<compile_context>
chip_gen: v7x
topology: tpu7x:2x2x1
jax: 0.10.0
libtpu: 0.0.40
codegen_flags: <defaults>
</compile_context>

<pallas_src>
import math

import jax
import jax.numpy as jnp
import numpy as np
from jax import lax
from jax.experimental import pallas as pl
from jax.experimental.pallas import tpu as pltpu

EPS = 1e-5


# ---------------------------------------------------------------------------
# Fused DenseBlock kernel (all SingleLayers + Transition in one pallas_call)
# ---------------------------------------------------------------------------
def _make_dense_block_kernel(n_layers, cin, growth, H, W, cout):
    """Build the fused kernel for a fixed (n_layers, channels, spatial) configuration."""

    def kernel(*refs):
        # refs = x, [scale_i, shift_i, w9_i, b_i] * n_layers, scale_t, shift_t, wt, bt,
        #        o_ref, slab (VMEM f32), act (VMEM f32, spatially padded)
        x_ref = refs[0]
        o_ref = refs[1 + 4 * n_layers + 4]
        slab = refs[-2]   # (H, W, C_total)  raw (pre-BN) concatenated features
        act = refs[-1]    # (H+2, W+2, C_act) zero-padded activations for the 3x3 convs

        # Zero the padded activation buffer once per batch element: the border is never
        # written again, so padded positions stay exactly zero -> no border mask needed
        # (the folded BN shift cannot leak into the padding).
        act[...] = jnp.zeros_like(act)
        slab[:, :, :cin] = x_ref[...]

        c = cin
        for i in range(n_layers):
            scale_ref, shift_ref, w_ref, b_ref = refs[1 + 4 * i: 5 + 4 * i]

            # BN (eval, folded) + ReLU in f32; write interior of the padded buffer.
            a = jnp.maximum(slab[:, :, :c] * scale_ref[...] + shift_ref[...], 0.0)
            act[1:H + 1, 1:W + 1, :c] = a

            # im2col: the 9 shifted (H, W, c) patches concatenated on lanes -> a single
            # (H*W, 9c) @ (9c, growth) MXU matmul, bf16 operands, f32 accumulation.
            patches = [
                act[ky:ky + H, kx:kx + W, :c].reshape(H * W, c)
                for ky in range(3) for kx in range(3)
            ]
            im2col = jnp.concatenate(patches, axis=-1).astype(jnp.bfloat16)
            conv = jnp.dot(im2col, w_ref[...],
                           preferred_element_type=jnp.float32) + b_ref[...]

            # Dense connectivity: append the new features to the slab (channel concat).
            slab[:, :, c:c + growth] = conv.reshape(H, W, growth)
            c += growth

        # Transition: BN + ReLU + 1x1 conv over the full slab.
        scale_t, shift_t, wt_ref, bt_ref = refs[1 + 4 * n_layers: 5 + 4 * n_layers]
        at = jnp.maximum(slab[...] * scale_t[...] + shift_t[...], 0.0)
        out = jnp.dot(at.reshape(H * W, c).astype(jnp.bfloat16), wt_ref[...],
                      preferred_element_type=jnp.float32) + bt_ref[...]
        o_ref[...] = out.reshape(H, W, cout)

    return kernel


def _const_index_map(ndim):
    return lambda n: (0,) * ndim


# ---------------------------------------------------------------------------
# Parameter preparation (done ONCE, outside the forward path)
# ---------------------------------------------------------------------------
def _fold_bn(gamma, beta, mean, var):
    scale = gamma / jnp.sqrt(var + EPS)
    return scale, beta - mean * scale


def prepare_params(params):
    """Fold BN into per-channel scale/shift and re-layout conv weights (bf16, tap-major)."""
    layers = []
    for gamma, beta, mean, var, w, b in params["layers"]:
        cout, cin = w.shape[0], w.shape[1]
        scale, shift = _fold_bn(gamma, beta, mean, var)
        # torch (Cout, Cin, 3, 3) -> (ky, kx, Cin, Cout) -> (9*Cin, Cout); row = tap*Cin+ch
        w9 = jnp.transpose(w, (2, 3, 1, 0)).reshape(9 * cin, cout)
        layers.append((scale.reshape(1, 1, cin).astype(jnp.float32),
                       shift.reshape(1, 1, cin).astype(jnp.float32),
                       w9.astype(jnp.bfloat16),
                       b.reshape(1, cout).astype(jnp.float32)))
    gamma, beta, mean, var, w, b = params["trans"]
    cout, cin = w.shape[0], w.shape[1]
    scale, shift = _fold_bn(gamma, beta, mean, var)
    wt = jnp.transpose(w.reshape(cout, cin), (1, 0))            # (Cin, Cout)
    trans = (scale.reshape(1, 1, cin).astype(jnp.float32),
             shift.reshape(1, 1, cin).astype(jnp.float32),
             wt.astype(jnp.bfloat16),
             b.reshape(1, cout).astype(jnp.float32))
    return layers, trans


# ---------------------------------------------------------------------------
# Forward wrapper
# ---------------------------------------------------------------------------
def dense_block_forward(x_nchw, layer_params, trans_params):
    """Fused DenseBlock forward. Input / output are NCHW (PyTorch convention)."""
    x = jnp.transpose(x_nchw, (0, 2, 3, 1)).astype(jnp.float32)   # NCHW -> NHWC
    N, H, W, cin = x.shape
    n_layers = len(layer_params)
    growth = layer_params[0][3].shape[-1]
    cout = trans_params[3].shape[-1]
    c_total = cin + n_layers * growth
    c_act = cin + (n_layers - 1) * growth      # widest 3x3-conv input channel count

    flat = [p for lp in layer_params for p in lp] + list(trans_params)

    in_specs = [pl.BlockSpec((None, H, W, cin), lambda n: (n, 0, 0, 0))]
    for p in flat:
        in_specs.append(pl.BlockSpec(p.shape, _const_index_map(p.ndim)))

    out = pl.pallas_call(
        _make_dense_block_kernel(n_layers, cin, growth, H, W, cout),
        out_shape=jax.ShapeDtypeStruct((N, H, W, cout), jnp.float32),
        grid=(N,),
        in_specs=in_specs,
        out_specs=pl.BlockSpec((None, H, W, cout), lambda n: (n, 0, 0, 0)),
        scratch_shapes=[
            pltpu.VMEM((H, W, c_total), jnp.float32),            # raw feature slab
            pltpu.VMEM((H + 2, W + 2, c_act), jnp.float32),      # zero-padded activations
        ],
        compiler_params=pltpu.CompilerParams(
            dimension_semantics=("parallel",)),                  # batch sharded across TCs
    )(x, *flat)
    return jnp.transpose(out, (0, 3, 1, 2))                      # NHWC -> NCHW


# ---------------------------------------------------------------------------
# Pure-JAX reference (f32, for correctness check)
# ---------------------------------------------------------------------------
def _ref_bn_relu(x, gamma, beta, mean, var):
    return jnp.maximum((x - mean) / jnp.sqrt(var + EPS) * gamma + beta, 0.0)


def ref_dense_block(x_nchw, params):
    x = jnp.transpose(x_nchw, (0, 2, 3, 1)).astype(jnp.float32)
    for gamma, beta, mean, var, w, b in params["layers"]:
        a = _ref_bn_relu(x, gamma, beta, mean, var)
        out = lax.conv_general_dilated(
            a, jnp.transpose(w, (2, 3, 1, 0)), (1, 1), "SAME",
            dimension_numbers=("NHWC", "HWIO", "NHWC"),
            precision=lax.Precision.HIGHEST) + b
        x = jnp.concatenate([x, out], axis=-1)
    gamma, beta, mean, var, w, b = params["trans"]
    a = _ref_bn_relu(x, gamma, beta, mean, var)
    y = lax.conv_general_dilated(
        a, jnp.transpose(w, (2, 3, 1, 0)), (1, 1), "SAME",
        dimension_numbers=("NHWC", "HWIO", "NHWC"),
        precision=lax.Precision.HIGHEST) + b
    return jnp.transpose(y, (0, 3, 1, 2))


# ---------------------------------------------------------------------------
# Deterministic parameter init (shapes follow the PyTorch module __init__)
# ---------------------------------------------------------------------------
def init_params(key, in_channels, growth_rate, n_layers, reduction):
    params = {"layers": []}
    c = in_channels
    keys = jax.random.split(key, n_layers + 1)
    for i in range(n_layers):
        k = jax.random.split(keys[i], 6)
        params["layers"].append((
            jax.random.uniform(k[0], (c,), jnp.float32, 0.5, 1.5),       # gamma
            0.1 * jax.random.normal(k[1], (c,), jnp.float32),            # beta
            0.1 * jax.random.normal(k[2], (c,), jnp.float32),            # running_mean
            jax.random.uniform(k[3], (c,), jnp.float32, 0.5, 1.5),       # running_var
            0.2 * jax.random.normal(k[4], (growth_rate, c, 3, 3), jnp.float32),
            0.1 * jax.random.normal(k[5], (growth_rate,), jnp.float32),
        ))
        c += growth_rate
    out_c = math.floor(c * reduction)
    k = jax.random.split(keys[-1], 6)
    params["trans"] = (
        jax.random.uniform(k[0], (c,), jnp.float32, 0.5, 1.5),
        0.1 * jax.random.normal(k[1], (c,), jnp.float32),
        0.1 * jax.random.normal(k[2], (c,), jnp.float32),
        jax.random.uniform(k[3], (c,), jnp.float32, 0.5, 1.5),
        0.2 * jax.random.normal(k[4], (out_c, c, 1, 1), jnp.float32),
        0.1 * jax.random.normal(k[5], (out_c,), jnp.float32),
    )
    return params, out_c


if __name__ == "__main__":
    # DenseBlock(in_channels=4, growth_rate=4, n_layers=2, reduction=0.5, bottleneck=False)
    N, C, H, W = 2, 4, 16, 16
    growth_rate, n_layers, reduction = 4, 2, 0.5

    key = jax.random.PRNGKey(0)
    kx, kp = jax.random.split(key)
    x = jax.random.normal(kx, (N, C, H, W), jnp.float32)          # NCHW like PyTorch
    params, out_c = init_params(kp, C, growth_rate, n_layers, reduction)

    layer_p, trans_p = prepare_params(params)                     # BN fold + weight layout (once)
    y = jax.block_until_ready(dense_block_forward(x, layer_p, trans_p))

    assert y.shape == (N, out_c, H, W), y.shape
    y_ref = jax.block_until_ready(ref_dense_block(x, params))
    # bf16 MXU operands with f32 accumulation (per perf review) -> tolerance vs the
    # full-f32 reference is relaxed accordingly.
    np.testing.assert_allclose(np.asarray(y), np.asarray(y_ref), rtol=2e-2, atol=3e-2)

    print("KERNEL_OK")
</pallas_src>

<mosaic_0001>
module attributes {stable_mosaic.version = 11 : i64} {
  func.func @kernel(%arg0: i32, %arg1: memref<1x16x16x4xf32, #tpu.memory_space<vmem>>, %arg2: memref<1x1x4xf32, #tpu.memory_space<vmem>>, %arg3: memref<1x1x4xf32, #tpu.memory_space<vmem>>, %arg4: memref<36x4xbf16, #tpu.memory_space<vmem>>, %arg5: memref<1x4xf32, #tpu.memory_space<vmem>>, %arg6: memref<1x1x8xf32, #tpu.memory_space<vmem>>, %arg7: memref<1x1x8xf32, #tpu.memory_space<vmem>>, %arg8: memref<72x4xbf16, #tpu.memory_space<vmem>>, %arg9: memref<1x4xf32, #tpu.memory_space<vmem>>, %arg10: memref<1x1x12xf32, #tpu.memory_space<vmem>>, %arg11: memref<1x1x12xf32, #tpu.memory_space<vmem>>, %arg12: memref<12x6xbf16, #tpu.memory_space<vmem>>, %arg13: memref<1x6xf32, #tpu.memory_space<vmem>>, %arg14: memref<1x16x16x6xf32, #tpu.memory_space<vmem>>, %arg15: memref<16x16x12xf32, #tpu.memory_space<vmem>>, %arg16: memref<18x18x8xf32, #tpu.memory_space<vmem>>) attributes {dimension_semantics = [#tpu.dimension_semantics<parallel>], iteration_bounds = array<i64: 2>, scalar_prefetch = 0 : i64, scratch_operands = 2 : i64, tpu.core_type = #tpu.core_type<tc>, window_params = [{transform_indices = @transform_0, window_bounds = array<i64: 1, 16, 16, 4>}, {pipeline_mode = #tpu.pipeline_mode<synchronous>, transform_indices = @transform_1, window_bounds = array<i64: 1, 1, 4>}, {pipeline_mode = #tpu.pipeline_mode<synchronous>, transform_indices = @transform_2, window_bounds = array<i64: 1, 1, 4>}, {pipeline_mode = #tpu.pipeline_mode<synchronous>, transform_indices = @transform_3, window_bounds = array<i64: 36, 4>}, {pipeline_mode = #tpu.pipeline_mode<synchronous>, transform_indices = @transform_4, window_bounds = array<i64: 1, 4>}, {pipeline_mode = #tpu.pipeline_mode<synchronous>, transform_indices = @transform_5, window_bounds = array<i64: 1, 1, 8>}, {pipeline_mode = #tpu.pipeline_mode<synchronous>, transform_indices = @transform_6, window_bounds = array<i64: 1, 1, 8>}, {pipeline_mode = #tpu.pipeline_mode<synchronous>, transform_indices = @transform_7, window_bounds = array<i64: 72, 4>}, {pipeline_mode = #tpu.pipeline_mode<synchronous>, transform_indices = @transform_8, window_bounds = array<i64: 1, 4>}, {pipeline_mode = #tpu.pipeline_mode<synchronous>, transform_indices = @transform_9, window_bounds = array<i64: 1, 1, 12>}, {pipeline_mode = #tpu.pipeline_mode<synchronous>, transform_indices = @transform_10, window_bounds = array<i64: 1, 1, 12>}, {pipeline_mode = #tpu.pipeline_mode<synchronous>, transform_indices = @transform_11, window_bounds = array<i64: 12, 6>}, {pipeline_mode = #tpu.pipeline_mode<synchronous>, transform_indices = @transform_12, window_bounds = array<i64: 1, 6>}, {transform_indices = @transform_13, window_bounds = array<i64: 1, 16, 16, 6>}]} {
    %cst = arith.constant 0.000000e+00 : f32
    %0 = vector.broadcast %cst : f32 to vector<18x18x8xf32>
    %c0 = arith.constant 0 : index
    %c0_0 = arith.constant 0 : index
    %c0_1 = arith.constant 0 : index
    %1 = vector.load %arg16[%c0, %c0_0, %c0_1] : memref<18x18x8xf32, #tpu.memory_space<vmem>>, vector<18x18x8xf32>
    tpu.vector_store %arg16[%c0, %c0_0, %c0_1], %0 {strides = array<i32>} : memref<18x18x8xf32, #tpu.memory_space<vmem>>, vector<18x18x8xf32>,
    %c0_2 = arith.constant 0 : index
    %c0_3 = arith.constant 0 : index
    %c0_4 = arith.constant 0 : index
    %c0_5 = arith.constant 0 : index
    %2 = vector.load %arg1[%c0_2, %c0_3, %c0_4, %c0_5] : memref<1x16x16x4xf32, #tpu.memory_space<vmem>>, vector<1x16x16x4xf32>
    %3 = vector.shape_cast %2 : vector<1x16x16x4xf32> to vector<16x16x4xf32>
    %c0_6 = arith.constant 0 : index
    %c0_7 = arith.constant 0 : index
    %c0_8 = arith.constant 0 : index
    %4 = vector.load %arg15[%c0_6, %c0_7, %c0_8] : memref<16x16x12xf32, #tpu.memory_space<vmem>>, vector<16x16x4xf32>
    tpu.vector_store %arg15[%c0_6, %c0_7, %c0_8], %3 {strides = array<i32>} : memref<16x16x12xf32, #tpu.memory_space<vmem>>, vector<16x16x4xf32>,
    %c0_9 = arith.constant 0 : index
    %c0_10 = arith.constant 0 : index
    %c0_11 = arith.constant 0 : index
    %5 = vector.load %arg15[%c0_9, %c0_10, %c0_11] : memref<16x16x12xf32, #tpu.memory_space<vmem>>, vector<16x16x4xf32>
    %c0_12 = arith.constant 0 : index
    %c0_13 = arith.constant 0 : index
    %c0_14 = arith.constant 0 : index
    %6 = vector.load %arg2[%c0_12, %c0_13, %c0_14] : memref<1x1x4xf32, #tpu.memory_space<vmem>>, vector<1x1x4xf32>
    %7 = vector.broadcast %6 : vector<1x1x4xf32> to vector<16x16x4xf32>
    %8 = arith.mulf %5, %7 : vector<16x16x4xf32>
    %c0_15 = arith.constant 0 : index
    %c0_16 = arith.constant 0 : index
    %c0_17 = arith.constant 0 : index
    %9 = vector.load %arg3[%c0_15, %c0_16, %c0_17] : memref<1x1x4xf32, #tpu.memory_space<vmem>>, vector<1x1x4xf32>
    %10 = vector.broadcast %9 : vector<1x1x4xf32> to vector<16x16x4xf32>
    %11 = arith.addf %8, %10 : vector<16x16x4xf32>
    %cst_18 = arith.constant 0.000000e+00 : f32
    %12 = vector.broadcast %cst_18 : f32 to vector<16x16x4xf32>
    %13 = arith.maximumf %11, %12 : vector<16x16x4xf32>
    %c1 = arith.constant 1 : index
    %c1_19 = arith.constant 1 : index
    %c0_20 = arith.constant 0 : index
    %14 = vector.load %arg16[%c1, %c1_19, %c0_20] : memref<18x18x8xf32, #tpu.memory_space<vmem>>, vector<16x16x4xf32>
    tpu.vector_store %arg16[%c1, %c1_19, %c0_20], %13 {strides = array<i32>} : memref<18x18x8xf32, #tpu.memory_space<vmem>>, vector<16x16x4xf32>,
    %c0_21 = arith.constant 0 : index
    %c0_22 = arith.constant 0 : index
    %c0_23 = arith.constant 0 : index
    %15 = vector.load %arg16[%c0_21, %c0_22, %c0_23] : memref<18x18x8xf32, #tpu.memory_space<vmem>>, vector<16x16x4xf32>
    %16 = vector.shape_cast %15 : vector<16x16x4xf32> to vector<256x4xf32>
    %c0_24 = arith.constant 0 : index
    %c1_25 = arith.constant 1 : index
    %c0_26 = arith.constant 0 : index
    %17 = vector.load %arg16[%c0_24, %c1_25, %c0_26] : memref<18x18x8xf32, #tpu.memory_space<vmem>>, vector<16x16x4xf32>
    %18 = vector.shape_cast %17 : vector<16x16x4xf32> to vector<256x4xf32>
    %c0_27 = arith.constant 0 : index
    %c2 = arith.constant 2 : index
    %c0_28 = arith.constant 0 : index
    %19 = vector.load %arg16[%c0_27, %c2, %c0_28] : memref<18x18x8xf32, #tpu.memory_space<vmem>>, vector<16x16x4xf32>
    %20 = vector.shape_cast %19 : vector<16x16x4xf32> to vector<256x4xf32>
    %c1_29 = arith.constant 1 : index
    %c0_30 = arith.constant 0 : index
    %c0_31 = arith.constant 0 : index
    %21 = vector.load %arg16[%c1_29, %c0_30, %c0_31] : memref<18x18x8xf32, #tpu.memory_space<vmem>>, vector<16x16x4xf32>
    %22 = vector.shape_cast %21 : vector<16x16x4xf32> to vector<256x4xf32>
    %c1_32 = arith.constant 1 : index
    %c1_33 = arith.constant 1 : index
    %c0_34 = arith.constant 0 : index
    %23 = vector.load %arg16[%c1_32, %c1_33, %c0_34] : memref<18x18x8xf32, #tpu.memory_space<vmem>>, vector<16x16x4xf32>
    %24 = vector.shape_cast %23 : vector<16x16x4xf32> to vector<256x4xf32>
    %c1_35 = arith.constant 1 : index
    %c2_36 = arith.constant 2 : index
    %c0_37 = arith.constant 0 : index
    %25 = vector.load %arg16[%c1_35, %c2_36, %c0_37] : memref<18x18x8xf32, #tpu.memory_space<vmem>>, vector<16x16x4xf32>
    %26 = vector.shape_cast %25 : vector<16x16x4xf32> to vector<256x4xf32>
    %c2_38 = arith.constant 2 : index
    %c0_39 = arith.constant 0 : index
    %c0_40 = arith.constant 0 : index
    %27 = vector.load %arg16[%c2_38, %c0_39, %c0_40] : memref<18x18x8xf32, #tpu.memory_space<vmem>>, vector<16x16x4xf32>
    %28 = vector.shape_cast %27 : vector<16x16x4xf32> to vector<256x4xf32>
    %c2_41 = arith.constant 2 : index
    %c1_42 = arith.constant 1 : index
    %c0_43 = arith.constant 0 : index
    %29 = vector.load %arg16[%c2_41, %c1_42, %c0_43] : memref<18x18x8xf32, #tpu.memory_space<vmem>>, vector<16x16x4xf32>
    %30 = vector.shape_cast %29 : vector<16x16x4xf32> to vector<256x4xf32>
    %c2_44 = arith.constant 2 : index
    %c2_45 = arith.constant 2 : index
    %c0_46 = arith.constant 0 : index
    %31 = vector.load %arg16[%c2_44, %c2_45, %c0_46] : memref<18x18x8xf32, #tpu.memory_space<vmem>>, vector<16x16x4xf32>
    %32 = vector.shape_cast %31 : vector<16x16x4xf32> to vector<256x4xf32>
    %33 = tpu.concatenate %16, %18, %20, %22, %24, %26, %28, %30, %32 in 1 : vector<256x4xf32>, vector<256x4xf32>, vector<256x4xf32>, vector<256x4xf32>, vector<256x4xf32>, vector<256x4xf32>, vector<256x4xf32>, vector<256x4xf32>, vector<256x4xf32> -> vector<256x36xf32>
    %34 = arith.truncf %33 : vector<256x36xf32> to vector<256x36xbf16>
    %c0_47 = arith.constant 0 : index
    %c0_48 = arith.constant 0 : index
    %35 = vector.load %arg4[%c0_47, %c0_48] : memref<36x4xbf16, #tpu.memory_space<vmem>>, vector<36x4xbf16>
    %cst_49 = arith.constant dense<0.000000e+00> : vector<256x4xf32>
    %36 = tpu.matmul %34, %35, %cst_49 {dimension_numbers = #tpu.dot_dimension_numbers<[1], [0], [0], [1], [0, 0, 1, 1], [], []>} : vector<256x36xbf16>, vector<36x4xbf16>, vector<256x4xf32> -> vector<256x4xf32>
    %c0_50 = arith.constant 0 : index
    %c0_51 = arith.constant 0 : index
    %37 = vector.load %arg5[%c0_50, %c0_51] : memref<1x4xf32, #tpu.memory_space<vmem>>, vector<1x4xf32>
    %38 = vector.broadcast %37 : vector<1x4xf32> to vector<256x4xf32>
    %39 = arith.addf %36, %38 : vector<256x4xf32>
    %40 = vector.shape_cast %39 : vector<256x4xf32> to vector<16x16x4xf32>
    %c0_52 = arith.constant 0 : index
    %c0_53 = arith.constant 0 : index
    %c4 = arith.constant 4 : index
    %41 = vector.load %arg15[%c0_52, %c0_53, %c4] : memref<16x16x12xf32, #tpu.memory_space<vmem>>, vector<16x16x4xf32>
    tpu.vector_store %arg15[%c0_52, %c0_53, %c4], %40 {strides = array<i32>} : memref<16x16x12xf32, #tpu.memory_space<vmem>>, vector<16x16x4xf32>,
    %c0_54 = arith.constant 0 : index
    %c0_55 = arith.constant 0 : index
    %c0_56 = arith.constant 0 : index
    %42 = vector.load %arg15[%c0_54, %c0_55, %c0_56] : memref<16x16x12xf32, #tpu.memory_space<vmem>>, vector<16x16x8xf32>
    %c0_57 = arith.constant 0 : index
    %c0_58 = arith.constant 0 : index
    %c0_59 = arith.constant 0 : index
    %43 = vector.load %arg6[%c0_57, %c0_58, %c0_59] : memref<1x1x8xf32, #tpu.memory_space<vmem>>, vector<1x1x8xf32>
    %44 = vector.broadcast %43 : vector<1x1x8xf32> to vector<16x16x8xf32>
    %45 = arith.mulf %42, %44 : vector<16x16x8xf32>
    %c0_60 = arith.constant 0 : index
    %c0_61 = arith.constant 0 : index
    %c0_62 = arith.constant 0 : index
    %46 = vector.load %arg7[%c0_60, %c0_61, %c0_62] : memref<1x1x8xf32, #tpu.memory_space<vmem>>, vector<1x1x8xf32>
    %47 = vector.broadcast %46 : vector<1x1x8xf32> to vector<16x16x8xf32>
    %48 = arith.addf %45, %47 : vector<16x16x8xf32>
    %cst_63 = arith.constant 0.000000e+00 : f32
    %49 = vector.broadcast %cst_63 : f32 to vector<16x16x8xf32>
    %50 = arith.maximumf %48, %49 : vector<16x16x8xf32>
    %c1_64 = arith.constant 1 : index
    %c1_65 = arith.constant 1 : index
    %c0_66 = arith.constant 0 : index
    %51 = vector.load %arg16[%c1_64, %c1_65, %c0_66] : memref<18x18x8xf32, #tpu.memory_space<vmem>>, vector<16x16x8xf32>
    tpu.vector_store %arg16[%c1_64, %c1_65, %c0_66], %50 {strides = array<i32>} : memref<18x18x8xf32, #tpu.memory_space<vmem>>, vector<16x16x8xf32>,
    %c0_67 = arith.constant 0 : index
    %c0_68 = arith.constant 0 : index
    %c0_69 = arith.constant 0 : index
    %52 = vector.load %arg16[%c0_67, %c0_68, %c0_69] : memref<18x18x8xf32, #tpu.memory_space<vmem>>, vector<16x16x8xf32>
    %53 = vector.shape_cast %52 : vector<16x16x8xf32> to vector<256x8xf32>
    %c0_70 = arith.constant 0 : index
    %c1_71 = arith.constant 1 : index
    %c0_72 = arith.constant 0 : index
    %54 = vector.load %arg16[%c0_70, %c1_71, %c0_72] : memref<18x18x8xf32, #tpu.memory_space<vmem>>, vector<16x16x8xf32>
    %55 = vector.shape_cast %54 : vector<16x16x8xf32> to vector<256x8xf32>
    %c0_73 = arith.constant 0 : index
    %c2_74 = arith.constant 2 : index
    %c0_75 = arith.constant 0 : index
    %56 = vector.load %arg16[%c0_73, %c2_74, %c0_75] : memref<18x18x8xf32, #tpu.memory_space<vmem>>, vector<16x16x8xf32>
    %57 = vector.shape_cast %56 : vector<16x16x8xf32> to vector<256x8xf32>
    %c1_76 = arith.constant 1 : index
    %c0_77 = arith.constant 0 : index
    %c0_78 = arith.constant 0 : index
    %58 = vector.load %arg16[%c1_76, %c0_77, %c0_78] : memref<18x18x8xf32, #tpu.memory_space<vmem>>, vector<16x16x8xf32>
    %59 = vector.shape_cast %58 : vector<16x16x8xf32> to vector<256x8xf32>
    %c1_79 = arith.constant 1 : index
    %c1_80 = arith.constant 1 : index
    %c0_81 = arith.constant 0 : index
    %60 = vector.load %arg16[%c1_79, %c1_80, %c0_81] : memref<18x18x8xf32, #tpu.memory_space<vmem>>, vector<16x16x8xf32>
    %61 = vector.shape_cast %60 : vector<16x16x8xf32> to vector<256x8xf32>
    %c1_82 = arith.constant 1 : index
    %c2_83 = arith.constant 2 : index
    %c0_84 = arith.constant 0 : index
    %62 = vector.load %arg16[%c1_82, %c2_83, %c0_84] : memref<18x18x8xf32, #tpu.memory_space<vmem>>, vector<16x16x8xf32>
    %63 = vector.shape_cast %62 : vector<16x16x8xf32> to vector<256x8xf32>
    %c2_85 = arith.constant 2 : index
    %c0_86 = arith.constant 0 : index
    %c0_87 = arith.constant 0 : index
    %64 = vector.load %arg16[%c2_85, %c0_86, %c0_87] : memref<18x18x8xf32, #tpu.memory_space<vmem>>, vector<16x16x8xf32>
    %65 = vector.shape_cast %64 : vector<16x16x8xf32> to vector<256x8xf32>
    %c2_88 = arith.constant 2 : index
    %c1_89 = arith.constant 1 : index
    %c0_90 = arith.constant 0 : index
    %66 = vector.load %arg16[%c2_88, %c1_89, %c0_90] : memref<18x18x8xf32, #tpu.memory_space<vmem>>, vector<16x16x8xf32>
    %67 = vector.shape_cast %66 : vector<16x16x8xf32> to vector<256x8xf32>
    %c2_91 = arith.constant 2 : index
    %c2_92 = arith.constant 2 : index
    %c0_93 = arith.constant 0 : index
    %68 = vector.load %arg16[%c2_91, %c2_92, %c0_93] : memref<18x18x8xf32, #tpu.memory_space<vmem>>, vector<16x16x8xf32>
    %69 = vector.shape_cast %68 : vector<16x16x8xf32> to vector<256x8xf32>
    %70 = tpu.concatenate %53, %55, %57, %59, %61, %63, %65, %67, %69 in 1 : vector<256x8xf32>, vector<256x8xf32>, vector<256x8xf32>, vector<256x8xf32>, vector<256x8xf32>, vector<256x8xf32>, vector<256x8xf32>, vector<256x8xf32>, vector<256x8xf32> -> vector<256x72xf32>
    %71 = arith.truncf %70 : vector<256x72xf32> to vector<256x72xbf16>
    %c0_94 = arith.constant 0 : index
    %c0_95 = arith.constant 0 : index
    %72 = vector.load %arg8[%c0_94, %c0_95] : memref<72x4xbf16, #tpu.memory_space<vmem>>, vector<72x4xbf16>
    %cst_96 = arith.constant dense<0.000000e+00> : vector<256x4xf32>
    %73 = tpu.matmul %71, %72, %cst_96 {dimension_numbers = #tpu.dot_dimension_numbers<[1], [0], [0], [1], [0, 0, 1, 1], [], []>} : vector<256x72xbf16>, vector<72x4xbf16>, vector<256x4xf32> -> vector<256x4xf32>
    %c0_97 = arith.constant 0 : index
    %c0_98 = arith.constant 0 : index
    %74 = vector.load %arg9[%c0_97, %c0_98] : memref<1x4xf32, #tpu.memory_space<vmem>>, vector<1x4xf32>
    %75 = vector.broadcast %74 : vector<1x4xf32> to vector<256x4xf32>
    %76 = arith.addf %73, %75 : vector<256x4xf32>
    %77 = vector.shape_cast %76 : vector<256x4xf32> to vector<16x16x4xf32>
    %c0_99 = arith.constant 0 : index
    %c0_100 = arith.constant 0 : index
    %c8 = arith.constant 8 : index
    %78 = vector.load %arg15[%c0_99, %c0_100, %c8] : memref<16x16x12xf32, #tpu.memory_space<vmem>>, vector<16x16x4xf32>
    tpu.vector_store %arg15[%c0_99, %c0_100, %c8], %77 {strides = array<i32>} : memref<16x16x12xf32, #tpu.memory_space<vmem>>, vector<16x16x4xf32>,
    %c0_101 = arith.constant 0 : index
    %c0_102 = arith.constant 0 : index
    %c0_103 = arith.constant 0 : index
    %79 = vector.load %arg15[%c0_101, %c0_102, %c0_103] : memref<16x16x12xf32, #tpu.memory_space<vmem>>, vector<16x16x12xf32>
    %c0_104 = arith.constant 0 : index
    %c0_105 = arith.constant 0 : index
    %c0_106 = arith.constant 0 : index
    %80 = vector.load %arg10[%c0_104, %c0_105, %c0_106] : memref<1x1x12xf32, #tpu.memory_space<vmem>>, vector<1x1x12xf32>
    %81 = vector.broadcast %80 : vector<1x1x12xf32> to vector<16x16x12xf32>
    %82 = arith.mulf %79, %81 : vector<16x16x12xf32>
    %c0_107 = arith.constant 0 : index
    %c0_108 = arith.constant 0 : index
    %c0_109 = arith.constant 0 : index
    %83 = vector.load %arg11[%c0_107, %c0_108, %c0_109] : memref<1x1x12xf32, #tpu.memory_space<vmem>>, vector<1x1x12xf32>
    %84 = vector.broadcast %83 : vector<1x1x12xf32> to vector<16x16x12xf32>
    %85 = arith.addf %82, %84 : vector<16x16x12xf32>
    %cst_110 = arith.constant 0.000000e+00 : f32
    %86 = vector.broadcast %cst_110 : f32 to vector<16x16x12xf32>
    %87 = arith.maximumf %85, %86 : vector<16x16x12xf32>
    %88 = vector.shape_cast %87 : vector<16x16x12xf32> to vector<256x12xf32>
    %89 = arith.truncf %88 : vector<256x12xf32> to vector<256x12xbf16>
    %c0_111 = arith.constant 0 : index
    %c0_112 = arith.constant 0 : index
    %90 = vector.load %arg12[%c0_111, %c0_112] : memref<12x6xbf16, #tpu.memory_space<vmem>>, vector<12x6xbf16>
    %cst_113 = arith.constant dense<0.000000e+00> : vector<256x6xf32>
    %91 = tpu.matmul %89, %90, %cst_113 {dimension_numbers = #tpu.dot_dimension_numbers<[1], [0], [0], [1], [0, 0, 1, 1], [], []>} : vector<256x12xbf16>, vector<12x6xbf16>, vector<256x6xf32> -> vector<256x6xf32>
    %c0_114 = arith.constant 0 : index
    %c0_115 = arith.constant 0 : index
    %92 = vector.load %arg13[%c0_114, %c0_115] : memref<1x6xf32, #tpu.memory_space<vmem>>, vector<1x6xf32>
    %93 = vector.broadcast %92 : vector<1x6xf32> to vector<256x6xf32>
    %94 = arith.addf %91, %93 : vector<256x6xf32>
    %95 = vector.shape_cast %94 : vector<256x6xf32> to vector<16x16x6xf32>
    %c0_116 = arith.constant 0 : index
    %c0_117 = arith.constant 0 : index
    %c0_118 = arith.constant 0 : index
    %c0_119 = arith.constant 0 : index
    %96 = vector.load %arg14[%c0_116, %c0_117, %c0_118, %c0_119] : memref<1x16x16x6xf32, #tpu.memory_space<vmem>>, vector<1x16x16x6xf32>
    %97 = vector.shape_cast %96 : vector<1x16x16x6xf32> to vector<16x16x6xf32>
    %98 = vector.shape_cast %95 : vector<16x16x6xf32> to vector<1x16x16x6xf32>
    tpu.vector_store %arg14[%c0_116, %c0_117, %c0_118, %c0_119], %98 {strides = array<i32>} : memref<1x16x16x6xf32, #tpu.memory_space<vmem>>, vector<1x16x16x6xf32>,
    return
  }
  func.func @transform_0(%arg0: i32) -> (i32, i32, i32, i32) {
    %c0_i32 = arith.constant 0 : i32
    %c0_i32_0 = arith.constant 0 : i32
    %c0_i32_1 = arith.constant 0 : i32
    %c0_i32_2 = arith.constant 0 : i32
    return %arg0, %c0_i32, %c0_i32_0, %c0_i32_1 : i32, i32, i32, i32
  }
  func.func @transform_1(%arg0: i32) -> (i32, i32, i32) {
    %c0_i32 = arith.constant 0 : i32
    %c0_i32_0 = arith.constant 0 : i32
    %c0_i32_1 = arith.constant 0 : i32
    %c0_i32_2 = arith.constant 0 : i32
    return %c0_i32, %c0_i32_0, %c0_i32_1 : i32, i32, i32
  }
  func.func @transform_2(%arg0: i32) -> (i32, i32, i32) {
    %c0_i32 = arith.constant 0 : i32
    %c0_i32_0 = arith.constant 0 : i32
    %c0_i32_1 = arith.constant 0 : i32
    %c0_i32_2 = arith.constant 0 : i32
    return %c0_i32, %c0_i32_0, %c0_i32_1 : i32, i32, i32
  }
  func.func @transform_3(%arg0: i32) -> (i32, i32) {
    %c0_i32 = arith.constant 0 : i32
    %c0_i32_0 = arith.constant 0 : i32
    %c0_i32_1 = arith.constant 0 : i32
    return %c0_i32, %c0_i32_0 : i32, i32
  }
  func.func @transform_4(%arg0: i32) -> (i32, i32) {
    %c0_i32 = arith.constant 0 : i32
    %c0_i32_0 = arith.constant 0 : i32
    %c0_i32_1 = arith.constant 0 : i32
    return %c0_i32, %c0_i32_0 : i32, i32
  }
  func.func @transform_5(%arg0: i32) -> (i32, i32, i32) {
    %c0_i32 = arith.constant 0 : i32
    %c0_i32_0 = arith.constant 0 : i32
    %c0_i32_1 = arith.constant 0 : i32
    %c0_i32_2 = arith.constant 0 : i32
    return %c0_i32, %c0_i32_0, %c0_i32_1 : i32, i32, i32
  }
  func.func @transform_6(%arg0: i32) -> (i32, i32, i32) {
    %c0_i32 = arith.constant 0 : i32
    %c0_i32_0 = arith.constant 0 : i32
    %c0_i32_1 = arith.constant 0 : i32
    %c0_i32_2 = arith.constant 0 : i32
    return %c0_i32, %c0_i32_0, %c0_i32_1 : i32, i32, i32
  }
  func.func @transform_7(%arg0: i32) -> (i32, i32) {
    %c0_i32 = arith.constant 0 : i32
    %c0_i32_0 = arith.constant 0 : i32
    %c0_i32_1 = arith.constant 0 : i32
    return %c0_i32, %c0_i32_0 : i32, i32
  }
  func.func @transform_8(%arg0: i32) -> (i32, i32) {
    %c0_i32 = arith.constant 0 : i32
    %c0_i32_0 = arith.constant 0 : i32
    %c0_i32_1 = arith.constant 0 : i32
    return %c0_i32, %c0_i32_0 : i32, i32
  }
  func.func @transform_9(%arg0: i32) -> (i32, i32, i32) {
    %c0_i32 = arith.constant 0 : i32
    %c0_i32_0 = arith.constant 0 : i32
    %c0_i32_1 = arith.constant 0 : i32
    %c0_i32_2 = arith.constant 0 : i32
    return %c0_i32, %c0_i32_0, %c0_i32_1 : i32, i32, i32
  }
  func.func @transform_10(%arg0: i32) -> (i32, i32, i32) {
    %c0_i32 = arith.constant 0 : i32
    %c0_i32_0 = arith.constant 0 : i32
    %c0_i32_1 = arith.constant 0 : i32
    %c0_i32_2 = arith.constant 0 : i32
    return %c0_i32, %c0_i32_0, %c0_i32_1 : i32, i32, i32
  }
  func.func @transform_11(%arg0: i32) -> (i32, i32) {
    %c0_i32 = arith.constant 0 : i32
    %c0_i32_0 = arith.constant 0 : i32
    %c0_i32_1 = arith.constant 0 : i32
    return %c0_i32, %c0_i32_0 : i32, i32
  }
  func.func @transform_12(%arg0: i32) -> (i32, i32) {
    %c0_i32 = arith.constant 0 : i32
    %c0_i32_0 = arith.constant 0 : i32
    %c0_i32_1 = arith.constant 0 : i32
    return %c0_i32, %c0_i32_0 : i32, i32
  }
  func.func @transform_13(%arg0: i32) -> (i32, i32, i32, i32) {
    %c0_i32 = arith.constant 0 : i32
    %c0_i32_0 = arith.constant 0 : i32
    %c0_i32_1 = arith.constant 0 : i32
    %c0_i32_2 = arith.constant 0 : i32
    return %arg0, %c0_i32, %c0_i32_0, %c0_i32_1 : i32, i32, i32, i32
  }
}

</mosaic_0001>

<bundles_post_ra>
// kernel: tpu_custom_call.1
= control target key start
LH: loop header
LB: loop body
LE: loop exit
PB: predicated region body
PF: predicated region fallthrough
CT: control target
= control target key end

     0   :  { %s7073_s25 = smov 0   ;;  %s9528_s0 = inlined_call_operand.vmem [shape: f32[2,16,16,4], index: 0, kind: input, shape index: {}]   ;;  %s9529_s1 = inlined_call_operand.vmem [shape: f32[1,1,4], index: 1, kind: input, shape index: {}]   ;;  %s9530_s2 = inlined_call_operand.vmem [shape: f32[1,1,4], index: 2, kind: input, shape index: {}]   ;;  %s9531_s3 = inlined_call_operand.vmem [shape: bf16[36,4], index: 3, kind: input, shape index: {}]   ;;  %s9532_s4 = inlined_call_operand.vmem [shape: f32[1,4], index: 4, kind: input, shape index: {}]   ;;  %s9533_s5 = inlined_call_operand.vmem [shape: f32[1,1,8], index: 5, kind: input, shape index: {}]   ;;  %s9534_s6 = inlined_call_operand.vmem [shape: f32[1,1,8], index: 6, kind: input, shape index: {}]   ;;  %s9535_s7 = inlined_call_operand.vmem [shape: bf16[72,4], index: 7, kind: input, shape index: {}]   ;;  %s9536_s8 = inlined_call_operand.vmem [shape: f32[1,4], index: 8, kind: input, shape index: {}]   ;;  %s9537_s9 = inlined_call_operand.vmem [shape: f32[1,1,12], index: 9, kind: input, shape index: {}]   ;;  %s9538_s10 = inlined_call_operand.vmem [shape: f32[1,1,12], index: 10, kind: input, shape index: {}]   ;;  %s9539_s11 = inlined_call_operand.vmem [shape: bf16[12,6], index: 11, kind: input, shape index: {}]   ;;  %s9540_s12 = inlined_call_operand.vmem [shape: f32[1,6], index: 12, kind: input, shape index: {}]   ;;  %s9541_s13 = inlined_call_operand.vmem [shape: f32[2,16,16,6], index: 13, kind: output, shape index: {}]  }
   0x1 LB: > { %s5384_s26 = sadd.s32 4294967295, %s6988_s25   ;;  %p5388_p0 = scmp.ge.s32.totalorder %s6988_s25, 1  ;;  %s6988_s25 = sphi %s7073_s25, %s23_s25  }
   0x2   : > { %p387_p1 = scmp.lt.s32.totalorder %s6988_s25, 3 }
   0x4   : > { %p388_p2 = pnand %p5388_p0, %p387_p1 }
   0x6   : > { %391 = sbr.rel (%p388_p2) target bundleno = 1639 (0x667), region = 72 }
   0xd   : > { %vm442_vm0 = vcmask 64512   ;;  %vm445_vm1 = vcmask 58368   ;;  %p7083_p3 = scmp.lt.s32.totalorder %s5384_s26, 1  ;;  %v6990_v0 = vmov 0.0   ;;  %vm530_vm2 = vcmask 31744   ;;  %s6991_s17 = smov 4  }
   0xe   : > { %443 = vst.msk [vmem:[#allocation3] sm:$0xff] %vm442_vm0, %v6990_v0  ;;  %444 = vst.msk [vmem:[#allocation3 + $0x8] sm:$0xff] %vm442_vm0, %v6990_v0  ;;  %v7175_v14 = vld [vmem:[%s9529_s1] ss:$0 sm:$0xff]  ;;  %s6992_s20 = smov 8   ;;  %s6993_s21 = smov 12  }
   0xf   : > { %446 = vst.msk [vmem:[#allocation3 + $0x10] sm:$0x3] %vm445_vm1, %v6990_v0  ;;  %449 = vst.msk [vmem:[#allocation3 + $0x28] sm:$0x3] %vm445_vm1, %v6990_v0  ;;  %s9618_s26 = smov (!%p7083_p3, %s5384_s26), 1  ;;  %s6994_s24 = smov 16  }
  0x10   : > { %447 = vst.msk [vmem:[#allocation3 + $0x18] sm:$0xff] %vm442_vm0, %v6990_v0  ;;  %448 = vst.msk [vmem:[#allocation3 + $0x20] sm:$0xff] %vm442_vm0, %v6990_v0  ;;  %s5461_s28 = sshll.u32 %s9618_s26, 8  ;;  %v7193_v21 = vld [vmem:[%s9530_s2] ss:$0 sm:$0xff]  ;;  %s6995_s30 = smov 20  }
  0x11   : > { %450 = vst.msk [vmem:[#allocation3 + $0x30] sm:$0xff] %vm442_vm0, %v6990_v0  ;;  %451 = vst.msk [vmem:[#allocation3 + $0x38] sm:$0xff] %vm442_vm0, %v6990_v0  ;;  %s7153_s14 = scalar_lea.vmem %s9528_s0, %s5461_s28  ;;  %vm2405_vm3 = vcmask 1041408   ;;  %s6996_s18 = smov 24   ;;  %vm2115_vm4 = vcmask 97280   ;;  %vm2148_vm5 = vcmask 130048  }
  0x12   : > { %452 = vst.msk [vmem:[#allocation3 + $0x40] sm:$0x3] %vm445_vm1, %v6990_v0  ;;  %455 = vst.msk [vmem:[#allocation3 + $0x58] sm:$0x3] %vm445_vm1, %v6990_v0  ;;  %v500_v1 = vld [vmem:[%s7153_s14 + $0x10] sm:$0xff]  ;;  %v501_v2 = vld [vmem:[%s7153_s14 + $0x18] sm:$0xff]  ;;  %s9427_s23 = scalar_lea.vmem %s9541_s13, %s5461_s28 }
  0x13   : > { %453 = vst.msk [vmem:[#allocation3 + $0x48] sm:$0xff] %vm442_vm0, %v6990_v0  ;;  %454 = vst.msk [vmem:[#allocation3 + $0x50] sm:$0xff] %vm442_vm0, %v6990_v0  ;;  %v498_v3 = vld [vmem:[%s7153_s14] sm:$0xff]  ;;  %v499_v4 = vld [vmem:[%s7153_s14 + $0x8] sm:$0xff]  ;;  %s6997_s19 = smov 28   ;;  %vm2181_vm6 = vcmask 162816  }
  0x14   : > { %456 = vst.msk [vmem:[#allocation3 + $0x60] sm:$0xff] %vm442_vm0, %v6990_v0  ;;  %457 = vst.msk [vmem:[#allocation3 + $0x68] sm:$0xff] %vm442_vm0, %v6990_v0  ;;  %v502_v5 = vld [vmem:[%s7153_s14 + $0x20] sm:$0xff]  ;;  %v503_v6 = vld [vmem:[%s7153_s14 + $0x28] sm:$0xff]  ;;  %vm2214_vm7 = vcmask 195584   ;;  %vm2247_vm8 = vcmask 228352  }
  0x15   : > { %458 = vst.msk [vmem:[#allocation3 + $0x70] sm:$0x3] %vm445_vm1, %v6990_v0  ;;  %461 = vst.msk [vmem:[#allocation3 + $0x88] sm:$0x3] %vm445_vm1, %v6990_v0  ;;  %v770_v7 = vld [vmem:[#allocation3 + $0x1] sm:$0xff]  ;;  %v504_v9 = vld [vmem:[%s7153_s14 + $0x30] sm:$0xff] }
  0x16   : > { %459 = vst.msk [vmem:[#allocation3 + $0x78] sm:$0xff] %vm442_vm0, %v6990_v0  ;;  %460 = vst.msk [vmem:[#allocation3 + $0x80] sm:$0xff] %vm442_vm0, %v6990_v0  ;;  %v771_v8 = vld [vmem:[#allocation3 + $0x9] sm:$0xff]  ;;  %v505_v11 = vld [vmem:[%s7153_s14 + $0x38] sm:$0xff]  ;;  %vm2280_vm9 = vcmask 261120   ;;  %vm2356_vm10 = vcmask 293888  }
  0x17   : > { %462 = vst.msk [vmem:[#allocation3 + $0x90] sm:$0xff] %vm442_vm0, %v6990_v0  ;;  %463 = vst.msk [vmem:[#allocation3 + $0x98] sm:$0xff] %vm442_vm0, %v6990_v0  ;;  %v5665_v10 = vpack.i.bf16 %v771_v8, %v770_v7  ;;  %v506_v12 = vld [vmem:[%s7153_s14 + $0x40] sm:$0xff]  ;;  %v507_v13 = vld [vmem:[%s7153_s14 + $0x48] sm:$0xff]  ;;  %vm2698_vm11 = vcmask 64544   ;;  %s6999_s15 = smov 48  }
  0x18   : > { %464 = vst.msk [vmem:[#allocation3 + $0xa0] sm:$0x3] %vm445_vm1, %v6990_v0  ;;  %467 = vst.msk [vmem:[#allocation3 + $0xb8] sm:$0x3] %vm445_vm1, %v6990_v0  ;;  %v508_v15 = vld [vmem:[%s7153_s14 + $0x50] sm:$0xff]  ;;  %v509_v16 = vld [vmem:[%s7153_s14 + $0x58] sm:$0xff] }
  0x19   : > { %465 = vst.msk [vmem:[#allocation3 + $0xa8] sm:$0xff] %vm442_vm0, %v6990_v0  ;;  %466 = vst.msk [vmem:[#allocation3 + $0xb0] sm:$0xff] %vm442_vm0, %v6990_v0  ;;  %v510_v17 = vld [vmem:[%s7153_s14 + $0x60] sm:$0xff]  ;;  %5666 = vrot.lane.b32.xlu0 %v5665_v10, %s6991_s17  ;;  %v511_v18 = vld [vmem:[%s7153_s14 + $0x68] sm:$0xff]  ;;  %s7000_s16 = smov 56   ;;  %vm4585_vm12 = vcmask 1043456  }
  0x1a   : > { %468 = vst.msk [vmem:[#allocation3 + $0xc0] sm:$0xff] %vm442_vm0, %v6990_v0  ;;  %469 = vst.msk [vmem:[#allocation3 + $0xc8] sm:$0xff] %vm442_vm0, %v6990_v0  ;;  %v512_v19 = vld [vmem:[%s7153_s14 + $0x70] sm:$0xff]  ;;  %v513_v20 = vld [vmem:[%s7153_s14 + $0x78] sm:$0xff]  ;;  %vm4345_vm13 = vcmask 326656   ;;  %vm4378_vm14 = vcmask 392192  }
  0x1b   : > { %470 = vst.msk [vmem:[#allocation3 + $0xd0] sm:$0x3] %vm445_vm1, %v6990_v0  ;;  %473 = vst.msk [vmem:[#allocation3 + $0xe8] sm:$0x3] %vm445_vm1, %v6990_v0  ;;  %v514_v22 = vld [vmem:[%s7153_s14 + $0x80] sm:$0xff]  ;;  %v515_v23 = vld [vmem:[%s7153_s14 + $0x88] sm:$0xff] }
  0x1c   : > { %471 = vst.msk [vmem:[#allocation3 + $0xd8] sm:$0xff] %vm442_vm0, %v6990_v0  ;;  %472 = vst.msk [vmem:[#allocation3 + $0xe0] sm:$0xff] %vm442_vm0, %v6990_v0  ;;  %v516_v24 = vld [vmem:[%s7153_s14 + $0x90] sm:$0xff]  ;;  %v517_v25 = vld [vmem:[%s7153_s14 + $0x98] sm:$0xff]  ;;  %vm4411_vm15 = vcmask 457728  }
  0x1d   : > { %474 = vst.msk [vmem:[#allocation3 + $0xf0] sm:$0xff] %vm442_vm0, %v6990_v0  ;;  %475 = vst.msk [vmem:[#allocation3 + $0xf8] sm:$0xff] %vm442_vm0, %v6990_v0  ;;  %v518_v26 = vld [vmem:[%s7153_s14 + $0xa0] sm:$0xff]  ;;  %v519_v27 = vld [vmem:[%s7153_s14 + $0xa8] sm:$0xff] }
  0x1e   : > { %476 = vst.msk [vmem:[#allocation3 + $0x100] sm:$0x3] %vm445_vm1, %v6990_v0  ;;  %479 = vst.msk [vmem:[#allocation3 + $0x118] sm:$0x3] %vm445_vm1, %v6990_v0  ;;  %v520_v41 = vld [vmem:[%s7153_s14 + $0xb0] sm:$0xff]  ;;  %v521_v42 = vld [vmem:[%s7153_s14 + $0xb8] sm:$0xff] }
  0x1f   : > { %477 = vst.msk [vmem:[#allocation3 + $0x108] sm:$0xff] %vm442_vm0, %v6990_v0  ;;  %478 = vst.msk [vmem:[#allocation3 + $0x110] sm:$0xff] %vm442_vm0, %v6990_v0 }
  0x20   : > { %480 = vst.msk [vmem:[#allocation3 + $0x120] sm:$0xff] %vm442_vm0, %v6990_v0  ;;  %481 = vst.msk [vmem:[#allocation3 + $0x128] sm:$0xff] %vm442_vm0, %v6990_v0 }
  0x21   : > { %482 = vst.msk [vmem:[#allocation3 + $0x130] sm:$0x3] %vm445_vm1, %v6990_v0  ;;  %485 = vst.msk [vmem:[#allocation3 + $0x148] sm:$0x3] %vm445_vm1, %v6990_v0 }
  0x22   : > { %483 = vst.msk [vmem:[#allocation3 + $0x138] sm:$0xff] %vm442_vm0, %v6990_v0  ;;  %484 = vst.msk [vmem:[#allocation3 + $0x140] sm:$0xff] %vm442_vm0, %v6990_v0 }
  0x23   : > { %486 = vst.msk [vmem:[#allocation3 + $0x150] sm:$0xff] %vm442_vm0, %v6990_v0  ;;  %487 = vst.msk [vmem:[#allocation3 + $0x158] sm:$0xff] %vm442_vm0, %v6990_v0 }
  0x24   : > { %488 = vst.msk [vmem:[#allocation3 + $0x160] sm:$0x3] %vm445_vm1, %v6990_v0  ;;  %491 = vst.msk [vmem:[#allocation3 + $0x178] sm:$0x3] %vm445_vm1, %v6990_v0 }
  0x25   : > { %489 = vst.msk [vmem:[#allocation3 + $0x168] sm:$0xff] %vm442_vm0, %v6990_v0  ;;  %490 = vst.msk [vmem:[#allocation3 + $0x170] sm:$0xff] %vm442_vm0, %v6990_v0 }
  0x26   : > { %492 = vst.msk [vmem:[#allocation3 + $0x180] sm:$0xff] %vm442_vm0, %v6990_v0  ;;  %493 = vst.msk [vmem:[#allocation3 + $0x188] sm:$0xff] %vm442_vm0, %v6990_v0 }
  0x27   : > { %494 = vst.msk [vmem:[#allocation3 + $0x190] sm:$0x3] %vm445_vm1, %v6990_v0  ;;  %497 = vst.msk [vmem:[#allocation3 + $0x1a8] sm:$0x3] %vm445_vm1, %v6990_v0  ;;  %vm4444_vm1 = vcmask 523264  }
  0x28   : > { %495 = vst.msk [vmem:[#allocation3 + $0x198] sm:$0xff] %vm442_vm0, %v6990_v0  ;;  %496 = vst.msk [vmem:[#allocation3 + $0x1a0] sm:$0xff] %vm442_vm0, %v6990_v0 }
  0x29   : > { %533 = vst.msk [vmem:[#allocation2 + $0x10] sm:$0xff] %vm530_vm2, %v500_v1  ;;  %534 = vst.msk [vmem:[#allocation2 + $0x18] sm:$0xff] %vm530_vm2, %v501_v2 }
  0x2a   : > { %531 = vst.msk [vmem:[#allocation2] sm:$0xff] %vm530_vm2, %v498_v3  ;;  %532 = vst.msk [vmem:[#allocation2 + $0x8] sm:$0xff] %vm530_vm2, %v499_v4 }
  0x2b   : > { %535 = vst.msk [vmem:[#allocation2 + $0x20] sm:$0xff] %vm530_vm2, %v502_v5  ;;  %536 = vst.msk [vmem:[#allocation2 + $0x28] sm:$0xff] %vm530_vm2, %v503_v6 }
  0x2c   : > { %537 = vst.msk [vmem:[#allocation2 + $0x30] sm:$0xff] %vm530_vm2, %v504_v9  ;;  %538 = vst.msk [vmem:[#allocation2 + $0x38] sm:$0xff] %vm530_vm2, %v505_v11 }
  0x2d   : > { %539 = vst.msk [vmem:[#allocation2 + $0x40] sm:$0xff] %vm530_vm2, %v506_v12  ;;  %540 = vst.msk [vmem:[#allocation2 + $0x48] sm:$0xff] %vm530_vm2, %v507_v13  ;;  %v522_v12 = vld [vmem:[%s7153_s14 + $0xc0] sm:$0xff]  ;;  %v523_v13 = vld [vmem:[%s7153_s14 + $0xc8] sm:$0xff] }
  0x2e   : > { %541 = vst.msk [vmem:[#allocation2 + $0x50] sm:$0xff] %vm530_vm2, %v508_v15  ;;  %542 = vst.msk [vmem:[#allocation2 + $0x58] sm:$0xff] %vm530_vm2, %v509_v16  ;;  %v524_v15 = vld [vmem:[%s7153_s14 + $0xd0] sm:$0xff] }
  0x2f   : > { %543 = vst.msk [vmem:[#allocation2 + $0x60] sm:$0xff] %vm530_vm2, %v510_v17  ;;  %544 = vst.msk [vmem:[#allocation2 + $0x68] sm:$0xff] %vm530_vm2, %v511_v18 }
  0x30   : > { %545 = vst.msk [vmem:[#allocation2 + $0x70] sm:$0xff] %vm530_vm2, %v512_v19  ;;  %546 = vst.msk [vmem:[#allocation2 + $0x78] sm:$0xff] %vm530_vm2, %v513_v20  ;;  %v565_v28 = vld [vmem:[#allocation2 + $0x10] sm:$0xff]  ;;  %v566_v29 = vld [vmem:[#allocation2 + $0x18] sm:$0xff] }
  0x31   : > { %547 = vst.msk [vmem:[#allocation2 + $0x80] sm:$0xff] %vm530_vm2, %v514_v22  ;;  %548 = vst.msk [vmem:[#allocation2 + $0x88] sm:$0xff] %vm530_vm2, %v515_v23  ;;  %v563_v30 = vld [vmem:[#allocation2] sm:$0xff]  ;;  %v604_v31 = vmul.f32 %v7175_v14, %v565_v28  ;;  %v605_v32 = vmul.f32 %v7175_v14, %v566_v29  ;;  %v564_v33 = vld [vmem:[#allocation2 + $0x8] sm:$0xff] }
  0x32   : > { %549 = vst.msk [vmem:[#allocation2 + $0x90] sm:$0xff] %vm530_vm2, %v516_v24  ;;  %550 = vst.msk [vmem:[#allocation2 + $0x98] sm:$0xff] %vm530_vm2, %v517_v25  ;;  %v602_v34 = vmul.f32 %v7175_v14, %v563_v30  ;;  %v567_v35 = vld [vmem:[#allocation2 + $0x20] sm:$0xff]  ;;  %v568_v36 = vld [vmem:[#allocation2 + $0x28] sm:$0xff]  ;;  %v603_v37 = vmul.f32 %v7175_v14, %v564_v33 }
  0x33   : > { %551 = vst.msk [vmem:[#allocation2 + $0xa0] sm:$0xff] %vm530_vm2, %v518_v26  ;;  %552 = vst.msk [vmem:[#allocation2 + $0xa8] sm:$0xff] %vm530_vm2, %v519_v27  ;;  %v606_v38 = vmul.f32 %v7175_v14, %v567_v35  ;;  %v607_v39 = vmul.f32 %v7175_v14, %v568_v36  ;;  %v569_v40 = vld [vmem:[#allocation2 + $0x30] sm:$0xff]  ;;  %v643_v43 = vadd.f32 %v7193_v21, %v604_v31  ;;  %v570_v46 = vld [vmem:[#allocation2 + $0x38] sm:$0xff] }
  0x34   : > { %v644_v44 = vadd.f32 %v7193_v21, %v605_v32  ;;  %v641_v45 = vadd.f32 %v7193_v21, %v602_v34  ;;  %v608_v47 = vmul.f32 %v7175_v14, %v569_v40  ;;  %553 = vst.msk [vmem:[#allocation2 + $0xb0] sm:$0xff] %vm530_vm2, %v520_v41  ;;  %554 = vst.msk [vmem:[#allocation2 + $0xb8] sm:$0xff] %vm530_vm2, %v521_v42  ;;  %v571_v52 = vld [vmem:[#allocation2 + $0x40] sm:$0xff]  ;;  %v572_v53 = vld [vmem:[#allocation2 + $0x48] sm:$0xff] }
  0x35   : > { %v642_v48 = vadd.f32 %v7193_v21, %v603_v37  ;;  %v645_v49 = vadd.f32 %v7193_v21, %v606_v38  ;;  %v646_v50 = vadd.f32 %v7193_v21, %v607_v39  ;;  %v609_v51 = vmul.f32 %v7175_v14, %v570_v46  ;;  %v573_v54 = vld [vmem:[#allocation2 + $0x50] sm:$0xff]  ;;  %v574_v59 = vld [vmem:[#allocation2 + $0x58] sm:$0xff]  ;;  %555 = vst.msk [vmem:[#allocation2 + $0xc0] sm:$0xff] %vm530_vm2, %v522_v12  ;;  %v526_v22 = vld [vmem:[%s7153_s14 + $0xe0] sm:$0xff] }
  0x36   : > { %v675_v55 = vmax.f32 %v643_v43, 0.0  ;;  %v676_v56 = vmax.f32 %v644_v44, 0.0  ;;  %v673_v57 = vmax.f32 %v641_v45, 0.0  ;;  %v647_v58 = vadd.f32 %v7193_v21, %v608_v47  ;;  %v575_v60 = vld [vmem:[#allocation2 + $0x60] sm:$0xff]  ;;  %v576_v61 = vld [vmem:[#allocation2 + $0x68] sm:$0xff]  ;;  %556 = vst.msk [vmem:[#allocation2 + $0xc8] sm:$0xff] %vm530_vm2, %v523_v13 }
  0x37   : > { %v674_v62 = vmax.f32 %v642_v48, 0.0  ;;  %v677_v63 = vmax.f32 %v645_v49, 0.0  ;;  %v678_v0 = vmax.f32 %v646_v50, 0.0  ;;  %v648_v1 = vadd.f32 %v7193_v21, %v609_v51  ;;  %v577_v2 = vld [vmem:[#allocation2 + $0x70] sm:$0xff]  ;;  %v578_v7 = vld [vmem:[#allocation2 + $0x78] sm:$0xff]  ;;  %557 = vst.msk [vmem:[#allocation2 + $0xd0] sm:$0xff] %vm530_vm2, %v524_v15 }
  0x38   : > { %708 = vst.msk [vmem:[#allocation3 + $0x31] sm:$0xff] %vm530_vm2, %v675_v55  ;;  %709 = vst.msk [vmem:[#allocation3 + $0x39] sm:$0xff] %vm530_vm2, %v676_v56  ;;  %v679_v3 = vmax.f32 %v647_v58, 0.0  ;;  %v610_v4 = vmul.f32 %v7175_v14, %v571_v52  ;;  %v611_v5 = vmul.f32 %v7175_v14, %v572_v53  ;;  %v612_v6 = vmul.f32 %v7175_v14, %v573_v54  ;;  %v525_v20 = vld [vmem:[%s7153_s14 + $0xd8] sm:$0xff]  ;;  %v527_v23 = vld [vmem:[%s7153_s14 + $0xe8] sm:$0xff] }
  0x39   : > { %706 = vst.msk [vmem:[#allocation3 + $0x19] sm:$0xff] %vm530_vm2, %v673_v57  ;;  %707 = vst.msk [vmem:[#allocation3 + $0x21] sm:$0xff] %vm530_vm2, %v674_v62  ;;  %v680_v8 = vmax.f32 %v648_v1, 0.0  ;;  %v613_v9 = vmul.f32 %v7175_v14, %v574_v59  ;;  %v614_v10 = vmul.f32 %v7175_v14, %v575_v60  ;;  %v615_v11 = vmul.f32 %v7175_v14, %v576_v61  ;;  %v579_v28 = vld [vmem:[#allocation2 + $0x80] sm:$0xff]  ;;  %v580_v29 = vld [vmem:[#allocation2 + $0x88] sm:$0xff] }
  0x3a   : > { %710 = vst.msk [vmem:[#allocation3 + $0x49] sm:$0xff] %vm530_vm2, %v677_v63  ;;  %711 = vst.msk [vmem:[#allocation3 + $0x51] sm:$0xff] %vm530_vm2, %v678_v0  ;;  %v649_v16 = vadd.f32 %v7193_v21, %v610_v4  ;;  %v650_v17 = vadd.f32 %v7193_v21, %v611_v5  ;;  %v651_v18 = vadd.f32 %v7193_v21, %v612_v6  ;;  %v581_v30 = vld [vmem:[#allocation2 + $0x90] sm:$0xff]  ;;  %v582_v35 = vld [vmem:[#allocation2 + $0x98] sm:$0xff] }
  0x3b   : > { %712 = vst.msk [vmem:[#allocation3 + $0x61] sm:$0xff] %vm530_vm2, %v679_v3  ;;  %v616_v19 = vmul.f32 %v7175_v14, %v577_v2  ;;  %713 = vst.msk [vmem:[#allocation3 + $0x69] sm:$0xff] %vm530_vm2, %v680_v8  ;;  %v652_v24 = vadd.f32 %v7193_v21, %v613_v9  ;;  %v653_v25 = vadd.f32 %v7193_v21, %v614_v10  ;;  %v583_v36 = vld [vmem:[#allocation2 + $0xa0] sm:$0xff]  ;;  %v584_v37 = vld [vmem:[#allocation2 + $0xa8] sm:$0xff] }
  0x3c   : > { %v654_v26 = vadd.f32 %v7193_v21, %v615_v11  ;;  %v617_v27 = vmul.f32 %v7175_v14, %v578_v7  ;;  %558 = vst.msk [vmem:[#allocation2 + $0xd8] sm:$0xff] %vm530_vm2, %v525_v20  ;;  %559 = vst.msk [vmem:[#allocation2 + $0xe0] sm:$0xff] %vm530_vm2, %v526_v22  ;;  %v681_v31 = vmax.f32 %v649_v16, 0.0  ;;  %v682_v32 = vmax.f32 %v650_v17, 0.0  ;;  %v585_v46 = vld [vmem:[#allocation2 + $0xb0] sm:$0xff]  ;;  %v586_v54 = vld [vmem:[#allocation2 + $0xb8] sm:$0xff] }
  0x3d   : > { %560 = vst.msk [vmem:[#allocation2 + $0xe8] sm:$0xff] %vm530_vm2, %v527_v23  ;;  %v683_v33 = vmax.f32 %v651_v18, 0.0  ;;  %v655_v34 = vadd.f32 %v7193_v21, %v616_v19  ;;  %v684_v38 = vmax.f32 %v652_v24, 0.0  ;;  %v685_v39 = vmax.f32 %v653_v25, 0.0  ;;  %v587_v3 = vld [vmem:[#allocation2 + $0xc0] sm:$0xff]  ;;  %v588_v4 = vld [vmem:[#allocation2 + $0xc8] sm:$0xff] }
  0x3e   : > { %v686_v40 = vmax.f32 %v654_v26, 0.0  ;;  %v656_v41 = vadd.f32 %v7193_v21, %v617_v27  ;;  %714 = vst.msk [vmem:[#allocation3 + $0x79] sm:$0xff] %vm530_vm2, %v681_v31  ;;  %715 = vst.msk [vmem:[#allocation3 + $0x81] sm:$0xff] %vm530_vm2, %v682_v32  ;;  %v618_v43 = vmul.f32 %v7175_v14, %v579_v28  ;;  %v619_v44 = vmul.f32 %v7175_v14, %v580_v29  ;;  %v589_v10 = vld [vmem:[#allocation2 + $0xd0] sm:$0xff] }
  0x3f   : > { %716 = vst.msk [vmem:[#allocation3 + $0x91] sm:$0xff] %vm530_vm2, %v683_v33  ;;  %v687_v42 = vmax.f32 %v655_v34, 0.0  ;;  %v620_v45 = vmul.f32 %v7175_v14, %v581_v30  ;;  %v774_v47 = vld [vmem:[#allocation3 + $0x31] sm:$0xff]  ;;  %v775_v48 = vld [vmem:[#allocation3 + $0x39] sm:$0xff]  ;;  %717 = vst.msk [vmem:[#allocation3 + $0x99] sm:$0xff] %vm530_vm2, %v684_v38  ;;  %v621_v51 = vmul.f32 %v7175_v14, %v582_v35  ;;  %v622_v52 = vmul.f32 %v7175_v14, %v583_v36 }
  0x40   : > { %v772_v49 = vld [vmem:[#allocation3 + $0x19] sm:$0xff]  ;;  %718 = vst.msk [vmem:[#allocation3 + $0xa9] sm:$0xff] %vm530_vm2, %v685_v39  ;;  %719 = vst.msk [vmem:[#allocation3 + $0xb1] sm:$0xff] %vm530_vm2, %v686_v40  ;;  %v688_v50 = vmax.f32 %v656_v41, 0.0  ;;  %v623_v53 = vmul.f32 %v7175_v14, %v584_v37  ;;  %v7278_v55 = vpack.i.bf16 %v775_v48, %v774_v47  ;;  %v773_v56 = vld [vmem:[#allocation3 + $0x21] sm:$0xff]  ;;  %v657_v59 = vadd.f32 %v7193_v21, %v618_v43 }
  0x41   : > { %v776_v57 = vld [vmem:[#allocation3 + $0x49] sm:$0xff]  ;;  %v777_v58 = vld [vmem:[#allocation3 + $0x51] sm:$0xff]  ;;  %720 = vst.msk [vmem:[#allocation3 + $0xc1] sm:$0xff] %vm530_vm2, %v687_v42  ;;  %v658_v60 = vadd.f32 %v7193_v21, %v619_v44  ;;  %v659_v61 = vadd.f32 %v7193_v21, %v620_v45  ;;  %v7284_v62 = vpack.i.bf16 %v773_v56, %v772_v49  ;;  %v660_v1 = vadd.f32 %v7193_v21, %v621_v51 }
  0x42   : > { %v7286_v63 = vpack.i.bf16 %v777_v58, %v776_v57  ;;  %v778_v0 = vld [vmem:[#allocation3 + $0x61] sm:$0xff]  ;;  %721 = vst.msk [vmem:[#allocation3 + $0xc9] sm:$0xff] %vm530_vm2, %v688_v50  ;;  %v661_v2 = vadd.f32 %v7193_v21, %v622_v52  ;;  %5676 = vrot.lane.b32.xlu1 %v7278_v55, %s6991_s17  ;;  %v779_v5 = vld [vmem:[#allocation3 + $0x69] sm:$0xff]  ;;  %v689_v6 = vmax.f32 %v657_v59, 0.0  ;;  %v662_v9 = vadd.f32 %v7193_v21, %v623_v53 }
  0x43   : > { %v690_v7 = vmax.f32 %v658_v60, 0.0  ;;  %v691_v8 = vmax.f32 %v659_v61, 0.0  ;;  %v590_v11 = vld [vmem:[#allocation2 + $0xd8] sm:$0xff]  ;;  %5671 = vrot.lane.b32.xlu0 %v7284_v62, %s6991_s17  ;;  %v7296_v12 = vpack.i.bf16 %v779_v5, %v778_v0  ;;  %v692_v13 = vmax.f32 %v660_v1, 0.0  ;;  %v591_v17 = vld [vmem:[#allocation2 + $0xe0] sm:$0xff] }
  0x44   : > { %v693_v15 = vmax.f32 %v661_v2, 0.0  ;;  %v624_v16 = vmul.f32 %v7175_v14, %v585_v46  ;;  %722 = vst.msk [vmem:[#allocation3 + $0xd9] sm:$0xff] %vm530_vm2, %v689_v6  ;;  %v694_v18 = vmax.f32 %v662_v9, 0.0  ;;  %v625_v19 = vmul.f32 %v7175_v14, %v586_v54  ;;  %v592_v35 = vld [vmem:[#allocation2 + $0xe8] sm:$0xff] }
  0x45   : > { %723 = vst.msk [vmem:[#allocation3 + $0xe1] sm:$0xff] %vm530_vm2, %v690_v7  ;;  %724 = vst.msk [vmem:[#allocation3 + $0xf1] sm:$0xff] %vm530_vm2, %v691_v8  ;;  %v626_v20 = vmul.f32 %v7175_v14, %v587_v3  ;;  %v627_v22 = vmul.f32 %v7175_v14, %v588_v4  ;;  %v780_v23 = vld [vmem:[#allocation3 + $0x79] sm:$0xff]  ;;  %v781_v24 = vld [vmem:[#allocation3 + $0x81] sm:$0xff]  ;;  %v628_v27 = vmul.f32 %v7175_v14, %v589_v10 }
  0x46   : > { %v782_v25 = vld [vmem:[#allocation3 + $0x91] sm:$0xff]  ;;  %725 = vst.msk [vmem:[#allocation3 + $0xf9] sm:$0xff] %vm530_vm2, %v692_v13  ;;  %726 = vst.msk [vmem:[#allocation3 + $0x109] sm:$0xff] %vm530_vm2, %v693_v15  ;;  %v663_v26 = vadd.f32 %v7193_v21, %v624_v16  ;;  %v629_v28 = vmul.f32 %v7175_v14, %v590_v11  ;;  %v630_v29 = vmul.f32 %v7175_v14, %v591_v17  ;;  %5681 = vrot.lane.b32.xlu1 %v7286_v63, %s6991_s17  ;;  %v783_v31 = vld [vmem:[#allocation3 + $0x99] sm:$0xff] }
  0x47   : > { %v7313_v30 = vpack.i.bf16 %v781_v24, %v780_v23  ;;  %727 = vst.msk [vmem:[#allocation3 + $0x111] sm:$0xff] %vm530_vm2, %v694_v18  ;;  %v664_v32 = vadd.f32 %v7193_v21, %v625_v19  ;;  %v665_v33 = vadd.f32 %v7193_v21, %v626_v20  ;;  %v666_v34 = vadd.f32 %v7193_v21, %v627_v22  ;;  %v784_v37 = vld [vmem:[#allocation3 + $0xa9] sm:$0xff]  ;;  %v785_v38 = vld [vmem:[#allocation3 + $0xb1] sm:$0xff]  ;;  %v804_v22 = vld [vmem:[#allocation3 + $0x1a] sm:$0xff] }
  0x48   : > { %5686 = vrot.lane.b32.xlu0 %v7296_v12, %s6991_s17  ;;  %v7321_v36 = vpack.i.bf16 %v783_v31, %v782_v25  ;;  %v695_v39 = vmax.f32 %v663_v26, 0.0  ;;  %v667_v40 = vadd.f32 %v7193_v21, %v628_v27  ;;  %v786_v41 = vld [vmem:[#allocation3 + $0xc1] sm:$0xff]  ;;  %v668_v46 = vadd.f32 %v7193_v21, %v629_v28  ;;  %v803_v18 = vld [vmem:[#allocation3 + $0xa] sm:$0xff]  ;;  %v806_v24 = vld [vmem:[#allocation3 + $0x32] sm:$0xff] }
  0x49   : > { %v787_v42 = vld [vmem:[#allocation3 + $0xc9] sm:$0xff]  ;;  %v696_v43 = vmax.f32 %v664_v32, 0.0  ;;  %v697_v44 = vmax.f32 %v665_v33, 0.0  ;;  %v698_v45 = vmax.f32 %v666_v34, 0.0  ;;  %v631_v48 = vmul.f32 %v7175_v14, %v592_v35  ;;  %v807_v25 = vld [vmem:[#allocation3 + $0x3a] sm:$0xff]  ;;  %v809_v28 = vld [vmem:[#allocation3 + $0x52] sm:$0xff] }
  0x4a   : > { %728 = vst.msk [vmem:[#allocation3 + $0x121] sm:$0xff] %vm530_vm2, %v695_v39  ;;  %v699_v47 = vmax.f32 %v667_v40, 0.0  ;;  %v669_v49 = vadd.f32 %v7193_v21, %v630_v29  ;;  %5691 = vrot.lane.b32.xlu1 %v7313_v30, %s6991_s17  ;;  %v7330_v50 = vpack.i.bf16 %v785_v38, %v784_v37  ;;  %v700_v51 = vmax.f32 %v668_v46, 0.0  ;;  %v802_v17 = vld [vmem:[#allocation3 + $0x2] sm:$0xff]  ;;  %v808_v27 = vld [vmem:[#allocation3 + $0x4a] sm:$0xff]  ;;  %v812_v35 = vld [vmem:[#allocation3 + $0x7a] sm:$0xff] }
  0x4b   : > { %729 = vst.msk [vmem:[#allocation3 + $0x129] sm:$0xff] %vm530_vm2, %v696_v43  ;;  %730 = vst.msk [vmem:[#allocation3 + $0x139] sm:$0xff] %vm530_vm2, %v697_v44  ;;  %v7337_v52 = vpack.i.bf16 %v787_v42, %v786_v41  ;;  %v788_v53 = vld [vmem:[#allocation3 + $0xd9] sm:$0xff]  ;;  %v670_v56 = vadd.f32 %v7193_v21, %v631_v48  ;;  %v5740_v20 = vpack.i.bf16 %v803_v18, %v802_v17  ;;  %v805_v23 = vld [vmem:[#allocation3 + $0x22] sm:$0xff] }
  0x4c   : > { %731 = vst.msk [vmem:[#allocation3 + $0x141] sm:$0xff] %vm530_vm2, %v698_v45  ;;  %5696 = vrot.lane.b32.xlu0 %v7321_v36, %s6991_s17  ;;  %v789_v54 = vld [vmem:[#allocation3 + $0xe1] sm:$0xff]  ;;  %732 = vst.msk [vmem:[#allocation3 + $0x151] sm:$0xff] %vm530_vm2, %v699_v47  ;;  %v701_v57 = vmax.f32 %v669_v49, 0.0  ;;  %v790_v58 = vld [vmem:[#allocation3 + $0xf1] sm:$0xff]  ;;  %v7358_v26 = vpack.i.bf16 %v805_v23, %v804_v22  ;;  %v7361_v29 = vpack.i.bf16 %v807_v25, %v806_v24 }
  0x4d   : > { %v791_v59 = vld [vmem:[#allocation3 + $0xf9] sm:$0xff]  ;;  %733 = vst.msk [vmem:[#allocation3 + $0x159] sm:$0xff] %vm530_vm2, %v700_v51  ;;  %v702_v60 = vmax.f32 %v670_v56, 0.0  ;;  %v7345_v61 = vpack.i.bf16 %v789_v54, %v788_v53  ;;  %v792_v1 = vld [vmem:[#allocation3 + $0x109] sm:$0xff]  ;;  %v7365_v33 = vpack.i.bf16 %v809_v28, %v808_v27 }
  0x4e   : > { %734 = vst.msk [vmem:[#allocation3 + $0x169] sm:$0xff] %vm530_vm2, %v701_v57  ;;  %5701 = vrot.lane.b32.xlu1 %v7330_v50, %s6991_s17  ;;  %v5715_v0 = vpack.i.bf16 %v791_v59, %v790_v58  ;;  %v793_v2 = vld [vmem:[#allocation3 + $0x111] sm:$0xff]  ;;  %v810_v31 = vld [vmem:[#allocation3 + $0x62] sm:$0xff]  ;;  %v815_v39 = vld [vmem:[#allocation3 + $0x9a] sm:$0xff] }
  0x4f   : > { %735 = vst.msk [vmem:[#allocation3 + $0x171] sm:$0xff] %vm530_vm2, %v702_v60  ;;  %v5720_v5 = vpack.i.bf16 %v793_v2, %v792_v1  ;;  %v811_v32 = vld [vmem:[#allocation3 + $0x6a] sm:$0xff]  ;;  %v813_v37 = vld [vmem:[#allocation3 + $0x82] sm:$0xff]  ;;  %v814_v38 = vld [vmem:[#allocation3 + $0x92] sm:$0xff] }
  0x50   : > { %5706 = vrot.lane.b32.xlu0 %v7337_v52, %s6991_s17  ;;  %v7369_v34 = vpack.i.bf16 %v811_v32, %v810_v31  ;;  %v7373_v40 = vpack.i.bf16 %v813_v37, %v812_v35  ;;  %v7377_v41 = vpack.i.bf16 %v815_v39, %v814_v38  ;;  %v816_v42 = vld [vmem:[#allocation3 + $0xaa] sm:$0xff]  ;;  %v817_v43 = vld [vmem:[#allocation3 + $0xb2] sm:$0xff]  ;;  %v818_v44 = vld [vmem:[#allocation3 + $0xc2] sm:$0xff] }
  0x51   : > { %v794_v3 = vld [vmem:[#allocation3 + $0x121] sm:$0xff]  ;;  %v819_v45 = vld [vmem:[#allocation3 + $0xca] sm:$0xff]  ;;  %v7381_v46 = vpack.i.bf16 %v817_v43, %v816_v42  ;;  %v822_v51 = vld [vmem:[#allocation3 + $0xf2] sm:$0xff] }
  0x52   : > { %v795_v4 = vld [vmem:[#allocation3 + $0x129] sm:$0xff]  ;;  %5711 = vrot.lane.b32.xlu1 %v7345_v61, %s6991_s17  ;;  %v796_v7 = vld [vmem:[#allocation3 + $0x139] sm:$0xff]  ;;  %v7385_v47 = vpack.i.bf16 %v819_v45, %v818_v44 }
  0x53   : > { %v5725_v6 = vpack.i.bf16 %v795_v4, %v794_v3  ;;  %v797_v8 = vld [vmem:[#allocation3 + $0x141] sm:$0xff]  ;;  %v798_v9 = vld [vmem:[#allocation3 + $0x151] sm:$0xff]  ;;  %v6947_v45 = vld [vmem:[%s9531_s3 + $0x10] ss:$0 sps:$4 sm:$0x33]  }
  0x54   : > { %5716 = vrot.lane.b32.xlu0 %v5715_v0, %s6991_s17  ;;  %v799_v10 = vld [vmem:[#allocation3 + $0x159] sm:$0xff]  ;;  %v5730_v11 = vpack.i.bf16 %v797_v8, %v796_v7  ;;  %v821_v49 = vld [vmem:[#allocation3 + $0xe2] sm:$0xff]  ;;  %v824_v57 = vld [vmem:[#allocation3 + $0x10a] sm:$0xff] }
  0x55   : > { %v5735_v13 = vpack.i.bf16 %v799_v10, %v798_v9  ;;  %v800_v15 = vld [vmem:[#allocation3 + $0x169] sm:$0xff]  ;;  %v820_v48 = vld [vmem:[#allocation3 + $0xda] sm:$0xff]  ;;  %v825_v58 = vld [vmem:[#allocation3 + $0x112] sm:$0xff] }
  0x56   : > { %5721 = vrot.lane.b32.xlu1 %v5720_v5, %s6991_s17  ;;  %v801_v16 = vld [vmem:[#allocation3 + $0x171] sm:$0xff]  ;;  %v823_v53 = vld [vmem:[#allocation3 + $0xfa] sm:$0xff]  ;;  %v7389_v54 = vpack.i.bf16 %v821_v49, %v820_v48  ;;  %v826_v59 = vld [vmem:[#allocation3 + $0x122] sm:$0xff]  ;;  %v7397_v0 = vpack.i.bf16 %v825_v58, %v824_v57  ;;  %v2407_v49 = vsel %vm2405_vm3, %v6947_v45, 0 }
  0x57   : > { %v5745_v19 = vpack.i.bf16 %v801_v16, %v800_v15  ;;  %v7393_v56 = vpack.i.bf16 %v823_v53, %v822_v51  ;;  %v827_v60 = vld [vmem:[#allocation3 + $0x12a] sm:$0xff]  ;;  %v828_v2 = vld [vmem:[#allocation3 + $0x13a] sm:$0xff]  ;;  %v829_v3 = vld [vmem:[#allocation3 + $0x142] sm:$0xff] }
  0x58   : > { %5726 = vrot.lane.b32.xlu0 %v5725_v6, %s6991_s17  ;;  %v5805_v1 = vpack.i.bf16 %v827_v60, %v826_v59  ;;  %v830_v4 = vld [vmem:[#allocation3 + $0x152] sm:$0xff]  ;;  %v831_v5 = vld [vmem:[#allocation3 + $0x15a] sm:$0xff]  ;;  %v5810_v6 = vpack.i.bf16 %v829_v3, %v828_v2  ;;  %v832_v8 = vld [vmem:[#allocation3 + $0x16a] sm:$0xff] }
  0x59   : > { %v5815_v7 = vpack.i.bf16 %v831_v5, %v830_v4  ;;  %v833_v9 = vld [vmem:[#allocation3 + $0x172] sm:$0xff]  ;;  %v7416_v18 = vld [vmem:[#allocation3 + $0x48] sm:$0xff]  ;;  %v7426_v23 = vld [vmem:[#allocation3 + $0x60] sm:$0xff] }
  0x5a   : > { %5731 = vrot.lane.b32.xlu1 %v5730_v11, %s6991_s17  ;;  %v7404_v10 = vld [vmem:[#allocation3 + $0x18] sm:$0xff]  ;;  %v7406_v11 = vld [vmem:[#allocation3 + $0x20] sm:$0xff]  ;;  %v7412_v16 = vld [vmem:[#allocation3 + $0x30] sm:$0xff] }
  0x5b   : > { %v5825_v15 = vpack.i.bf16 %v7406_v11, %v7404_v10  ;;  %v7414_v17 = vld [vmem:[#allocation3 + $0x38] sm:$0xff]  ;;  %v7428_v24 = vld [vmem:[#allocation3 + $0x68] sm:$0xff]  ;;  %v7432_v27 = vld [vmem:[#allocation3 + $0x80] sm:$0xff] }
  0x5c   : > { %5736 = vrot.lane.b32.xlu0 %v5735_v13, %s6991_s17  ;;  %v5820_v13 = vpack.i.bf16 %v833_v9, %v832_v8  ;;  %v7430_v25 = vld [vmem:[#allocation3 + $0x78] sm:$0xff]  ;;  %v5840_v28 = vpack.i.bf16 %v7428_v24, %v7426_v23  ;;  %v844_v32 = vld [vmem:[#allocation3 + $0x90] sm:$0xff]  ;;  %v846_v37 = vld [vmem:[#allocation3 + $0xa8] sm:$0xff] }
  0x5d   : > { %v5845_v31 = vpack.i.bf16 %v7432_v27, %v7430_v25  ;;  %v845_v35 = vld [vmem:[#allocation3 + $0x98] sm:$0xff]  ;;  %v847_v38 = vld [vmem:[#allocation3 + $0xb0] sm:$0xff]  ;;  %v6945_v43 = vld [vmem:[%s9531_s3] sm:$0xff]  }
  0x5e   : > { %5746 = vrot.lane.b32.xlu1 %v5745_v19, %s6991_s17  ;;  %v7418_v19 = vld [vmem:[#allocation3 + $0x50] sm:$0xff]  ;;  %v7441_v39 = vpack.i.bf16 %v845_v35, %v844_v32  ;;  %v7444_v42 = vpack.i.bf16 %v847_v38, %v846_v37  ;;  %5520 = vmatprep.subr.bf16.mxu0 %v6945_v43  ;;  %v6946_v44 = vld [vmem:[%s9531_s3 + $0x8] sm:$0xff]   ;;  %v529_v48 = vld [vmem:[%s7153_s14 + $0xf8] sm:$0xff] }
  0x5f   : > { %v5835_v22 = vpack.i.bf16 %v7418_v19, %v7416_v18  ;;  %5634 = vmatprep.subr.bf16.mxu1 %v6945_v43  ;;  %5521 = vmatpush3.bf16.msra.mxu0 %v6945_v43  ;;  %562 = vst.msk [vmem:[#allocation2 + $0xf8] sm:$0xff] %vm530_vm2, %v529_v48  ;;  %v7541_v2 = vld [vmem:[#allocation3 + $0xc0] sm:$0xff]  ;;  %v7543_v3 = vld [vmem:[#allocation3 + $0xc8] sm:$0xff]  ;;  %v7570_v9 = vld [vmem:[#allocation3 + $0xd8] sm:$0xff] }
  0x60   : > { %5741 = vrot.lane.b32.xlu0 %v5740_v20, %s6992_s20  ;;  %v5830_v20 = vpack.i.bf16 %v7414_v17, %v7412_v16  ;;  %5637 = vmatpush3.bf16.msra.mxu1 %v6945_v43  ;;  %9562 = vst [vmem:[#allocation4_spill] sm:$0xff] %v7541_v2  ;;  %9563 = vst [vmem:[#allocation5_spill] sm:$0xff] %v7543_v3  ;;  %v6010_v5 = vpack.i.bf16 %v7543_v3, %v7541_v2  ;;  %v882_v32 = vld [vmem:[#allocation3 + $0xd9] sm:$0xff]  ;;  %v883_v35 = vld [vmem:[#allocation3 + $0xe1] sm:$0xff] }
  0x61   : > { %5522 = vmatprep.subr.bf16.mxu0 %v6946_v44  ;;  %5635 = vmatprep.subr.bf16.mxu1 %v6946_v44  ;;  %9570 = vst [vmem:[#allocation12_spill] sm:$0xff] %v7570_v9  ;;  %v758_v37 = vld [vmem:[#allocation3 + $0xf0] sm:$0xff]  ;;  %v759_v38 = vld [vmem:[#allocation3 + $0xf8] sm:$0xff] }
  0x62   : > { %5751 = vrot.lane.b32.xlu1 %v7358_v26, %s6992_s20  ;;  %v884_v43 = vld [vmem:[#allocation3 + $0xf1] sm:$0xff] }
  0x63   : > { %5523 = vmatpush3.bf16.msra.mxu0 %v6946_v44 }
  0x64   : > { %5756 = vrot.lane.b32.xlu0 %v7361_v29, %s6992_s20  ;;  %5638 = vmatpush3.bf16.msra.mxu1 %v6946_v44 }
  0x65   : > { %5640 = vmatprep.subr.msk.bf16.mxu0 %vm2405_vm3, %v6947_v45  ;;  %5641 = vmatprep.subr.msk.bf16.mxu1 %vm2405_vm3, %v6947_v45  ;;  %vm4878_vm3 = vcmask 97344  }
  0x66   : > { %5761 = vrot.lane.b32.xlu1 %v7365_v33, %s6992_s20  ;;  %v594_v51 = vld [vmem:[#allocation2 + $0xf8] sm:$0xff] }
  0x67   : > { %5525 = vmatpush3.bf16.msra.mxu0 %v2407_v49  ;;  %v633_v57 = vmul.f32 %v7175_v14, %v594_v51  ;;  %v761_v51 = vld [vmem:[#allocation3 + $0x110] sm:$0xff] }
  0x68   : > { %5766 = vrot.lane.b32.xlu0 %v7369_v34, %s6992_s20  ;;  %5639 = vmatpush3.bf16.msra.mxu1 %v2407_v49 }
  0x69   : > { %v672_v59 = vadd.f32 %v7193_v21, %v633_v57 }
  0x6a   : > { %5771 = vrot.lane.b32.xlu1 %v7373_v40, %s6992_s20 }
  0x6b   : > { %v704_v60 = vmax.f32 %v672_v59, 0.0  ;;  %v982_v59 = vld [vmem:[#allocation3 + $0x111] sm:$0xff] }
  0x6c   : > { %5776 = vrot.lane.b32.xlu0 %v7377_v41, %s6992_s20 }
  0x6d   : > { %737 = vst.msk [vmem:[#allocation3 + $0x189] sm:$0xff] %vm530_vm2, %v704_v60 }
  0x6e   : > { %5781 = vrot.lane.b32.xlu1 %v7381_v46, %s6992_s20 }
  0x70   : > { %5786 = vrot.lane.b32.xlu0 %v7385_v47, %s6992_s20 }
  0x72   : > { %5791 = vrot.lane.b32.xlu1 %v7389_v54, %s6992_s20 }
  0x74   : > { %5796 = vrot.lane.b32.xlu0 %v7393_v56, %s6992_s20 }
  0x76   : > { %5801 = vrot.lane.b32.xlu1 %v7397_v0, %s6992_s20 }
  0x78   : > { %5806 = vrot.lane.b32.xlu0 %v5805_v1, %s6992_s20 }
  0x7a   : > { %5811 = vrot.lane.b32.xlu1 %v5810_v6, %s6992_s20 }
  0x7c   : > { %5816 = vrot.lane.b32.xlu0 %v5815_v7, %s6992_s20 }
  0x7e   : > { %5821 = vrot.lane.b32.xlu1 %v5820_v13, %s6992_s20  ;;  %v7572_v13 = vld [vmem:[#allocation3 + $0xe0] sm:$0xff] }
  0x7f   : > { %9571 = vst [vmem:[#allocation13_spill] sm:$0xff] %v7572_v13 }
  0x80   : > { %5826 = vrot.lane.b32.xlu0 %v5825_v15, %s6993_s21 }
  0x82   : > { %5831 = vrot.lane.b32.xlu1 %v5830_v20, %s6993_s21 }
  0x84   : > { %5836 = vrot.lane.b32.xlu0 %v5835_v22, %s6993_s21 }
  0x86   : > { %5841 = vrot.lane.b32.xlu1 %v5840_v28, %s6993_s21 }
  0x88   : > { %5846 = vrot.lane.b32.xlu0 %v5845_v31, %s6993_s21 }
  0x8a   : > { %5851 = vrot.lane.b32.xlu1 %v7441_v39, %s6993_s21 }
  0x8c   : > { %5856 = vrot.lane.b32.xlu0 %v7444_v42, %s6993_s21 }
  0x8e   : > { %5861 = vrot.lane.b32.xlu1 %v7284_v62, %s6994_s24  ;;  %v528_v62 = vld [vmem:[%s7153_s14 + $0xf0] sm:$0xff]  ;;  %s6998_s14 = smov 32  }
  0x8f   : > { %561 = vst.msk [vmem:[#allocation2 + $0xf0] sm:$0xff] %vm530_vm2, %v528_v62 }
  0x90   : > { %5866 = vrot.lane.b32.xlu0 %v7278_v55, %s6994_s24 }
  0x92   : > { %5871 = vrot.lane.b32.xlu1 %v7358_v26, %s6995_s30 }
  0x94   : > { %5876 = vrot.lane.b32.xlu0 %v7361_v29, %s6995_s30 }
  0x96   : > { %5881 = vrot.lane.b32.xlu1 %v5830_v20, %s6996_s18  ;;  %v593_v26 = vld [vmem:[#allocation2 + $0xf0] sm:$0xff] }
  0x97   : > { %v632_v53 = vmul.f32 %v7175_v14, %v593_v26  ;;  %v7501_v14 = vpop.permute.xlu0 %5666  ;;  %v760_v26 = vld [vmem:[#allocation3 + $0x108] sm:$0xff] }
  0x98   : > { %5886 = vrot.lane.b32.xlu0 %v5835_v22, %s6996_s18  ;;  %v6100_v57 = vpack.i.bf16 %v761_v51, %v760_v26  ;;  %v920_v26 = vld [vmem:[#allocation3 + $0x122] sm:$0xff]  ;;  %v921_v51 = vld [vmem:[#allocation3 + $0x12a] sm:$0xff] }
  0x99   : > { %v671_v58 = vadd.f32 %v7193_v21, %v632_v53 }
  0x9a   : > { %5891 = vrot.lane.b32.xlu1 %v7278_v55, %s6997_s19 }
  0x9b   : > { %v703_v55 = vmax.f32 %v671_v58, 0.0  ;;  %v981_v58 = vld [vmem:[#allocation3 + $0x109] sm:$0xff] }
  0x9c   : > { %5896 = vrot.lane.b32.xlu0 %v7286_v63, %s6997_s19 }
  0x9d   : > { %736 = vst.msk [vmem:[#allocation3 + $0x181] sm:$0xff] %vm530_vm2, %v703_v55 }
  0x9e   : > { %5901 = vrot.lane.b32.xlu1 %v7361_v29, %s6998_s14 }
  0xa0   : > { %5906 = vrot.lane.b32.xlu0 %v7365_v33, %s6998_s14 }
  0xa2   : > { %5911 = vrot.lane.b32.xlu1 %v7286_v63, %s6994_s24 }
  0xa4   : > { %5916 = vrot.lane.b32.xlu0 %v7296_v12, %s6994_s24 }
  0xa6   : > { %5921 = vrot.lane.b32.xlu1 %v7365_v33, %s6995_s30 }
  0xa8   : > { %5926 = vrot.lane.b32.xlu0 %v7369_v34, %s6995_s30 }
  0xaa   : > { %5931 = vrot.lane.b32.xlu1 %v5840_v28, %s6996_s18 }
  0xac   : > { %5936 = vrot.lane.b32.xlu0 %v5845_v31, %s6996_s18 }
  0xae   : > { %5941 = vrot.lane.b32.xlu1 %v7296_v12, %s6997_s19 }
  0xb0   : > { %5946 = vrot.lane.b32.xlu0 %v7313_v30, %s6997_s19 }
  0xb2   : > { %5951 = vrot.lane.b32.xlu1 %v7369_v34, %s6998_s14 }
  0xb4   : > { %5956 = vrot.lane.b32.xlu0 %v7373_v40, %s6998_s14  ;;  %v7507_v21 = vpop.permute.xlu1 %5676 }
  0xb5   : > { %v7509_v63 = vpop.permute.xlu0 %5671 }
  0xb6   : > { %5961 = vrot.lane.b32.xlu1 %v7313_v30, %s6994_s24 }
  0xb8   : > { %5966 = vrot.lane.b32.xlu0 %v7321_v36, %s6994_s24  ;;  %v7515_v12 = vpop.permute.xlu1 %5681 }
  0xba   : > { %v7517_v29 = vpop.permute.xlu0 %5686  ;;  %5971 = vrot.lane.b32.xlu1 %v7373_v40, %s6995_s30 }
  0xbc   : > { %5976 = vrot.lane.b32.xlu0 %v7377_v41, %s6995_s30  ;;  %v7523_v33 = vpop.permute.xlu1 %5691 }
  0xbe   : > { %v7525_v34 = vpop.permute.xlu0 %5696  ;;  %5981 = vrot.lane.b32.xlu1 %v7441_v39, %s6996_s18 }
  0xc0   : > { %5986 = vrot.lane.b32.xlu0 %v7444_v42, %s6996_s18  ;;  %v7531_v30 = vpop.permute.xlu1 %5701  ;;  %v6075_v42 = vpack.i.bf16 %v883_v35, %v882_v32  ;;  %v762_v35 = vld [vmem:[#allocation3 + $0x120] sm:$0xff] }
  0xc2   : > { %v7533_v1 = vpop.permute.xlu0 %5706  ;;  %5991 = vrot.lane.b32.xlu1 %v7321_v36, %s6997_s19 }
  0xc4   : > { %5996 = vrot.lane.b32.xlu0 %v7330_v50, %s6997_s19  ;;  %v7539_v40 = vpop.permute.xlu1 %5711 }
  0xc6   : > { %v7545_v4 = vpop.permute.xlu0 %5716  ;;  %6001 = vrot.lane.b32.xlu1 %v7377_v41, %s6998_s14 }
  0xc7   : > { %9564 = vst [vmem:[#allocation6_spill] sm:$0xff] %v7545_v4 }
  0xc8   : > { %6006 = vrot.lane.b32.xlu0 %v7381_v46, %s6998_s14  ;;  %v7553_v36 = vpop.permute.xlu1 %5721 }
  0xc9   : > { %9565 = vst [vmem:[#allocation7_spill] sm:$0xff] %v7553_v36  ;;  %v766_v36 = vld [vmem:[#allocation3 + $0x150] sm:$0xff] }
  0xca   : > { %v7555_v6 = vpop.permute.xlu0 %5726  ;;  %6011 = vrot.lane.b32.xlu1 %v6010_v5, %s6993_s21 }
  0xcb   : > { %9566 = vst [vmem:[#allocation8_spill] sm:$0xff] %v7555_v6  ;;  %v5674_v6 = vunpack.i.h.bf16 %v7509_v63 }
  0xcc   : > { %6016 = vrot.lane.b32.xlu0 %v7330_v50, %s6994_s24  ;;  %v7560_v7 = vpop.permute.xlu1 %5731  ;;  %v6040_v50 = vpack.i.bf16 %v7572_v13, %v7570_v9 }
  0xcd   : > { %9567 = vst [vmem:[#allocation9_spill] sm:$0xff] %v7560_v7  ;;  %v738_v7 = vld [vmem:[#allocation3] sm:$0xff] }
  0xce   : > { %v7562_v8 = vpop.permute.xlu0 %5736  ;;  %6021 = vrot.lane.b32.xlu1 %v7337_v52, %s6994_s24 }
  0xcf   : > { %9568 = vst [vmem:[#allocation10_spill] sm:$0xff] %v7562_v8  ;;  %v1018_v8 = vld [vmem:[#allocation3 + $0x142] sm:$0xff] }
  0xd0   : > { %6026 = vrot.lane.b32.xlu0 %v7381_v46, %s6995_s30  ;;  %v7568_v41 = vpop.permute.xlu1 %5746 }
  0xd1   : > { %9569 = vst [vmem:[#allocation11_spill] sm:$0xff] %v7568_v41  ;;  %v1017_v41 = vld [vmem:[#allocation3 + $0x13a] sm:$0xff] }
  0xd2   : > { %v7574_v15 = vpop.permute.xlu0 %5741  ;;  %6031 = vrot.lane.b32.xlu1 %v7385_v47, %s6995_s30  ;;  %v7677_v2 = vpack.i.bf16 %v1018_v8, %v1017_v41 }
  0xd4   : > { %6036 = vrot.lane.b32.xlu0 %v6010_v5, %s6996_s18  ;;  %v7581_v20 = vpop.permute.xlu1 %5751 }
  0xd5   : > { %v5754_v4 = vunpack.i.h.bf16 %v7581_v20 }
  0xd6   : > { %v7583_v22 = vpop.permute.xlu0 %5756  ;;  %6041 = vrot.lane.b32.xlu1 %v6040_v50, %s6996_s18 }
  0xd8   : > { %6046 = vrot.lane.b32.xlu0 %v7337_v52, %s6997_s19  ;;  %v7588_v46 = vpop.permute.xlu1 %5761  ;;  %v6070_v52 = vpack.i.bf16 %v759_v38, %v758_v37  ;;  %v763_v37 = vld [vmem:[#allocation3 + $0x128] sm:$0xff] }
  0xda   : > { %v7590_v28 = vpop.permute.xlu0 %5766  ;;  %6051 = vrot.lane.b32.xlu1 %v7345_v61, %s6997_s19  ;;  %v885_v61 = vld [vmem:[#allocation3 + $0xf9] sm:$0xff] }
  0xdb   : > { %v6080_v45 = vpack.i.bf16 %v885_v61, %v884_v43  ;;  %v889_v43 = vld [vmem:[#allocation3 + $0x129] sm:$0xff] }
  0xdc   : > { %6056 = vrot.lane.b32.xlu0 %v7385_v47, %s6998_s14  ;;  %v7596_v31 = vpop.permute.xlu1 %5771 }
  0xde   : > { %v7598_v39 = vpop.permute.xlu0 %5776  ;;  %6061 = vrot.lane.b32.xlu1 %v7389_v54, %s6998_s14 }
  0xe0   : > { %6066 = vrot.lane.b32.xlu0 %v6040_v50, %s6993_s21  ;;  %v7603_v44 = vpop.permute.xlu1 %5781 }
  0xe2   : > { %v7605_v47 = vpop.permute.xlu0 %5786  ;;  %6071 = vrot.lane.b32.xlu1 %v6070_v52, %s6993_s21 }
  0xe3   : > { %9572 = vst [vmem:[#allocation14_spill] sm:$0xff] %v7605_v47 }
  0xe4   : > { %6076 = vrot.lane.b32.xlu0 %v6075_v42, %s6994_s24  ;;  %v7609_v62 = vpop.permute.xlu1 %5791  ;;  %v888_v42 = vld [vmem:[#allocation3 + $0x121] sm:$0xff] }
  0xe5   : > { %9573 = vst [vmem:[#allocation15_spill] sm:$0xff] %v7609_v62 }
  0xe6   : > { %v7611_v48 = vpop.permute.xlu0 %5796  ;;  %6081 = vrot.lane.b32.xlu1 %v6080_v45, %s6994_s24 }
  0xe7   : > { %9574 = vst [vmem:[#allocation16_spill] sm:$0xff] %v7611_v48 }
  0xe8   : > { %6086 = vrot.lane.b32.xlu0 %v7389_v54, %s6995_s30  ;;  %v7616_v49 = vpop.permute.xlu1 %5801  ;;  %v6110_v54 = vpack.i.bf16 %v982_v59, %v981_v58 }
  0xe9   : > { %9575 = vst [vmem:[#allocation17_spill] sm:$0xff] %v7616_v49  ;;  %v5743_v49 = vunpack.i.l.bf16 %v7574_v15 }
  0xea   : > { %v7618_v53 = vpop.permute.xlu0 %5806  ;;  %6091 = vrot.lane.b32.xlu1 %v7393_v56, %s6995_s30 }
  0xeb   : > { %9576 = vst [vmem:[#allocation18_spill] sm:$0xff] %v7618_v53  ;;  %v739_v53 = vld [vmem:[#allocation3 + $0x8] sm:$0xff] }
  0xec   : > { %6096 = vrot.lane.b32.xlu0 %v6070_v52, %s6996_s18  ;;  %v7623_v55 = vpop.permute.xlu1 %5811  ;;  %v6130_v52 = vpack.i.bf16 %v763_v37, %v762_v35  ;;  %v764_v37 = vld [vmem:[#allocation3 + $0x138] sm:$0xff] }
  0xed   : > { %9577 = vst [vmem:[#allocation19_spill] sm:$0xff] %v7623_v55  ;;  %v893_v55 = vld [vmem:[#allocation3 + $0x159] sm:$0xff] }
  0xee   : > { %v7625_v60 = vpop.permute.xlu0 %5816  ;;  %6101 = vrot.lane.b32.xlu1 %v6100_v57, %s6996_s18 }
  0xef   : > { %9578 = vst [vmem:[#allocation20_spill] sm:$0xff] %v7625_v60  ;;  %v986_v60 = vld [vmem:[#allocation3 + $0x141] sm:$0xff] }
  0xf0   : > { %6106 = vrot.lane.b32.xlu0 %v6080_v45, %s6997_s19  ;;  %v7629_v5 = vpop.permute.xlu1 %5821 }
  0xf1   : > { %9579 = vst [vmem:[#allocation21_spill] sm:$0xff] %v7629_v5  ;;  %v765_v5 = vld [vmem:[#allocation3 + $0x140] sm:$0xff] }
  0xf2   : > { %v7631_v50 = vpop.permute.xlu0 %5826  ;;  %6111 = vrot.lane.b32.xlu1 %v6110_v54, %s6997_s19 }
  0xf3   : > { %v5828_v3 = vunpack.i.l.bf16 %v7631_v50 }
  0xf4   : > { %6116 = vrot.lane.b32.xlu0 %v7393_v56, %s6998_s14  ;;  %v7636_v32 = vpop.permute.xlu1 %5831  ;;  %v6140_v56 = vpack.i.bf16 %v889_v43, %v888_v42  ;;  %v7664_v43 = vpack.i.bf16 %v765_v5, %v764_v37  ;;  %v5673_v5 = vunpack.i.l.bf16 %v7509_v63  ;;  %v5744_v37 = vunpack.i.h.bf16 %v7574_v15 }
  0xf5   : > { %v5829_v63 = vunpack.i.h.bf16 %v7631_v50  ;;  %v5833_v8 = vunpack.i.l.bf16 %v7636_v32 }
  0xf6   : > { %v7638_v38 = vpop.permute.xlu0 %5836  ;;  %6121 = vrot.lane.b32.xlu1 %v7397_v0, %s6998_s14  ;;  %v2053_v41 = vsel %vm530_vm2, %v7404_v10, %v5673_v5 }
  0xf8   : > { %6126 = vrot.lane.b32.xlu0 %v6100_v57, %s6993_s21  ;;  %v7643_v61 = vpop.permute.xlu1 %5841  ;;  %v7654_v57 = vpack.i.bf16 %v921_v51, %v920_v26  ;;  %v5669_v26 = vunpack.i.h.bf16 %v7501_v14  ;;  %v5668_v51 = vunpack.i.l.bf16 %v7501_v14  ;;  %v767_v14 = vld [vmem:[#allocation3 + $0x158] sm:$0xff] }
  0xf9   : > { %v7683_v15 = vpack.i.bf16 %v767_v14, %v766_v36  ;;  %v2054_v36 = vsel %vm530_vm2, %v7406_v11, %v5674_v6 }
  0xfa   : > { %v7645_v45 = vpop.permute.xlu0 %5846  ;;  %6131 = vrot.lane.b32.xlu1 %v6130_v52, %s6993_s21  ;;  %v2052_v47 = vsel %vm530_vm2, %v739_v53, %v5669_v26 }
  0xfc   : > { %6136 = vrot.lane.b32.xlu0 %v6110_v54, %s6994_s24  ;;  %v7649_v58 = vpop.permute.xlu1 %5851  ;;  %v985_v54 = vld [vmem:[#allocation3 + $0x139] sm:$0xff] }
  0xfd   : > { %v7675_v13 = vpack.i.bf16 %v986_v60, %v985_v54  ;;  %v5834_v60 = vunpack.i.h.bf16 %v7636_v32  ;;  %v2086_v54 = vsel %vm442_vm0, %v2054_v36, %v5754_v4 }
  0xfe   : > { %v7651_v59 = vpop.permute.xlu0 %5856  ;;  %6141 = vrot.lane.b32.xlu1 %v6140_v56, %s6994_s24 }
  0xff   : > { %v2119_v4 = vsel %vm2115_vm4, %v2086_v54, %v5834_v60 }
 0x100   : > { %6146 = vrot.lane.b32.xlu0 %v7397_v0, %s6995_s30  ;;  %v7658_v35 = vpop.permute.xlu1 %5861  ;;  %v892_v0 = vld [vmem:[#allocation3 + $0x151] sm:$0xff] }
 0x101   : > { %v7685_v62 = vpack.i.bf16 %v893_v55, %v892_v0  ;;  %v2084_v55 = vsel %vm442_vm0, %v2052_v47, %v5744_v37  ;;  %v5864_v32 = vunpack.i.h.bf16 %v7658_v35 }
 0x102   : > { %v7660_v42 = vpop.permute.xlu0 %5866  ;;  %6151 = vrot.lane.b32.xlu1 %v7654_v57, %s6995_s30 }
 0x103   : > { %v5869_v11 = vunpack.i.h.bf16 %v7660_v42  ;;  %v5868_v6 = vunpack.i.l.bf16 %v7660_v42 }
 0x104   : > { %6156 = vrot.lane.b32.xlu0 %v6130_v52, %s6996_s18  ;;  %v5872_v48 = vpop.permute.xlu1 %5871  ;;  %v5753_v52 = vunpack.i.l.bf16 %v7581_v20  ;;  %v2051_v20 = vsel %vm530_vm2, %v738_v7, %v5668_v51  ;;  %v2117_v51 = vsel %vm2115_vm4, %v2084_v55, %v5829_v63 }
 0x105   : > { %v2083_v50 = vsel %vm442_vm0, %v2051_v20, %v5743_v49  ;;  %v5874_v49 = vunpack.i.h.bf16 %v5872_v48  ;;  %v5873_v0 = vunpack.i.l.bf16 %v5872_v48  ;;  %v2152_v48 = vsel %vm2148_vm5, %v2119_v4, %v5869_v11 }
 0x106   : > { %v5877_v9 = vpop.permute.xlu0 %5876  ;;  %6161 = vrot.lane.b32.xlu1 %v7664_v43, %s6996_s18  ;;  %v2085_v7 = vsel %vm442_vm0, %v2053_v41, %v5753_v52  ;;  %v2116_v10 = vsel %vm2115_vm4, %v2083_v50, %v5828_v3  ;;  %v2150_v52 = vsel %vm2148_vm5, %v2117_v51, %v5864_v32 }
 0x107   : > { %v2118_v47 = vsel %vm2115_vm4, %v2085_v7, %v5833_v8  ;;  %v5879_v3 = vunpack.i.h.bf16 %v5877_v9 }
 0x108   : > { %6166 = vrot.lane.b32.xlu0 %v6140_v56, %s6997_s19  ;;  %v5882_v53 = vpop.permute.xlu1 %5881  ;;  %v5863_v56 = vunpack.i.l.bf16 %v7658_v35  ;;  %v5878_v35 = vunpack.i.l.bf16 %v5877_v9  ;;  %v2151_v60 = vsel %vm2148_vm5, %v2118_v47, %v5868_v6 }
 0x109   : > { %v5884_v5 = vunpack.i.h.bf16 %v5882_v53  ;;  %v5883_v37 = vunpack.i.l.bf16 %v5882_v53  ;;  %v2185_v7 = vsel %vm2181_vm6, %v2152_v48, %v5879_v3  ;;  %v989_v48 = vld [vmem:[#allocation3 + $0x169] sm:$0xff] }
 0x10a   : > { %v5887_v26 = vpop.permute.xlu0 %5886  ;;  %6171 = vrot.lane.b32.xlu1 %v7675_v13, %s6997_s19  ;;  %v2149_v42 = vsel %vm2148_vm5, %v2116_v10, %v5863_v56  ;;  %v2184_v53 = vsel %vm2181_vm6, %v2151_v60, %v5878_v35 }
 0x10b   : > { %v5889_v63 = vunpack.i.h.bf16 %v5887_v26  ;;  %v5888_v20 = vunpack.i.l.bf16 %v5887_v26  ;;  %v2182_v9 = vsel %vm2181_vm6, %v2149_v42, %v5873_v0 }
 0x10c   : > { %6176 = vrot.lane.b32.xlu0 %v7654_v57, %s6998_s14  ;;  %v5892_v14 = vpop.permute.xlu1 %5891  ;;  %v2183_v57 = vsel %vm2181_vm6, %v2150_v52, %v5874_v49  ;;  %v2215_v32 = vsel %vm2214_vm7, %v2182_v9, %v5883_v37  ;;  %v924_v37 = vld [vmem:[#allocation3 + $0x152] sm:$0xff]  ;;  %v5679_v9 = vunpack.i.h.bf16 %v7507_v21 }
 0x10d   : > { %v5894_v41 = vunpack.i.h.bf16 %v5892_v14  ;;  %v5893_v36 = vunpack.i.l.bf16 %v5892_v14  ;;  %v2216_v56 = vsel %vm2214_vm7, %v2183_v57, %v5884_v5  ;;  %v2217_v26 = vsel %vm2214_vm7, %v2184_v53, %v5888_v20  ;;  %v925_v14 = vld [vmem:[#allocation3 + $0x15a] sm:$0xff]  ;;  %v865_v53 = vld [vmem:[#allocation3 + $0x188] sm:$0xff] }
 0x10e   : > { %v5897_v8 = vpop.permute.xlu0 %5896  ;;  %6181 = vrot.lane.b32.xlu1 %v7677_v2, %s6998_s14  ;;  %v2218_v10 = vsel %vm2214_vm7, %v2185_v7, %v5889_v63  ;;  %v5678_v57 = vunpack.i.l.bf16 %v7507_v21  ;;  %v5684_v7 = vunpack.i.h.bf16 %v7515_v12  ;;  %v5764_v21 = vunpack.i.h.bf16 %v7588_v46 }
 0x10f   : > { %v5899_v55 = vunpack.i.h.bf16 %v5897_v8  ;;  %v5898_v50 = vunpack.i.l.bf16 %v5897_v8  ;;  %v2249_v49 = vsel %vm2247_vm8, %v2216_v56, %v5894_v41  ;;  %v990_v41 = vld [vmem:[#allocation3 + $0x171] sm:$0xff] }
 0x110   : > { %6186 = vrot.lane.b32.xlu0 %v7664_v43, %s6993_s21  ;;  %v5902_v54 = vpop.permute.xlu1 %5901  ;;  %v2248_v43 = vsel %vm2247_vm8, %v2215_v32, %v5893_v36  ;;  %v1021_v36 = vld [vmem:[#allocation3 + $0x16a] sm:$0xff] }
 0x111   : > { %v5904_v51 = vunpack.i.h.bf16 %v5902_v54  ;;  %v5903_v11 = vunpack.i.l.bf16 %v5902_v54  ;;  %v2250_v0 = vsel %vm2247_vm8, %v2217_v26, %v5898_v50  ;;  %v2251_v3 = vsel %vm2247_vm8, %v2218_v10, %v5899_v55  ;;  %v1022_v55 = vld [vmem:[#allocation3 + $0x172] sm:$0xff]  ;;  %v864_v50 = vld [vmem:[#allocation3 + $0x180] sm:$0xff]  ;;  %v768_v32 = vld [vmem:[#allocation3 + $0x168] sm:$0xff] }
 0x112   : > { %v5907_v6 = vpop.permute.xlu0 %5906  ;;  %6191 = vrot.lane.b32.xlu1 %v7683_v15, %s6993_s21  ;;  %v5683_v54 = vunpack.i.l.bf16 %v7515_v12  ;;  %v769_v56 = vld [vmem:[#allocation3 + $0x170] sm:$0xff]  ;;  %v5759_v26 = vunpack.i.h.bf16 %v7583_v22  ;;  %v5758_v10 = vunpack.i.l.bf16 %v7583_v22  ;;  %v5838_v12 = vunpack.i.l.bf16 %v7638_v38 }
 0x113   : > { %v5909_v47 = vunpack.i.h.bf16 %v5907_v6  ;;  %v5908_v4 = vunpack.i.l.bf16 %v5907_v6  ;;  %v2281_v35 = vsel %vm2280_vm9, %v2248_v43, %v5903_v11  ;;  %v2282_v5 = vsel %vm2280_vm9, %v2249_v49, %v5904_v51 }
 0x114   : > { %6196 = vrot.lane.b32.xlu0 %v7675_v13, %s6994_s24  ;;  %v7740_v63 = vpop.permute.xlu1 %5911  ;;  %v2313_v20 = vpack.c.bf16 %v2282_v5, %v2281_v35  ;;  %v7747_v13 = vpack.i.bf16 %v925_v14, %v924_v37  ;;  %v7760_v6 = vpack.i.bf16 %v769_v56, %v768_v32  ;;  %v7768_v43 = vpack.i.bf16 %v1022_v55, %v1021_v36 }
 0x115   : > { %v2283_v42 = vsel %vm2280_vm9, %v2250_v0, %v5908_v4  ;;  %v2284_v52 = vsel %vm2280_vm9, %v2251_v3, %v5909_v47  ;;  %v7762_v47 = vpack.i.bf16 %v990_v41, %v989_v48  ;;  %v5839_v4 = vunpack.i.h.bf16 %v7638_v38 }
 0x116   : > { %v7742_v8 = vpop.permute.xlu0 %5916  ;;  %v2314_v60 = vpack.c.bf16 %v2284_v52, %v2283_v42  ;;  %6201 = vrot.lane.b32.xlu1 %v7685_v62, %s6994_s24  ;;  %5526 = vmatprep.mubr.msk.bf16.mxu0 %vm2356_vm10, %v2313_v20  ;;  %v7770_v22 = vpack.i.bf16 %v865_v53, %v864_v50  ;;  %v2055_v49 = vsel %vm530_vm2, %v7412_v16, %v5678_v57  ;;  %v5844_v0 = vunpack.i.h.bf16 %v7643_v61 }
 0x117   : > { %v5843_v3 = vunpack.i.l.bf16 %v7643_v61  ;;  %v2058_v38 = vsel %vm530_vm2, %v7418_v19, %v5684_v7  ;;  %v2057_v35 = vsel %vm530_vm2, %v7416_v18, %v5683_v54  ;;  %v2087_v16 = vsel %vm442_vm0, %v2055_v49, %v5758_v10 }
 0x118   : > { %6206 = vrot.lane.b32.xlu0 %v7677_v2, %s6995_s30  ;;  %5527 = vmatmul.mubr.msk.bf16.vlgmr.msra.gmra.mrb[0].mxu0 %vm2356_vm10, %v2314_v60  ;;  %v5922_v51 = vpop.permute.xlu1 %5921  ;;  %v5763_v2 = vunpack.i.l.bf16 %v7588_v46  ;;  %v2056_v46 = vsel %vm530_vm2, %v7414_v17, %v5679_v9  ;;  %v2090_v17 = vsel %vm442_vm0, %v2058_v38, %v5764_v21  ;;  %v5914_v61 = vunpack.i.h.bf16 %v7740_v63 }
 0x119   : > { %v2088_v5 = vsel %vm442_vm0, %v2056_v46, %v5759_v26  ;;  %v5913_v42 = vunpack.i.l.bf16 %v7740_v63  ;;  %v2120_v52 = vsel %vm2115_vm4, %v2087_v16, %v5838_v12  ;;  %v5919_v18 = vunpack.i.h.bf16 %v7742_v8 }
 0x11a   : > { %v5927_v11 = vpop.permute.xlu0 %5926  ;;  %6211 = vrot.lane.b32.xlu1 %v7747_v13, %s6995_s30  ;;  %v2089_v14 = vsel %vm442_vm0, %v2057_v35, %v5763_v2  ;;  %v2121_v19 = vsel %vm2115_vm4, %v2088_v5, %v5839_v4  ;;  %v5918_v20 = vunpack.i.l.bf16 %v7742_v8  ;;  %v2123_v48 = vsel %vm2115_vm4, %v2090_v17, %v5844_v0 }
 0x11b   : > { %v2122_v60 = vsel %vm2115_vm4, %v2089_v14, %v5843_v3  ;;  %v5924_v41 = vunpack.i.h.bf16 %v5922_v51  ;;  %v5923_v36 = vunpack.i.l.bf16 %v5922_v51  ;;  %v5929_v63 = vunpack.i.h.bf16 %v5927_v11 }
 0x11c   : > { %6216 = vrot.lane.b32.xlu0 %v7683_v15, %s6996_s18  ;;  %v5932_v37 = vpop.permute.xlu1 %5931  ;;  %v5928_v9 = vunpack.i.l.bf16 %v5927_v11  ;;  %v2153_v53 = vsel %vm2148_vm5, %v2120_v52, %v5913_v42  ;;  %v2154_v8 = vsel %vm2148_vm5, %v2121_v19, %v5914_v61  ;;  %v2156_v56 = vsel %vm2148_vm5, %v2123_v48, %v5919_v18  ;;  %v896_v19 = vld [vmem:[#allocation3 + $0x181] sm:$0xff]  ;;  %v897_v18 = vld [vmem:[#allocation3 + $0x189] sm:$0xff] }
 0x11d   : > { %v5934_v57 = vunpack.i.h.bf16 %v5932_v37  ;;  %v5933_v55 = vunpack.i.l.bf16 %v5932_v37  ;;  %v2155_v26 = vsel %vm2148_vm5, %v2122_v60, %v5918_v20  ;;  %v2187_v21 = vsel %vm2181_vm6, %v2154_v8, %v5924_v41  ;;  %v962_v8 = vld [vmem:[#allocation3 + $0x1a0] sm:$0xff] }
 0x11e   : > { %v5937_v15 = vpop.permute.xlu0 %5936  ;;  %6221 = vrot.lane.b32.xlu1 %v7760_v6, %s6996_s18  ;;  %v2188_v4 = vsel %vm2181_vm6, %v2155_v26, %v5928_v9  ;;  %v2189_v12 = vsel %vm2181_vm6, %v2156_v56, %v5929_v63  ;;  %v928_v9 = vld [vmem:[#allocation3 + $0x182] sm:$0xff]  ;;  %v5769_v56 = vunpack.i.h.bf16 %v7590_v28  ;;  %v5768_v26 = vunpack.i.l.bf16 %v7590_v28 }
 0x11f   : > { %v5939_v7 = vunpack.i.h.bf16 %v5937_v15  ;;  %v5938_v54 = vunpack.i.l.bf16 %v5937_v15  ;;  %v2220_v46 = vsel %vm2214_vm7, %v2187_v21, %v5934_v57  ;;  %v5689_v57 = vunpack.i.h.bf16 %v7517_v29  ;;  %v7855_v21 = vld [vmem:[#allocation3 + $0x1a2] sm:$0xff] }
 0x120   : > { %6226 = vrot.lane.b32.xlu0 %v7685_v62, %s6997_s19  ;;  %v5942_v50 = vpop.permute.xlu1 %5941  ;;  %v2186_v62 = vsel %vm2181_vm6, %v2153_v53, %v5923_v36  ;;  %v7839_v53 = vld [vmem:[#allocation3 + $0x198] sm:$0xff] }
 0x121   : > { %v5944_v10 = vunpack.i.h.bf16 %v5942_v50  ;;  %v5943_v51 = vunpack.i.l.bf16 %v5942_v50  ;;  %v2219_v49 = vsel %vm2214_vm7, %v2186_v62, %v5933_v55  ;;  %v2221_v3 = vsel %vm2214_vm7, %v2188_v4, %v5938_v54  ;;  %v929_v50 = vld [vmem:[#allocation3 + $0x18a] sm:$0xff]  ;;  %v7845_v54 = vld [vmem:[#allocation3 + $0x199] sm:$0xff] }
 0x122   : > { %v5947_v32 = vpop.permute.xlu0 %5946  ;;  %6231 = vrot.lane.b32.xlu1 %v7762_v47, %s6997_s19  ;;  %v2222_v38 = vsel %vm2214_vm7, %v2189_v12, %v5939_v7  ;;  %v5688_v55 = vunpack.i.l.bf16 %v7517_v29  ;;  %v5694_v7 = vunpack.i.h.bf16 %v7523_v33  ;;  %v7847_v29 = vld [vmem:[#allocation3 + $0x1a1] sm:$0xff]  ;;  %v7859_v4 = vpack.i.bf16 %v929_v50, %v928_v9 }
 0x123   : > { %v5949_v2 = vunpack.i.h.bf16 %v5947_v32  ;;  %v5948_v11 = vunpack.i.l.bf16 %v5947_v32  ;;  %v2252_v37 = vsel %vm2247_vm8, %v2219_v49, %v5943_v51  ;;  %v5693_v32 = vunpack.i.l.bf16 %v7523_v33  ;;  %v7853_v62 = vld [vmem:[#allocation3 + $0x19a] sm:$0xff] }
 0x124   : > { %6236 = vrot.lane.b32.xlu0 %v7747_v13, %s6998_s14  ;;  %v5952_v0 = vpop.permute.xlu1 %5951  ;;  %v2253_v13 = vsel %vm2247_vm8, %v2220_v46, %v5944_v10  ;;  %v5774_v10 = vunpack.i.h.bf16 %v7596_v31  ;;  %v6280_v33 = vpack.i.bf16 %v962_v8, %v7839_v53  ;;  %v2060_v12 = vsel %vm530_vm2, %v7428_v24, %v5689_v57 }
 0x125   : > { %v5954_v35 = vunpack.i.h.bf16 %v5952_v0  ;;  %v5953_v5 = vunpack.i.l.bf16 %v5952_v0  ;;  %v2254_v61 = vsel %vm2247_vm8, %v2221_v3, %v5948_v11  ;;  %v2255_v42 = vsel %vm2247_vm8, %v2222_v38, %v5949_v2 }
 0x126   : > { %v5957_v16 = vpop.permute.xlu0 %5956  ;;  %6241 = vrot.lane.b32.xlu1 %v7768_v43, %s6998_s14  ;;  %v5848_v2 = vunpack.i.l.bf16 %v7645_v45  ;;  %v2059_v28 = vsel %vm530_vm2, %v7426_v23, %v5688_v55  ;;  %v5849_v49 = vunpack.i.h.bf16 %v7645_v45  ;;  %v2062_v46 = vsel %vm530_vm2, %v7432_v27, %v5694_v7 }
 0x127   : > { %v5959_v17 = vunpack.i.h.bf16 %v5957_v16  ;;  %v5958_v14 = vunpack.i.l.bf16 %v5957_v16  ;;  %v2285_v15 = vsel %vm2280_vm9, %v2252_v37, %v5953_v5  ;;  %v2286_v52 = vsel %vm2280_vm9, %v2253_v13, %v5954_v35 }
 0x128   : > { %6246 = vrot.lane.b32.xlu0 %v7760_v6, %s6993_s21  ;;  %v7828_v48 = vpop.permute.xlu1 %5961  ;;  %v2315_v41 = vpack.c.bf16 %v2286_v52, %v2285_v15  ;;  %v7837_v6 = vpack.i.bf16 %v897_v18, %v896_v19  ;;  %v5854_v0 = vunpack.i.h.bf16 %v7649_v58  ;;  %v5853_v3 = vunpack.i.l.bf16 %v7649_v58 }
 0x129   : > { %v2287_v20 = vsel %vm2280_vm9, %v2254_v61, %v5958_v14  ;;  %v2288_v60 = vsel %vm2280_vm9, %v2255_v42, %v5959_v17  ;;  %v6300_v23 = vpack.i.bf16 %v7855_v21, %v7853_v62  ;;  %v2061_v24 = vsel %vm530_vm2, %v7430_v25, %v5693_v32  ;;  %v2937_v32 = vld [vmem:[#allocation3 + $0x1] sm:$0xff] }
 0x12a   : > { %v7830_v36 = vpop.permute.xlu0 %5966  ;;  %v2316_v63 = vpack.c.bf16 %v2288_v60, %v2287_v20  ;;  %6251 = vrot.lane.b32.xlu1 %v7770_v22, %s6993_s21  ;;  %5530 = vmatprep.mubr.msk.bf16.mxu0 %vm2356_vm10, %v2315_v41  ;;  %v2091_v45 = vsel %vm442_vm0, %v2059_v28, %v5768_v26  ;;  %v2092_v38 = vsel %vm442_vm0, %v2060_v12, %v5769_v56  ;;  %v5964_v16 = vunpack.i.h.bf16 %v7828_v48  ;;  %v2938_v56 = vld [vmem:[#allocation3 + $0x9] sm:$0xff] }
 0x12b   : > { %v2094_v35 = vsel %vm442_vm0, %v2062_v46, %v5774_v10  ;;  %v2124_v58 = vsel %vm2115_vm4, %v2091_v45, %v5848_v2  ;;  %v2125_v13 = vsel %vm2115_vm4, %v2092_v38, %v5849_v49  ;;  %v5969_v25 = vunpack.i.h.bf16 %v7830_v36 }
 0x12c   : > { %6256 = vrot.lane.b32.xlu0 %v7762_v47, %s6994_s24  ;;  %5531 = vmatmul.mubr.msk.bf16.gmra.mrb[4].mxu0 %vm2356_vm10, %v2316_v63  ;;  %v5972_v51 = vpop.permute.xlu1 %5971  ;;  %v5773_v47 = vunpack.i.l.bf16 %v7596_v31  ;;  %v6290_v31 = vpack.i.bf16 %v7847_v29, %v7845_v54  ;;  %v5968_v17 = vunpack.i.l.bf16 %v7830_v36  ;;  %v2127_v42 = vsel %vm2115_vm4, %v2094_v35, %v5854_v0 }
 0x12d   : > { %v5973_v14 = vunpack.i.l.bf16 %v5972_v51  ;;  %v5974_v15 = vunpack.i.h.bf16 %v5972_v51  ;;  %v2158_v36 = vsel %vm2148_vm5, %v2125_v13, %v5964_v16  ;;  %v2160_v55 = vsel %vm2148_vm5, %v2127_v42, %v5969_v25 }
 0x12e   : > { %v5977_v11 = vpop.permute.xlu0 %5976  ;;  %6261 = vrot.lane.b32.xlu1 %v7837_v6, %s6994_s24  ;;  %v2093_v5 = vsel %vm442_vm0, %v2061_v24, %v5773_v47  ;;  %v5779_v62 = vunpack.i.h.bf16 %v7598_v39  ;;  %v5778_v21 = vunpack.i.l.bf16 %v7598_v39  ;;  %v5859_v39 = vunpack.i.h.bf16 %v7651_v59 }
 0x12f   : > { %v2126_v61 = vsel %vm2115_vm4, %v2093_v5, %v5853_v3  ;;  %v5978_v52 = vunpack.i.l.bf16 %v5977_v11  ;;  %v5979_v19 = vunpack.i.h.bf16 %v5977_v11  ;;  %v6305_v3 = vpack.i.bf16 %v2938_v56, %v2937_v32 }
 0x130   : > { %6266 = vrot.lane.b32.xlu0 %v7768_v43, %s6995_s30  ;;  %v5982_v27 = vpop.permute.xlu1 %5981  ;;  %v5963_v43 = vunpack.i.l.bf16 %v7828_v48  ;;  %v2159_v50 = vsel %vm2148_vm5, %v2126_v61, %v5968_v17  ;;  %v5699_v17 = vunpack.i.h.bf16 %v7525_v34  ;;  %v5704_v61 = vunpack.i.h.bf16 %v7531_v30 }
 0x131   : > { %v5984_v18 = vunpack.i.h.bf16 %v5982_v27  ;;  %v5983_v20 = vunpack.i.l.bf16 %v5982_v27  ;;  %v2192_v7 = vsel %vm2181_vm6, %v2159_v50, %v5978_v52  ;;  %v2193_v26 = vsel %vm2181_vm6, %v2160_v55, %v5979_v19 }
 0x132   : > { %v5987_v37 = vpop.permute.xlu0 %5986  ;;  %6271 = vrot.lane.b32.xlu1 %v7859_v4, %s6995_s30  ;;  %v2157_v41 = vsel %vm2148_vm5, %v2124_v58, %v5963_v43  ;;  %v2969_v43 = vld [vmem:[#allocation3 + $0x2] sm:$0xff]  ;;  %v5783_v52 = vunpack.i.l.bf16 %v7603_v44  ;;  %v5858_v19 = vunpack.i.l.bf16 %v7651_v59 }
 0x133   : > { %v5988_v60 = vunpack.i.l.bf16 %v5987_v37  ;;  %v5989_v63 = vunpack.i.h.bf16 %v5987_v37  ;;  %v2190_v53 = vsel %vm2181_vm6, %v2157_v41, %v5973_v14  ;;  %v5698_v14 = vunpack.i.l.bf16 %v7525_v34 }
 0x134   : > { %6276 = vrot.lane.b32.xlu0 %v7770_v22, %s6996_s18  ;;  %v5992_v48 = vpop.permute.xlu1 %5991  ;;  %v2191_v22 = vsel %vm2181_vm6, %v2158_v36, %v5974_v15  ;;  %v2223_v10 = vsel %vm2214_vm7, %v2190_v53, %v5983_v20  ;;  %v5703_v15 = vunpack.i.l.bf16 %v7531_v30  ;;  %v6954_v20 = vld [vmem:[#allocation3 + $0x98] sm:$0xff]  ;;  %v6956_v30 = vld [vmem:[#allocation3 + $0xb0] sm:$0xff] }
 0x135   : > { %v5993_v9 = vunpack.i.l.bf16 %v5992_v48  ;;  %v5994_v8 = vunpack.i.h.bf16 %v5992_v48  ;;  %v2224_v51 = vsel %vm2214_vm7, %v2191_v22, %v5984_v18  ;;  %v2225_v47 = vsel %vm2214_vm7, %v2192_v7, %v5988_v60  ;;  %v6955_v60 = vld [vmem:[#allocation3 + $0x90] sm:$0xff] }
 0x136   : > { %v5997_v57 = vpop.permute.xlu0 %5996  ;;  %6281 = vrot.lane.b32.xlu1 %v6280_v33, %s6996_s18  ;;  %v2226_v11 = vsel %vm2214_vm7, %v2193_v26, %v5989_v63  ;;  %v2064_v34 = vsel %vm530_vm2, %v6954_v20, %v5699_v17  ;;  %v2063_v48 = vsel %vm530_vm2, %v6955_v60, %v5698_v14  ;;  %v2066_v41 = vsel %vm530_vm2, %v6956_v30, %v5704_v61 }
 0x137   : > { %v5999_v54 = vunpack.i.h.bf16 %v5997_v57  ;;  %v5998_v29 = vunpack.i.l.bf16 %v5997_v57  ;;  %v2256_v33 = vsel %vm2247_vm8, %v2223_v10, %v5993_v9  ;;  %v2095_v53 = vsel %vm442_vm0, %v2063_v48, %v5778_v21 }
 0x138   : > { %6286 = vrot.lane.b32.xlu0 %v7837_v6, %s6997_s19  ;;  %v6002_v2 = vpop.permute.xlu1 %6001  ;;  %v2257_v6 = vsel %vm2247_vm8, %v2224_v51, %v5994_v8  ;;  %v2096_v8 = vsel %vm442_vm0, %v2064_v34, %v5779_v62 }
 0x139   : > { %v6004_v12 = vunpack.i.h.bf16 %v6002_v2  ;;  %v6003_v28 = vunpack.i.l.bf16 %v6002_v2  ;;  %v2258_v24 = vsel %vm2247_vm8, %v2225_v47, %v5998_v29  ;;  %v2259_v45 = vsel %vm2247_vm8, %v2226_v11, %v5999_v54 }
 0x13a   : > { %v6007_v49 = vpop.permute.xlu0 %6006  ;;  %6291 = vrot.lane.b32.xlu1 %v6290_v31, %s6997_s19  ;;  %v2970_v31 = vld [vmem:[#allocation3 + $0xa] sm:$0xff]  ;;  %v2128_v54 = vsel %vm2115_vm4, %v2095_v53, %v5858_v19  ;;  %v2129_v56 = vsel %vm2115_vm4, %v2096_v8, %v5859_v39  ;;  %v9580_v53 = vld [vmem:[#allocation14_spill] sm:$0xff]  ;;  %s7001_s19 = smov 64  }
 0x13b   : > { %v6009_v46 = vunpack.i.h.bf16 %v6007_v49  ;;  %v6008_v0 = vunpack.i.l.bf16 %v6007_v49  ;;  %v2289_v38 = vsel %vm2280_vm9, %v2256_v33, %v6003_v28  ;;  %v2290_v35 = vsel %vm2280_vm9, %v2257_v6, %v6004_v12 }
 0x13c   : > { %6296 = vrot.lane.b32.xlu0 %v7859_v4, %s6998_s14  ;;  %v6012_v58 = vpop.permute.xlu1 %6011  ;;  %v2317_v16 = vpack.c.bf16 %v2290_v35, %v2289_v38  ;;  %v6310_v4 = vpack.i.bf16 %v2970_v31, %v2969_v43  ;;  %v5789_v8 = vunpack.i.h.bf16 %v9580_v53 }
 0x13d   : > { %v2291_v27 = vsel %vm2280_vm9, %v2258_v24, %v6008_v0  ;;  %v2292_v5 = vsel %vm2280_vm9, %v2259_v45, %v6009_v46  ;;  %v6014_v63 = vunpack.i.h.bf16 %v6012_v58  ;;  %v6013_v9 = vunpack.i.l.bf16 %v6012_v58 }
 0x13e   : > { %v6017_v37 = vpop.permute.xlu0 %6016  ;;  %v2318_v13 = vpack.c.bf16 %v2292_v5, %v2291_v27  ;;  %6301 = vrot.lane.b32.xlu1 %v6300_v23, %s6998_s14  ;;  %5534 = vmatprep.mubr.msk.bf16.mxu0 %vm2356_vm10, %v2317_v16  ;;  %v5784_v23 = vunpack.i.h.bf16 %v7603_v44  ;;  %v6957_v44 = vld [vmem:[#allocation3 + $0xa8] sm:$0xff] }
 0x13f   : > { %v6019_v57 = vunpack.i.h.bf16 %v6017_v37  ;;  %v6018_v55 = vunpack.i.l.bf16 %v6017_v37  ;;  %v2065_v50 = vsel %vm530_vm2, %v6957_v44, %v5703_v15 }
 0x140   : > { %5535 = vmatmul.mubr.msk.bf16.gmra.mrb[8].mxu0 %vm2356_vm10, %v2318_v13  ;;  %6306 = vrot.lane.b32.xlu0 %v6305_v3, %s6992_s20  ;;  %v7930_v25 = vpop.permute.xlu1 %6021  ;;  %v2098_v22 = vsel %vm442_vm0, %v2066_v41, %v5784_v23  ;;  %v2097_v7 = vsel %vm442_vm0, %v2065_v50, %v5783_v52  ;;  %v5713_v50 = vunpack.i.l.bf16 %v7539_v40 }
 0x141   : > { %v6023_v26 = vunpack.i.l.bf16 %v7930_v25  ;;  %v2130_v2 = vsel %vm2115_vm4, %v2097_v7, %v6013_v9  ;;  %v2131_v11 = vsel %vm2115_vm4, %v2098_v22, %v6014_v63  ;;  %v2161_v33 = vsel %vm2148_vm5, %v2128_v54, %v6018_v55  ;;  %v9581_v7 = vld [vmem:[#allocation15_spill] sm:$0xff] }
 0x142   : > { %v6027_v42 = vpop.permute.xlu0 %6026  ;;  %v2162_v12 = vsel %vm2148_vm5, %v2129_v56, %v6019_v57  ;;  %v6024_v28 = vunpack.i.h.bf16 %v7930_v25  ;;  %v5709_v9 = vunpack.i.h.bf16 %v7533_v1  ;;  %v5708_v57 = vunpack.i.l.bf16 %v7533_v1  ;;  %v9582_v56 = vld [vmem:[#allocation5_spill] sm:$0xff] }
 0x143   : > { %v6029_v29 = vunpack.i.h.bf16 %v6027_v42  ;;  %v6028_v59 = vunpack.i.l.bf16 %v6027_v42  ;;  %v2163_v35 = vsel %vm2148_vm5, %v2130_v2, %v6023_v26  ;;  %v5714_v55 = vunpack.i.h.bf16 %v7539_v40 }
 0x144   : > { %6311 = vrot.lane.b32.xlu0 %v6310_v4, %s6994_s24  ;;  %v6032_v18 = vpop.permute.xlu1 %6031  ;;  %v2164_v4 = vsel %vm2148_vm5, %v2131_v11, %v6024_v28  ;;  %v5788_v22 = vunpack.i.l.bf16 %v9580_v53  ;;  %v5794_v54 = vunpack.i.h.bf16 %v9581_v7  ;;  %v2068_v26 = vsel %vm530_vm2, %v9582_v56, %v5709_v9 }
 0x145   : > { %v6033_v49 = vunpack.i.l.bf16 %v6032_v18  ;;  %v2194_v0 = vsel %vm2181_vm6, %v2161_v33, %v6028_v59  ;;  %v2195_v3 = vsel %vm2181_vm6, %v2162_v12, %v6029_v29  ;;  %v6034_v24 = vunpack.i.h.bf16 %v6032_v18 }
 0x146   : > { %v6037_v36 = vpop.permute.xlu0 %6036  ;;  %v5793_v29 = vunpack.i.l.bf16 %v9581_v7 }
 0x147   : > { %v6039_v10 = vunpack.i.h.bf16 %v6037_v36  ;;  %v6038_v51 = vunpack.i.l.bf16 %v6037_v36  ;;  %v2196_v25 = vsel %vm2181_vm6, %v2163_v35, %v6033_v49  ;;  %v2197_v61 = vsel %vm2181_vm6, %v2164_v4, %v6034_v24  ;;  %v9585_v49 = vld [vmem:[#allocation12_spill] sm:$0xff] }
 0x148   : > { %v6042_v32 = vpop.permute.xlu1 %6041 }
 0x149   : > { %v6043_v45 = vunpack.i.l.bf16 %v6042_v32  ;;  %v2227_v27 = vsel %vm2214_vm7, %v2194_v0, %v6038_v51  ;;  %v2228_v5 = vsel %vm2214_vm7, %v2195_v3, %v6039_v10  ;;  %v6044_v58 = vunpack.i.h.bf16 %v6042_v32  ;;  %v9583_v10 = vld [vmem:[#allocation4_spill] sm:$0xff]  ;;  %v9584_v51 = vld [vmem:[#allocation13_spill] sm:$0xff] }
 0x14a   : > { %v6047_v47 = vpop.permute.xlu0 %6046  ;;  %v2067_v1 = vsel %vm530_vm2, %v9583_v10, %v5708_v57  ;;  %v2100_v0 = vsel %vm442_vm0, %v2068_v26, %v5789_v8 }
 0x14b   : > { %v6049_v6 = vunpack.i.h.bf16 %v6047_v47  ;;  %v6048_v46 = vunpack.i.l.bf16 %v6047_v47  ;;  %v2229_v42 = vsel %vm2214_vm7, %v2196_v25, %v6043_v45  ;;  %v2230_v23 = vsel %vm2214_vm7, %v2197_v61, %v6044_v58 }
 0x14c   : > { %v6052_v38 = vpop.permute.xlu1 %6051  ;;  %v2070_v47 = vsel %vm530_vm2, %v9584_v51, %v5714_v55 }
 0x14d   : > { %v6054_v43 = vunpack.i.h.bf16 %v6052_v38  ;;  %v6053_v31 = vunpack.i.l.bf16 %v6052_v38  ;;  %v2260_v17 = vsel %vm2247_vm8, %v2227_v27, %v6048_v46  ;;  %v2261_v14 = vsel %vm2247_vm8, %v2228_v5, %v6049_v6 }
 0x14e   : > { %v6057_v16 = vpop.permute.xlu0 %6056  ;;  %v2069_v6 = vsel %vm530_vm2, %v9585_v49, %v5713_v50  ;;  %v2099_v46 = vsel %vm442_vm0, %v2067_v1, %v5788_v22  ;;  %v2102_v3 = vsel %vm442_vm0, %v2070_v47, %v5794_v54 }
 0x14f   : > { %v6059_v37 = vunpack.i.h.bf16 %v6057_v16  ;;  %v6058_v13 = vunpack.i.l.bf16 %v6057_v16  ;;  %v2262_v34 = vsel %vm2247_vm8, %v2229_v42, %v6053_v31  ;;  %v2263_v60 = vsel %vm2247_vm8, %v2230_v23, %v6054_v43 }
 0x150   : > { %v6062_v21 = vpop.permute.xlu1 %6061  ;;  %v2101_v24 = vsel %vm442_vm0, %v2069_v6, %v5793_v29 }
 0x151   : > { %v2293_v15 = vsel %vm2280_vm9, %v2260_v17, %v6058_v13  ;;  %v2294_v62 = vsel %vm2280_vm9, %v2261_v14, %v6059_v37  ;;  %v6064_v52 = vunpack.i.h.bf16 %v6062_v21  ;;  %v6063_v19 = vunpack.i.l.bf16 %v6062_v21 }
 0x152   : > { %v6067_v18 = vpop.permute.xlu0 %6066  ;;  %v2319_v20 = vpack.c.bf16 %v2294_v62, %v2293_v15 }
 0x153   : > { %v2295_v48 = vsel %vm2280_vm9, %v2262_v34, %v6063_v19  ;;  %v2296_v30 = vsel %vm2280_vm9, %v2263_v60, %v6064_v52  ;;  %v6068_v59 = vunpack.i.l.bf16 %v6067_v18  ;;  %v6069_v40 = vunpack.i.h.bf16 %v6067_v18 }
 0x154   : > { %5538 = vmatprep.mubr.msk.bf16.mxu0 %vm2356_vm10, %v2319_v20  ;;  %v6072_v41 = vpop.permute.xlu1 %6071  ;;  %v2320_v39 = vpack.c.bf16 %v2296_v30, %v2295_v48 }
 0x155   : > { %v6074_v11 = vunpack.i.h.bf16 %v6072_v41  ;;  %v6073_v33 = vunpack.i.l.bf16 %v6072_v41  ;;  %v2132_v45 = vsel %vm2115_vm4, %v2099_v46, %v6068_v59  ;;  %v2133_v5 = vsel %vm2115_vm4, %v2100_v0, %v6069_v40  ;;  %v9588_v46 = vld [vmem:[#allocation16_spill] sm:$0xff] }
 0x156   : > { %v6077_v36 = vpop.permute.xlu0 %6076  ;;  %5539 = vmatmul.mubr.msk.bf16.gmra.mrb[12].mxu0 %vm2356_vm10, %v2320_v39  ;;  %v5799_v0 = vunpack.i.h.bf16 %v9588_v46 }
 0x157   : > { %v6079_v12 = vunpack.i.h.bf16 %v6077_v36  ;;  %v6078_v28 = vunpack.i.l.bf16 %v6077_v36  ;;  %v2134_v37 = vsel %vm2115_vm4, %v2101_v24, %v6073_v33  ;;  %v2135_v13 = vsel %vm2115_vm4, %v2102_v3, %v6074_v11  ;;  %v9589_v24 = vld [vmem:[#allocation17_spill] sm:$0xff] }
 0x158   : > { %v6082_v63 = vpop.permute.xlu1 %6081  ;;  %v5798_v3 = vunpack.i.l.bf16 %v9588_v46 }
 0x159   : > { %v6083_v58 = vunpack.i.l.bf16 %v6082_v63  ;;  %v2165_v4 = vsel %vm2148_vm5, %v2132_v45, %v6078_v28  ;;  %v2166_v25 = vsel %vm2148_vm5, %v2133_v5, %v6079_v12  ;;  %v6084_v17 = vunpack.i.h.bf16 %v6082_v63  ;;  %v9587_v12 = vld [vmem:[#allocation7_spill] sm:$0xff]  ;;  %v6958_v5 = vld [vmem:[#allocation3 + $0xf8] sm:$0xff] }
 0x15a   : > { %v6087_v44 = vpop.permute.xlu0 %6086  ;;  %v5724_v28 = vunpack.i.h.bf16 %v9587_v12  ;;  %v5723_v6 = vunpack.i.l.bf16 %v9587_v12  ;;  %v5804_v45 = vunpack.i.h.bf16 %v9589_v24 }
 0x15b   : > { %v6089_v38 = vunpack.i.h.bf16 %v6087_v44  ;;  %v6088_v35 = vunpack.i.l.bf16 %v6087_v44  ;;  %v2167_v19 = vsel %vm2148_vm5, %v2134_v37, %v6083_v58  ;;  %v2168_v36 = vsel %vm2148_vm5, %v2135_v13, %v6084_v17 }
 0x15c   : > { %v6092_v32 = vpop.permute.xlu1 %6091 }
 0x15d   : > { %v6093_v14 = vunpack.i.l.bf16 %v6092_v32  ;;  %v2198_v15 = vsel %vm2181_vm6, %v2165_v4, %v6088_v35  ;;  %v2199_v62 = vsel %vm2181_vm6, %v2166_v25, %v6089_v38  ;;  %v6094_v21 = vunpack.i.h.bf16 %v6092_v32 }
 0x15e   : > { %v6097_v2 = vpop.permute.xlu0 %6096  ;;  %v5803_v38 = vunpack.i.l.bf16 %v9589_v24 }
 0x15f   : > { %v6099_v16 = vunpack.i.h.bf16 %v6097_v2  ;;  %v6098_v43 = vunpack.i.l.bf16 %v6097_v2  ;;  %v2200_v63 = vsel %vm2181_vm6, %v2167_v19, %v6093_v14  ;;  %v2201_v55 = vsel %vm2181_vm6, %v2168_v36, %v6094_v21  ;;  %v9586_v2 = vld [vmem:[#allocation6_spill] sm:$0xff] }
 0x160   : > { %v6102_v27 = vpop.permute.xlu1 %6101  ;;  %v5719_v11 = vunpack.i.h.bf16 %v9586_v2  ;;  %v5718_v33 = vunpack.i.l.bf16 %v9586_v2 }
 0x161   : > { %v6103_v23 = vunpack.i.l.bf16 %v6102_v27  ;;  %v6104_v18 = vunpack.i.h.bf16 %v6102_v27  ;;  %v2231_v34 = vsel %vm2214_vm7, %v2198_v15, %v6098_v43  ;;  %v2232_v60 = vsel %vm2214_vm7, %v2199_v62, %v6099_v16  ;;  %v6959_v16 = vld [vmem:[#allocation3 + $0xf0] sm:$0xff] }
 0x162   : > { %v6107_v31 = vpop.permute.xlu0 %6106  ;;  %v2072_v58 = vsel %vm530_vm2, %v6958_v5, %v5719_v11  ;;  %v2071_v43 = vsel %vm530_vm2, %v6959_v16, %v5718_v33 }
 0x163   : > { %v6109_v61 = vunpack.i.h.bf16 %v6107_v31  ;;  %v6108_v42 = vunpack.i.l.bf16 %v6107_v31  ;;  %v2233_v44 = vsel %vm2214_vm7, %v2200_v63, %v6103_v23  ;;  %v2234_v22 = vsel %vm2214_vm7, %v2201_v55, %v6104_v18  ;;  %v6960_v31 = vld [vmem:[#allocation3 + $0x110] sm:$0xff] }
 0x164   : > { %v6112_v52 = vpop.permute.xlu1 %6111  ;;  %v2074_v37 = vsel %vm530_vm2, %v6960_v31, %v5724_v28  ;;  %v2103_v62 = vsel %vm442_vm0, %v2071_v43, %v5798_v3  ;;  %v2104_v21 = vsel %vm442_vm0, %v2072_v58, %v5799_v0 }
 0x165   : > { %v6114_v48 = vunpack.i.h.bf16 %v6112_v52  ;;  %v6113_v30 = vunpack.i.l.bf16 %v6112_v52  ;;  %v2264_v9 = vsel %vm2247_vm8, %v2231_v34, %v6108_v42  ;;  %v2265_v57 = vsel %vm2247_vm8, %v2232_v60, %v6109_v61  ;;  %v6961_v42 = vld [vmem:[#allocation3 + $0x108] sm:$0xff] }
 0x166   : > { %v6117_v20 = vpop.permute.xlu0 %6116  ;;  %v2073_v15 = vsel %vm530_vm2, %v6961_v42, %v5723_v6  ;;  %v2106_v23 = vsel %vm442_vm0, %v2074_v37, %v5804_v45 }
 0x167   : > { %v6119_v41 = vunpack.i.h.bf16 %v6117_v20  ;;  %v6118_v39 = vunpack.i.l.bf16 %v6117_v20  ;;  %v2266_v32 = vsel %vm2247_vm8, %v2233_v44, %v6113_v30  ;;  %v2267_v56 = vsel %vm2247_vm8, %v2234_v22, %v6114_v48 }
 0x168   : > { %v6122_v50 = vpop.permute.xlu1 %6121  ;;  %v2105_v52 = vsel %vm442_vm0, %v2073_v15, %v5803_v38 }
 0x169   : > { %v2297_v53 = vsel %vm2280_vm9, %v2264_v9, %v6118_v39  ;;  %v2298_v8 = vsel %vm2280_vm9, %v2265_v57, %v6119_v41  ;;  %v6124_v7 = vunpack.i.h.bf16 %v6122_v50  ;;  %v6123_v54 = vunpack.i.l.bf16 %v6122_v50 }
 0x16a   : > { %v6127_v29 = vpop.permute.xlu0 %6126  ;;  %v2321_v59 = vpack.c.bf16 %v2298_v8, %v2297_v53 }
 0x16b   : > { %v2299_v26 = vsel %vm2280_vm9, %v2266_v32, %v6123_v54  ;;  %v2300_v10 = vsel %vm2280_vm9, %v2267_v56, %v6124_v7  ;;  %v6128_v35 = vunpack.i.l.bf16 %v6127_v29  ;;  %v6129_v13 = vunpack.i.h.bf16 %v6127_v29 }
 0x16c   : > { %5542 = vmatprep.mubr.msk.bf16.mxu1 %vm2356_vm10, %v2321_v59  ;;  %v6132_v1 = vpop.permute.xlu1 %6131  ;;  %v2322_v51 = vpack.c.bf16 %v2300_v10, %v2299_v26 }
 0x16d   : > { %v6134_v25 = vunpack.i.h.bf16 %v6132_v1  ;;  %v6133_v17 = vunpack.i.l.bf16 %v6132_v1  ;;  %v2136_v19 = vsel %vm2115_vm4, %v2103_v62, %v6128_v35  ;;  %v2137_v60 = vsel %vm2115_vm4, %v2104_v21, %v6129_v13  ;;  %v9592_v62 = vld [vmem:[#allocation18_spill] sm:$0xff] }
 0x16e   : > { %v6137_v47 = vpop.permute.xlu0 %6136  ;;  %5543 = vmatmul.mubr.msk.bf16.vlgmr.msra.gmra.mrb[0].mxu1 %vm2356_vm10, %v2322_v51  ;;  %v5809_v21 = vunpack.i.h.bf16 %v9592_v62 }
 0x16f   : > { %v6139_v14 = vunpack.i.h.bf16 %v6137_v47  ;;  %v6138_v61 = vunpack.i.l.bf16 %v6137_v47  ;;  %v2138_v36 = vsel %vm2115_vm4, %v2105_v52, %v6133_v17  ;;  %v2139_v63 = vsel %vm2115_vm4, %v2106_v23, %v6134_v25  ;;  %v9593_v52 = vld [vmem:[#allocation19_spill] sm:$0xff] }
 0x170   : > { %v8025_v40 = vpop.permute.xlu1 %6141  ;;  %v5808_v23 = vunpack.i.l.bf16 %v9592_v62 }
 0x171   : > { %v6143_v48 = vunpack.i.l.bf16 %v8025_v40  ;;  %v2169_v9 = vsel %vm2148_vm5, %v2136_v19, %v6138_v61  ;;  %v2170_v57 = vsel %vm2148_vm5, %v2137_v60, %v6139_v14  ;;  %v6144_v55 = vunpack.i.h.bf16 %v8025_v40  ;;  %v9591_v14 = vld [vmem:[#allocation9_spill] sm:$0xff]  ;;  %v6962_v60 = vld [vmem:[#allocation3 + $0x128] sm:$0xff] }
 0x172   : > { %v6147_v49 = vpop.permute.xlu0 %6146  ;;  %v5734_v61 = vunpack.i.h.bf16 %v9591_v14  ;;  %v5733_v15 = vunpack.i.l.bf16 %v9591_v14  ;;  %v5814_v19 = vunpack.i.h.bf16 %v9593_v52 }
 0x173   : > { %v6149_v18 = vunpack.i.h.bf16 %v6147_v49  ;;  %v6148_v20 = vunpack.i.l.bf16 %v6147_v49  ;;  %v2171_v59 = vsel %vm2148_vm5, %v2138_v36, %v6143_v48  ;;  %v2172_v2 = vsel %vm2148_vm5, %v2139_v63, %v6144_v55 }
 0x174   : > { %v6152_v27 = vpop.permute.xlu1 %6151 }
 0x175   : > { %v6153_v44 = vunpack.i.l.bf16 %v6152_v27  ;;  %v2202_v8 = vsel %vm2181_vm6, %v2169_v9, %v6148_v20  ;;  %v2203_v22 = vsel %vm2181_vm6, %v2170_v57, %v6149_v18  ;;  %v6154_v7 = vunpack.i.h.bf16 %v6152_v27 }
 0x176   : > { %v6157_v4 = vpop.permute.xlu0 %6156  ;;  %v5813_v18 = vunpack.i.l.bf16 %v9593_v52 }
 0x177   : > { %v6159_v30 = vunpack.i.h.bf16 %v6157_v4  ;;  %v6158_v41 = vunpack.i.l.bf16 %v6157_v4  ;;  %v2204_v11 = vsel %vm2181_vm6, %v2171_v59, %v6153_v44  ;;  %v2205_v28 = vsel %vm2181_vm6, %v2172_v2, %v6154_v7  ;;  %v9590_v4 = vld [vmem:[#allocation8_spill] sm:$0xff] }
 0x178   : > { %v6162_v34 = vpop.permute.xlu1 %6161  ;;  %v5729_v25 = vunpack.i.h.bf16 %v9590_v4  ;;  %v5728_v17 = vunpack.i.l.bf16 %v9590_v4 }
 0x179   : > { %v6163_v54 = vunpack.i.l.bf16 %v6162_v34  ;;  %v2235_v32 = vsel %vm2214_vm7, %v2202_v8, %v6158_v41  ;;  %v2236_v56 = vsel %vm2214_vm7, %v2203_v22, %v6159_v30  ;;  %v6164_v26 = vunpack.i.h.bf16 %v6162_v34  ;;  %v6963_v30 = vld [vmem:[#allocation3 + $0x120] sm:$0xff] }
 0x17a   : > { %v6167_v39 = vpop.permute.xlu0 %6166  ;;  %v2076_v48 = vsel %vm530_vm2, %v6962_v60, %v5729_v25  ;;  %v2075_v41 = vsel %vm530_vm2, %v6963_v30, %v5728_v17 }
 0x17b   : > { %v6169_v50 = vunpack.i.h.bf16 %v6167_v39  ;;  %v6168_v53 = vunpack.i.l.bf16 %v6167_v39  ;;  %v2237_v49 = vsel %vm2214_vm7, %v2204_v11, %v6163_v54  ;;  %v2238_v3 = vsel %vm2214_vm7, %v2205_v28, %v6164_v26  ;;  %v6964_v39 = vld [vmem:[#allocation3 + $0x140] sm:$0xff] }
 0x17c   : > { %v6172_v29 = vpop.permute.xlu1 %6171  ;;  %v2078_v36 = vsel %vm530_vm2, %v6964_v39, %v5734_v61  ;;  %v2107_v22 = vsel %vm442_vm0, %v2075_v41, %v5808_v23  ;;  %v2108_v7 = vsel %vm442_vm0, %v2076_v48, %v5809_v21 }
 0x17d   : > { %v6174_v1 = vunpack.i.h.bf16 %v6172_v29  ;;  %v6173_v51 = vunpack.i.l.bf16 %v6172_v29  ;;  %v2268_v33 = vsel %vm2247_vm8, %v2235_v32, %v6168_v53  ;;  %v2269_v12 = vsel %vm2247_vm8, %v2236_v56, %v6169_v50  ;;  %v6965_v53 = vld [vmem:[#allocation3 + $0x138] sm:$0xff] }
 0x17e   : > { %v6177_v10 = vpop.permute.xlu0 %6176  ;;  %v2077_v8 = vsel %vm530_vm2, %v6965_v53, %v5733_v15  ;;  %v2110_v54 = vsel %vm442_vm0, %v2078_v36, %v5814_v19 }
 0x17f   : > { %v6179_v47 = vunpack.i.h.bf16 %v6177_v10  ;;  %v6178_v40 = vunpack.i.l.bf16 %v6177_v10  ;;  %v2270_v27 = vsel %vm2247_vm8, %v2237_v49, %v6173_v51  ;;  %v2271_v5 = vsel %vm2247_vm8, %v2238_v3, %v6174_v1 }
 0x180   : > { %v6182_v0 = vpop.permute.xlu1 %6181  ;;  %v2109_v29 = vsel %vm442_vm0, %v2077_v8, %v5813_v18 }
 0x181   : > { %v2301_v6 = vsel %vm2280_vm9, %v2268_v33, %v6178_v40  ;;  %v2302_v46 = vsel %vm2280_vm9, %v2269_v12, %v6179_v47  ;;  %v6184_v24 = vunpack.i.h.bf16 %v6182_v0  ;;  %v6183_v45 = vunpack.i.l.bf16 %v6182_v0 }
 0x182   : > { %v6187_v38 = vpop.permute.xlu0 %6186  ;;  %v2323_v35 = vpack.c.bf16 %v2302_v46, %v2301_v6 }
 0x183   : > { %v2303_v58 = vsel %vm2280_vm9, %v2270_v27, %v6183_v45  ;;  %v2304_v16 = vsel %vm2280_vm9, %v2271_v5, %v6184_v24  ;;  %v6188_v20 = vunpack.i.l.bf16 %v6187_v38  ;;  %v6189_v63 = vunpack.i.h.bf16 %v6187_v38 }
 0x184   : > { %5546 = vmatprep.mubr.msk.bf16.mxu1 %vm2356_vm10, %v2323_v35  ;;  %v6192_v43 = vpop.permute.xlu1 %6191  ;;  %v2324_v31 = vpack.c.bf16 %v2304_v16, %v2303_v58 }
 0x185   : > { %v6194_v57 = vunpack.i.h.bf16 %v6192_v43  ;;  %v6193_v55 = vunpack.i.l.bf16 %v6192_v43  ;;  %v2140_v59 = vsel %vm2115_vm4, %v2107_v22, %v6188_v20  ;;  %v2141_v10 = vsel %vm2115_vm4, %v2108_v7, %v6189_v63  ;;  %v9596_v22 = vld [vmem:[#allocation20_spill] sm:$0xff] }
 0x186   : > { %v6197_v37 = vpop.permute.xlu0 %6196  ;;  %5547 = vmatmul.mubr.msk.bf16.gmra.mrb[4].mxu1 %vm2356_vm10, %v2324_v31  ;;  %v5819_v7 = vunpack.i.h.bf16 %v9596_v22 }
 0x187   : > { %v6199_v44 = vunpack.i.h.bf16 %v6197_v37  ;;  %v6198_v50 = vunpack.i.l.bf16 %v6197_v37  ;;  %v2142_v2 = vsel %vm2115_vm4, %v2109_v29, %v6193_v55  ;;  %v2143_v11 = vsel %vm2115_vm4, %v2110_v54, %v6194_v57  ;;  %v9597_v29 = vld [vmem:[#allocation21_spill] sm:$0xff] }
 0x188   : > { %v8071_v13 = vpop.permute.xlu1 %6201  ;;  %v5818_v54 = vunpack.i.l.bf16 %v9596_v22 }
 0x189   : > { %v6203_v1 = vunpack.i.l.bf16 %v8071_v13  ;;  %v2173_v33 = vsel %vm2148_vm5, %v2140_v59, %v6198_v50  ;;  %v2174_v12 = vsel %vm2148_vm5, %v2141_v10, %v6199_v44  ;;  %v6204_v28 = vunpack.i.h.bf16 %v8071_v13  ;;  %v9595_v44 = vld [vmem:[#allocation11_spill] sm:$0xff]  ;;  %v6966_v10 = vld [vmem:[#allocation3 + $0x158] sm:$0xff] }
 0x18a   : > { %v6207_v42 = vpop.permute.xlu0 %6206  ;;  %v5749_v50 = vunpack.i.h.bf16 %v9595_v44  ;;  %v5748_v8 = vunpack.i.l.bf16 %v9595_v44  ;;  %v5824_v59 = vunpack.i.h.bf16 %v9597_v29 }
 0x18b   : > { %v6209_v32 = vunpack.i.h.bf16 %v6207_v42  ;;  %v6208_v56 = vunpack.i.l.bf16 %v6207_v42  ;;  %v2175_v35 = vsel %vm2148_vm5, %v2142_v2, %v6203_v1  ;;  %v2176_v4 = vsel %vm2148_vm5, %v2143_v11, %v6204_v28 }
 0x18c   : > { %v6212_v34 = vpop.permute.xlu1 %6211 }
 0x18d   : > { %v6213_v49 = vunpack.i.l.bf16 %v6212_v34  ;;  %v2206_v0 = vsel %vm2181_vm6, %v2173_v33, %v6208_v56  ;;  %v2207_v3 = vsel %vm2181_vm6, %v2174_v12, %v6209_v32  ;;  %v6214_v24 = vunpack.i.h.bf16 %v6212_v34 }
 0x18e   : > { %v6217_v9 = vpop.permute.xlu0 %6216  ;;  %v5823_v32 = vunpack.i.l.bf16 %v9597_v29 }
 0x18f   : > { %v6219_v51 = vunpack.i.h.bf16 %v6217_v9  ;;  %v6218_v47 = vunpack.i.l.bf16 %v6217_v9  ;;  %v2208_v25 = vsel %vm2181_vm6, %v2175_v35, %v6213_v49  ;;  %v2209_v61 = vsel %vm2181_vm6, %v2176_v4, %v6214_v24  ;;  %v9594_v9 = vld [vmem:[#allocation10_spill] sm:$0xff] }
 0x190   : > { %v6222_v26 = vpop.permute.xlu1 %6221  ;;  %v5739_v57 = vunpack.i.h.bf16 %v9594_v9  ;;  %v5738_v55 = vunpack.i.l.bf16 %v9594_v9 }
 0x191   : > { %v6223_v45 = vunpack.i.l.bf16 %v6222_v26  ;;  %v2239_v27 = vsel %vm2214_vm7, %v2206_v0, %v6218_v47  ;;  %v2240_v5 = vsel %vm2214_vm7, %v2207_v3, %v6219_v51  ;;  %v6224_v58 = vunpack.i.h.bf16 %v6222_v26  ;;  %v6967_v51 = vld [vmem:[#allocation3 + $0x150] sm:$0xff] }
 0x192   : > { %v6227_v40 = vpop.permute.xlu0 %6226  ;;  %v2080_v1 = vsel %vm530_vm2, %v6966_v10, %v5739_v57  ;;  %v2079_v47 = vsel %vm530_vm2, %v6967_v51, %v5738_v55 }
 0x193   : > { %v6229_v6 = vunpack.i.h.bf16 %v6227_v40  ;;  %v6228_v46 = vunpack.i.l.bf16 %v6227_v40  ;;  %v2241_v42 = vsel %vm2214_vm7, %v2208_v25, %v6223_v45  ;;  %v2242_v23 = vsel %vm2214_vm7, %v2209_v61, %v6224_v58  ;;  %v6968_v40 = vld [vmem:[#allocation3 + $0x170] sm:$0xff] }
 0x194   : > { %v6232_v38 = vpop.permute.xlu1 %6231  ;;  %v2082_v2 = vsel %vm530_vm2, %v6968_v40, %v5749_v50  ;;  %v2111_v3 = vsel %vm442_vm0, %v2079_v47, %v5818_v54  ;;  %v2112_v24 = vsel %vm442_vm0, %v2080_v1, %v5819_v7  ;;  %v8166_v47 = vld [vmem:[%s9532_s4] ss:$0 sm:$0xff] }
 0x195   : > { %v6234_v43 = vunpack.i.h.bf16 %v6232_v38  ;;  %v6233_v31 = vunpack.i.l.bf16 %v6232_v38  ;;  %v2272_v17 = vsel %vm2247_vm8, %v2239_v27, %v6228_v46  ;;  %v2273_v14 = vsel %vm2247_vm8, %v2240_v5, %v6229_v6  ;;  %v6969_v46 = vld [vmem:[#allocation3 + $0x168] sm:$0xff] }
 0x196   : > { %v6237_v16 = vpop.permute.xlu0 %6236  ;;  %v2081_v0 = vsel %vm530_vm2, %v6969_v46, %v5748_v8  ;;  %v2114_v45 = vsel %vm442_vm0, %v2082_v2, %v5824_v59  ;;  %vm4536_vm2 = vcmask 588800  }
 0x197   : > { %v6239_v37 = vunpack.i.h.bf16 %v6237_v16  ;;  %v6238_v13 = vunpack.i.l.bf16 %v6237_v16  ;;  %v2274_v34 = vsel %vm2247_vm8, %v2241_v42, %v6233_v31  ;;  %v2275_v60 = vsel %vm2247_vm8, %v2242_v23, %v6234_v43 }
 0x198   : > { %v6242_v21 = vpop.permute.xlu1 %6241  ;;  %v2113_v38 = vsel %vm442_vm0, %v2081_v0, %v5823_v32 }
 0x199   : > { %v2305_v15 = vsel %vm2280_vm9, %v2272_v17, %v6238_v13  ;;  %v2306_v62 = vsel %vm2280_vm9, %v2273_v14, %v6239_v37  ;;  %v6244_v52 = vunpack.i.h.bf16 %v6242_v21  ;;  %v6243_v19 = vunpack.i.l.bf16 %v6242_v21 }
 0x19a   : > { %v6247_v18 = vpop.permute.xlu0 %6246  ;;  %v2325_v20 = vpack.c.bf16 %v2306_v62, %v2305_v15 }
 0x19b   : > { %v2307_v48 = vsel %vm2280_vm9, %v2274_v34, %v6243_v19  ;;  %v2308_v30 = vsel %vm2280_vm9, %v2275_v60, %v6244_v52  ;;  %v6248_v56 = vunpack.i.l.bf16 %v6247_v18  ;;  %v6249_v11 = vunpack.i.h.bf16 %v6247_v18 }
 0x19c   : > { %5550 = vmatprep.mubr.msk.bf16.mxu1 %vm2356_vm10, %v2325_v20  ;;  %v6252_v41 = vpop.permute.xlu1 %6251  ;;  %v2326_v39 = vpack.c.bf16 %v2308_v30, %v2307_v48 }
 0x19d   : > { %v6254_v12 = vunpack.i.h.bf16 %v6252_v41  ;;  %v6253_v28 = vunpack.i.l.bf16 %v6252_v41  ;;  %v2144_v35 = vsel %vm2115_vm4, %v2111_v3, %v6248_v56  ;;  %v2145_v16 = vsel %vm2115_vm4, %v2112_v24, %v6249_v11 }
 0x19e   : > { %v6257_v36 = vpop.permute.xlu0 %6256  ;;  %5551 = vmatmul.mubr.msk.bf16.gmra.mrb[8].mxu1 %vm2356_vm10, %v2326_v39 }
 0x19f   : > { %v6259_v49 = vunpack.i.h.bf16 %v6257_v36  ;;  %v6258_v6 = vunpack.i.l.bf16 %v6257_v36  ;;  %v2146_v4 = vsel %vm2115_vm4, %v2113_v38, %v6253_v28  ;;  %v2147_v25 = vsel %vm2115_vm4, %v2114_v45, %v6254_v12 }
 0x1a0   : > { %v8117_v63 = vpop.permute.xlu1 %6261 }
 0x1a1   : > { %v6263_v43 = vunpack.i.l.bf16 %v8117_v63  ;;  %v2177_v17 = vsel %vm2148_vm5, %v2144_v35, %v6258_v6  ;;  %v2178_v14 = vsel %vm2148_vm5, %v2145_v16, %v6259_v49  ;;  %v6264_v61 = vunpack.i.h.bf16 %v8117_v63 }
 0x1a2   : > { %v6267_v53 = vpop.permute.xlu0 %6266 }
 0x1a3   : > { %v6269_v27 = vunpack.i.h.bf16 %v6267_v53  ;;  %v6268_v5 = vunpack.i.l.bf16 %v6267_v53  ;;  %v2179_v20 = vsel %vm2148_vm5, %v2146_v4, %v6263_v43  ;;  %v2180_v9 = vsel %vm2148_vm5, %v2147_v25, %v6264_v61 }
 0x1a4   : > { %v6272_v26 = vpop.permute.xlu1 %6271 }
 0x1a5   : > { %v6273_v42 = vunpack.i.l.bf16 %v6272_v26  ;;  %v2210_v21 = vsel %vm2181_vm6, %v2177_v17, %v6268_v5  ;;  %v2211_v23 = vsel %vm2181_vm6, %v2178_v14, %v6269_v27  ;;  %v6274_v52 = vunpack.i.h.bf16 %v6272_v26 }
 0x1a6   : > { %v6277_v33 = vpop.permute.xlu0 %6276 }
 0x1a7   : > { %v6279_v31 = vunpack.i.h.bf16 %v6277_v33  ;;  %v6278_v37 = vunpack.i.l.bf16 %v6277_v33  ;;  %v2212_v57 = vsel %vm2181_vm6, %v2179_v20, %v6273_v42  ;;  %v2213_v50 = vsel %vm2181_vm6, %v2180_v9, %v6274_v52 }
 0x1a8   : > { %v6282_v58 = vpop.permute.xlu1 %6281 }
 0x1a9   : > { %v6283_v19 = vunpack.i.l.bf16 %v6282_v58  ;;  %v2243_v34 = vsel %vm2214_vm7, %v2210_v21, %v6278_v37  ;;  %v2244_v60 = vsel %vm2214_vm7, %v2211_v23, %v6279_v31  ;;  %v6284_v48 = vunpack.i.h.bf16 %v6282_v58 }
 0x1aa   : > { %v6287_v13 = vpop.permute.xlu0 %6286 }
 0x1ab   : > { %v6289_v15 = vunpack.i.h.bf16 %v6287_v13  ;;  %v6288_v62 = vunpack.i.l.bf16 %v6287_v13  ;;  %v2245_v53 = vsel %vm2214_vm7, %v2212_v57, %v6283_v19  ;;  %v2246_v54 = vsel %vm2214_vm7, %v2213_v50, %v6284_v48 }
 0x1ac   : > { %v6292_v18 = vpop.permute.xlu1 %6291 }
 0x1ad   : > { %v6294_v41 = vunpack.i.h.bf16 %v6292_v18  ;;  %v6293_v39 = vunpack.i.l.bf16 %v6292_v18  ;;  %v2276_v55 = vsel %vm2247_vm8, %v2243_v34, %v6288_v62  ;;  %v2277_v44 = vsel %vm2247_vm8, %v2244_v60, %v6289_v15 }
 0x1ae   : > { %v6297_v30 = vpop.permute.xlu0 %6296 }
 0x1af   : > { %v6299_v36 = vunpack.i.h.bf16 %v6297_v30  ;;  %v6298_v63 = vunpack.i.l.bf16 %v6297_v30  ;;  %v2278_v56 = vsel %vm2247_vm8, %v2245_v53, %v6293_v39  ;;  %v2279_v26 = vsel %vm2247_vm8, %v2246_v54, %v6294_v41  ;;  %v8229_v53 = vld [vmem:[%s9534_s6] ss:$0 sm:$0xff] }
 0x1b0   : > { %v6302_v7 = vpop.permute.xlu1 %6301 }
 0x1b1   : > { %v2309_v8 = vsel %vm2280_vm9, %v2276_v55, %v6298_v63  ;;  %v2310_v22 = vsel %vm2280_vm9, %v2277_v44, %v6299_v36  ;;  %v6304_v29 = vunpack.i.h.bf16 %v6302_v7  ;;  %v6303_v59 = vunpack.i.l.bf16 %v6302_v7  ;;  %v8221_v55 = vld [vmem:[%s9533_s5] ss:$0 sm:$0xff] }
 0x1b2   : > { %v2327_v32 = vpack.c.bf16 %v2310_v22, %v2309_v8  ;;  %v8200_v23 = vpop.permute.xlu0 %6306 }
 0x1b3   : > { %v2311_v10 = vsel %vm2280_vm9, %v2278_v56, %v6303_v59  ;;  %v2312_v1 = vsel %vm2280_vm9, %v2279_v26, %v6304_v29 }
 0x1b4   : > { %5554 = vmatprep.mubr.msk.bf16.mxu1 %vm2356_vm10, %v2327_v32  ;;  %v2328_v51 = vpack.c.bf16 %v2312_v1, %v2311_v10 }
 0x1b6   : > { %5555 = vmatmul.mubr.msk.bf16.gmra.mrb[12].mxu1 %vm2356_vm10, %v2328_v51  ;;  %v8202_v19 = vpop.permute.xlu0 %6311 }
 0x1eb   : > { %v5528_v40 = vpop.f32.mrb[0].mxu0 }
 0x1ec   : > { %v2452_v2 = vadd.f32 %v5528_v40, %v8166_v47  ;;  %v2443_v11 = vpop.f32.mrb[1].mxu0 }
 0x1ed   : > { %v5529_v33 = vpop.f32.mrb[2].mxu0  ;;  %v2444_v49 = vadd.f32 %v8166_v47, %v2443_v11 }
 0x1ee   : > { %v2455_v12 = vadd.f32 %v5529_v33, %v8166_v47  ;;  %2606 = vrot.lane.b32.xlu0 %v2452_v2, %s6991_s17  ;;  %v2446_v28 = vpop.f32.mrb[3].mxu0 }
 0x1ef   : > { %v2447_v6 = vadd.f32 %v8166_v47, %v2446_v28 }
 0x1f0   : > { %2608 = vrot.lane.b32.xlu1 %v2455_v12, %s6991_s17 }
 0x1f2   : > { %2602 = vrot.lane.b32.xlu0 %v2444_v49, %s6991_s17 }
 0x1f4   : > { %2604 = vrot.lane.b32.xlu1 %v2447_v6, %s6991_s17 }
 0x1ff   : > { %v5532_v46 = vpop.f32.mrb[4].mxu0 }
 0x200   : > { %v2459_v0 = vpop.f32.mrb[5].mxu0  ;;  %v2468_v42 = vadd.f32 %v5532_v46, %v8166_v47 }
 0x201   : > { %v5533_v3 = vpop.f32.mrb[6].mxu0  ;;  %v2460_v62 = vadd.f32 %v8166_v47, %v2459_v0 }
 0x202   : > { %v2462_v24 = vpop.f32.mrb[7].mxu0  ;;  %v2471_v15 = vadd.f32 %v5533_v3, %v8166_v47 }
 0x203   : > { %v2463_v21 = vadd.f32 %v8166_v47, %v2462_v24 }
 0x213   : > { %v5536_v45 = vpop.f32.mrb[8].mxu0 }
 0x214   : > { %v2475_v38 = vpop.f32.mrb[9].mxu0  ;;  %v2484_v63 = vadd.f32 %v5536_v45, %v8166_v47 }
 0x215   : > { %v5537_v35 = vpop.f32.mrb[10].mxu0  ;;  %v2476_v50 = vadd.f32 %v8166_v47, %v2475_v38 }
 0x216   : > { %v2478_v27 = vpop.f32.mrb[11].mxu0  ;;  %v2487_v57 = vadd.f32 %v5537_v35, %v8166_v47 }
 0x217   : > { %v2479_v22 = vadd.f32 %v8166_v47, %v2478_v27 }
 0x229   : > { %v8176_v5 = vpop.f32.mrb[12].mxu0 }
 0x22a   : > { %v8178_v58 = vpop.f32.mrb[13].mxu0  ;;  %v2500_v38 = vadd.f32 %v8176_v5, %v8166_v47 }
 0x22b   : > { %v8180_v16 = vpop.f32.mrb[14].mxu0  ;;  %v2492_v27 = vadd.f32 %v8166_v47, %v8178_v58 }
 0x22c   : > { %v8182_v43 = vpop.f32.mrb[15].mxu0  ;;  %v2503_v35 = vadd.f32 %v8180_v16, %v8166_v47 }
 0x241   : > { %v5544_v31 = vpop.f32.mrb[0].mxu1 }
 0x242   : > { %v2516_v37 = vadd.f32 %v5544_v31, %v8166_v47  ;;  %v2507_v13 = vpop.f32.mrb[1].mxu1  ;;  %v2495_v31 = vadd.f32 %v8166_v47, %v8182_v43 }
 0x243   : > { %v5545_v4 = vpop.f32.mrb[2].mxu1  ;;  %v2508_v14 = vadd.f32 %v8166_v47, %v2507_v13 }
 0x244   : > { %v2519_v25 = vadd.f32 %v5545_v4, %v8166_v47  ;;  %v2510_v17 = vpop.f32.mrb[3].mxu1  ;;  %2638 = vrot.lane.b32.xlu0 %v2516_v37, %s6991_s17 }
 0x245   : > { %v2511_v61 = vadd.f32 %v8166_v47, %v2510_v17 }
 0x246   : > { %2640 = vrot.lane.b32.xlu1 %v2519_v25, %s6991_s17 }
 0x248   : > { %2634 = vrot.lane.b32.xlu0 %v2508_v14, %s6991_s17 }
 0x24a   : > { %2636 = vrot.lane.b32.xlu1 %v2511_v61, %s6991_s17 }
 0x24c   : > { %2614 = vrot.lane.b32.xlu0 %v2468_v42, %s6991_s17 }
 0x24e   : > { %2616 = vrot.lane.b32.xlu1 %v2471_v15, %s6991_s17 }
 0x250   : > { %2610 = vrot.lane.b32.xlu0 %v2460_v62, %s6991_s17 }
 0x252   : > { %2612 = vrot.lane.b32.xlu1 %v2463_v21, %s6991_s17 }
 0x259   : > { %v5548_v52 = vpop.f32.mrb[4].mxu1 }
 0x25a   : > { %v2532_v18 = vadd.f32 %v5548_v52, %v8166_v47  ;;  %v2523_v20 = vpop.f32.mrb[5].mxu1 }
 0x25b   : > { %v5549_v34 = vpop.f32.mrb[6].mxu1  ;;  %v2524_v30 = vadd.f32 %v8166_v47, %v2523_v20 }
 0x25c   : > { %v2535_v60 = vadd.f32 %v5549_v34, %v8166_v47  ;;  %v2526_v48 = vpop.f32.mrb[7].mxu1  ;;  %2646 = vrot.lane.b32.xlu0 %v2532_v18, %s6991_s17 }
 0x25d   : > { %v2527_v39 = vadd.f32 %v8166_v47, %v2526_v48 }
 0x25e   : > { %2648 = vrot.lane.b32.xlu1 %v2535_v60, %s6991_s17 }
 0x260   : > { %v2607_v41 = vpop.permute.xlu0 %2606  ;;  %2642 = vrot.lane.b32.xlu0 %v2524_v30, %s6991_s17 }
 0x261   : > { %2701 = vst.msk [vmem:[#allocation2 + $0x10] sm:$0xff] %vm2698_vm11, %v2607_v41 }
 0x262   : > { %v2609_v36 = vpop.permute.xlu1 %2608  ;;  %2644 = vrot.lane.b32.xlu1 %v2527_v39, %s6991_s17 }
 0x263   : > { %2702 = vst.msk [vmem:[#allocation2 + $0x18] sm:$0xff] %vm2698_vm11, %v2609_v36 }
 0x264   : > { %v2603_v9 = vpop.permute.xlu0 %2602  ;;  %2622 = vrot.lane.b32.xlu0 %v2484_v63, %s6991_s17 }
 0x265   : > { %2699 = vst.msk [vmem:[#allocation2] sm:$0xff] %vm2698_vm11, %v2603_v9 }
 0x266   : > { %v2605_v44 = vpop.permute.xlu1 %2604  ;;  %2624 = vrot.lane.b32.xlu1 %v2487_v57, %s6991_s17 }
 0x267   : > { %2700 = vst.msk [vmem:[#allocation2 + $0x8] sm:$0xff] %vm2698_vm11, %v2605_v44 }
 0x268   : > { %v2733_v8 = vld [vmem:[#allocation2 + $0x10] sm:$0xff]  ;;  %2618 = vrot.lane.b32.xlu0 %v2476_v50, %s6991_s17 }
 0x269   : > { %v2772_v7 = vmul.f32 %v8221_v55, %v2733_v8 }
 0x26a   : > { %v2734_v54 = vld [vmem:[#allocation2 + $0x18] sm:$0xff]  ;;  %2620 = vrot.lane.b32.xlu1 %v2479_v22, %s6991_s17 }
 0x26b   : > { %v2811_v29 = vadd.f32 %v8229_v53, %v2772_v7  ;;  %v2773_v59 = vmul.f32 %v8221_v55, %v2734_v54 }
 0x26c   : > { %v2731_v32 = vld [vmem:[#allocation2] sm:$0xff] }
 0x26d   : > { %v2843_v56 = vmax.f32 %v2811_v29, 0.0  ;;  %v2812_v26 = vadd.f32 %v8229_v53, %v2773_v59  ;;  %v2770_v10 = vmul.f32 %v8221_v55, %v2731_v32 }
 0x26e   : > { %v2732_v1 = vld [vmem:[#allocation2 + $0x8] sm:$0xff] }
 0x26f   : > { %2875 = vst.msk [vmem:[#allocation3 + $0x31] sm:$0xff] %vm442_vm0, %v2843_v56  ;;  %v2844_v51 = vmax.f32 %v2812_v26, 0.0  ;;  %v2809_v40 = vadd.f32 %v8229_v53, %v2770_v10  ;;  %v2771_v2 = vmul.f32 %v8221_v55, %v2732_v1 }
 0x271   : > { %2876 = vst.msk [vmem:[#allocation3 + $0x39] sm:$0xff] %vm442_vm0, %v2844_v51  ;;  %v2841_v11 = vmax.f32 %v2809_v40, 0.0  ;;  %v2810_v33 = vadd.f32 %v8229_v53, %v2771_v2  ;;  %v5552_v12 = vpop.f32.mrb[8].mxu1 }
 0x272   : > { %v2548_v49 = vadd.f32 %v5552_v12, %v8166_v47  ;;  %v2539_v6 = vpop.f32.mrb[9].mxu1 }
 0x273   : > { %2873 = vst.msk [vmem:[#allocation3 + $0x19] sm:$0xff] %vm442_vm0, %v2841_v11  ;;  %v2842_v28 = vmax.f32 %v2810_v33, 0.0  ;;  %v5553_v46 = vpop.f32.mrb[10].mxu1  ;;  %v2540_v24 = vadd.f32 %v8166_v47, %v2539_v6 }
 0x274   : > { %v2551_v0 = vadd.f32 %v5553_v46, %v8166_v47  ;;  %v2542_v3 = vpop.f32.mrb[11].mxu1  ;;  %2654 = vrot.lane.b32.xlu0 %v2548_v49, %s6991_s17 }
 0x275   : > { %2874 = vst.msk [vmem:[#allocation3 + $0x21] sm:$0xff] %vm442_vm0, %v2842_v28  ;;  %v2543_v45 = vadd.f32 %v8166_v47, %v2542_v3 }
 0x276   : > { %2656 = vrot.lane.b32.xlu1 %v2551_v0, %s6991_s17  ;;  %v3097_v14 = vld [vmem:[#allocation3 + $0x30] sm:$0xff] }
 0x277   : > { %v3129_v15 = vld [vmem:[#allocation3 + $0x31] sm:$0xff] }
 0x278   : > { %2650 = vrot.lane.b32.xlu0 %v2540_v24, %s6991_s17  ;;  %v3098_v17 = vld [vmem:[#allocation3 + $0x38] sm:$0xff] }
 0x279   : > { %v6330_v61 = vpack.i.bf16 %v3098_v17, %v3097_v14  ;;  %v3130_v42 = vld [vmem:[#allocation3 + $0x39] sm:$0xff] }
 0x27a   : > { %2652 = vrot.lane.b32.xlu1 %v2543_v45, %s6991_s17  ;;  %v6335_v62 = vpack.i.bf16 %v3130_v42, %v3129_v15  ;;  %v3161_v21 = vld [vmem:[#allocation3 + $0x32] sm:$0xff]  ;;  %v3162_v52 = vld [vmem:[#allocation3 + $0x3a] sm:$0xff] }
 0x27b   : > { %v8283_v20 = vld [vmem:[#allocation3 + $0x18] sm:$0xff] }
 0x27c   : > { %2630 = vrot.lane.b32.xlu0 %v2500_v38, %s6991_s17  ;;  %v8280_v18 = vld [vmem:[#allocation3 + $0x20] sm:$0xff] }
 0x27d   : > { %v2940_v34 = vld [vmem:[#allocation3 + $0x21] sm:$0xff]  ;;  %v6365_v60 = vpack.i.bf16 %v8280_v18, %v8283_v20  ;;  %v2939_v48 = vld [vmem:[#allocation3 + $0x19] sm:$0xff] }
 0x27e   : > { %2632 = vrot.lane.b32.xlu1 %v2503_v35, %s6991_s17  ;;  %v6355_v30 = vpack.i.bf16 %v2940_v34, %v2939_v48  ;;  %v2971_v41 = vld [vmem:[#allocation3 + $0x1a] sm:$0xff]  ;;  %v2972_v39 = vld [vmem:[#allocation3 + $0x22] sm:$0xff] }
 0x27f   : > { %v6360_v36 = vpack.i.bf16 %v2972_v39, %v2971_v41 }
 0x280   : > { %2626 = vrot.lane.b32.xlu0 %v2492_v27, %s6991_s17 }
 0x282   : > { %2628 = vrot.lane.b32.xlu1 %v2495_v31, %s6991_s17 }
 0x289   : > { %v5556_v5 = vpop.f32.mrb[12].mxu1 }
 0x28a   : > { %v2564_v37 = vadd.f32 %v5556_v5, %v8166_v47  ;;  %v2555_v13 = vpop.f32.mrb[13].mxu1 }
 0x28b   : > { %v5557_v4 = vpop.f32.mrb[14].mxu1  ;;  %v2556_v58 = vadd.f32 %v8166_v47, %v2555_v13 }
 0x28c   : > { %v2567_v16 = vadd.f32 %v5557_v4, %v8166_v47  ;;  %v2558_v25 = vpop.f32.mrb[15].mxu1  ;;  %2662 = vrot.lane.b32.xlu0 %v2564_v37, %s6991_s17 }
 0x28d   : > { %v2559_v43 = vadd.f32 %v8166_v47, %v2558_v25  ;;  %v6340_v47 = vpack.i.bf16 %v3162_v52, %v3161_v21 }
 0x28e   : > { %2664 = vrot.lane.b32.xlu1 %v2567_v16, %s6991_s17 }
 0x290   : > { %2658 = vrot.lane.b32.xlu0 %v2556_v58, %s6991_s17 }
 0x292   : > { %2660 = vrot.lane.b32.xlu1 %v2559_v43, %s6991_s17  ;;  %s7002_s17 = smov 40  }
 0x294   : > { %6331 = vrot.lane.b32.xlu0 %v6330_v61, %s6999_s15 }
 0x296   : > { %6316 = vrot.lane.b32.xlu1 %v6330_v61, %s6996_s18 }
 0x298   : > { %6336 = vrot.lane.b32.xlu0 %v6335_v62, %s7000_s16 }
 0x29a   : > { %6321 = vrot.lane.b32.xlu1 %v6335_v62, %s6998_s14 }
 0x29c   : > { %6341 = vrot.lane.b32.xlu0 %v6340_v47, %s7001_s19 }
 0x29e   : > { %6326 = vrot.lane.b32.xlu1 %v6340_v47, %s7002_s17 }
 0x2a0   : > { %6351 = vrot.lane.b32.xlu0 %v6340_v47, %s6994_s24 }
 0x2a2   : > { %6346 = vrot.lane.b32.xlu1 %v6335_v62, %s6992_s20 }
 0x2a4   : > { %6366 = vrot.lane.b32.xlu0 %v6365_v60, %s6996_s18 }
 0x2a6   : > { %6356 = vrot.lane.b32.xlu1 %v6355_v30, %s6992_s20 }
 0x2a8   : > { %6371 = vrot.lane.b32.xlu0 %v6355_v30, %s6998_s14 }
 0x2aa   : > { %6361 = vrot.lane.b32.xlu1 %v6360_v36, %s6994_s24 }
 0x2ac   : > { %6376 = vrot.lane.b32.xlu0 %v6360_v36, %s7002_s17 }
 0x2b6   : > { %v2639_v63 = vpop.permute.xlu0 %2638 }
 0x2b7   : > { %2717 = vst.msk [vmem:[#allocation2 + $0x90] sm:$0xff] %vm2698_vm11, %v2639_v63 }
 0x2b8   : > { %v2641_v9 = vpop.permute.xlu1 %2640 }
 0x2b9   : > { %2718 = vst.msk [vmem:[#allocation2 + $0x98] sm:$0xff] %vm2698_vm11, %v2641_v9 }
 0x2ba   : > { %v2635_v57 = vpop.permute.xlu0 %2634 }
 0x2bb   : > { %2715 = vst.msk [vmem:[#allocation2 + $0x80] sm:$0xff] %vm2698_vm11, %v2635_v57 }
 0x2bc   : > { %v2637_v44 = vpop.permute.xlu1 %2636 }
 0x2bd   : > { %2716 = vst.msk [vmem:[#allocation2 + $0x88] sm:$0xff] %vm2698_vm11, %v2637_v44 }
 0x2be   : > { %v2749_v50 = vld [vmem:[#allocation2 + $0x90] sm:$0xff]  ;;  %v2615_v8 = vpop.permute.xlu0 %2614 }
 0x2bf   : > { %v2788_v22 = vmul.f32 %v8221_v55, %v2749_v50  ;;  %2705 = vst.msk [vmem:[#allocation2 + $0x30] sm:$0xff] %vm2698_vm11, %v2615_v8 }
 0x2c0   : > { %v2750_v7 = vld [vmem:[#allocation2 + $0x98] sm:$0xff]  ;;  %v2617_v54 = vpop.permute.xlu1 %2616 }
 0x2c1   : > { %v2827_v29 = vadd.f32 %v8229_v53, %v2788_v22  ;;  %v2789_v59 = vmul.f32 %v8221_v55, %v2750_v7  ;;  %2706 = vst.msk [vmem:[#allocation2 + $0x38] sm:$0xff] %vm2698_vm11, %v2617_v54 }
 0x2c2   : > { %v2747_v32 = vld [vmem:[#allocation2 + $0x80] sm:$0xff]  ;;  %v2611_v56 = vpop.permute.xlu0 %2610 }
 0x2c3   : > { %v2859_v26 = vmax.f32 %v2827_v29, 0.0  ;;  %v2828_v10 = vadd.f32 %v8229_v53, %v2789_v59  ;;  %v2786_v1 = vmul.f32 %v8221_v55, %v2747_v32  ;;  %2703 = vst.msk [vmem:[#allocation2 + $0x20] sm:$0xff] %vm2698_vm11, %v2611_v56 }
 0x2c4   : > { %v2748_v51 = vld [vmem:[#allocation2 + $0x88] sm:$0xff]  ;;  %v2613_v40 = vpop.permute.xlu1 %2612 }
 0x2c5   : > { %2891 = vst.msk [vmem:[#allocation3 + $0xf1] sm:$0xff] %vm442_vm0, %v2859_v26  ;;  %v2860_v2 = vmax.f32 %v2828_v10, 0.0  ;;  %v2825_v11 = vadd.f32 %v8229_v53, %v2786_v1  ;;  %v2787_v33 = vmul.f32 %v8221_v55, %v2748_v51 }
 0x2c6   : > { %2704 = vst.msk [vmem:[#allocation2 + $0x28] sm:$0xff] %vm2698_vm11, %v2613_v40  ;;  %v2737_v12 = vld [vmem:[#allocation2 + $0x30] sm:$0xff] }
 0x2c7   : > { %2892 = vst.msk [vmem:[#allocation3 + $0xf9] sm:$0xff] %vm442_vm0, %v2860_v2  ;;  %v2857_v28 = vmax.f32 %v2825_v11, 0.0  ;;  %v2826_v49 = vadd.f32 %v8229_v53, %v2787_v33  ;;  %v2776_v6 = vmul.f32 %v8221_v55, %v2737_v12 }
 0x2c8   : > { %v2738_v46 = vld [vmem:[#allocation2 + $0x38] sm:$0xff] }
 0x2c9   : > { %2889 = vst.msk [vmem:[#allocation3 + $0xd9] sm:$0xff] %vm442_vm0, %v2857_v28  ;;  %v2858_v0 = vmax.f32 %v2826_v49, 0.0  ;;  %v2815_v3 = vadd.f32 %v8229_v53, %v2776_v6  ;;  %v2777_v24 = vmul.f32 %v8221_v55, %v2738_v46 }
 0x2ca   : > { %v2735_v45 = vld [vmem:[#allocation2 + $0x20] sm:$0xff] }
 0x2cb   : > { %2890 = vst.msk [vmem:[#allocation3 + $0xe1] sm:$0xff] %vm442_vm0, %v2858_v0  ;;  %v2847_v38 = vmax.f32 %v2815_v3, 0.0  ;;  %v2816_v35 = vadd.f32 %v8229_v53, %v2777_v24  ;;  %v2774_v27 = vmul.f32 %v8221_v55, %v2735_v45 }
 0x2cc   : > { %v3113_v16 = vld [vmem:[#allocation3 + $0xf0] sm:$0xff] }
 0x2cd   : > { %v2736_v31 = vld [vmem:[#allocation2 + $0x28] sm:$0xff]  ;;  %2879 = vst.msk [vmem:[#allocation3 + $0x61] sm:$0xff] %vm442_vm0, %v2847_v38  ;;  %v2848_v5 = vmax.f32 %v2816_v35, 0.0  ;;  %v2813_v37 = vadd.f32 %v8229_v53, %v2774_v27  ;;  %v3145_v62 = vld [vmem:[#allocation3 + $0xf1] sm:$0xff] }
 0x2ce   : > { %v2775_v13 = vmul.f32 %v8221_v55, %v2736_v31  ;;  %v2647_v4 = vpop.permute.xlu0 %2646  ;;  %v3114_v25 = vld [vmem:[#allocation3 + $0xf8] sm:$0xff] }
 0x2cf   : > { %2880 = vst.msk [vmem:[#allocation3 + $0x69] sm:$0xff] %vm442_vm0, %v2848_v5  ;;  %v2845_v58 = vmax.f32 %v2813_v37, 0.0  ;;  %v6395_v43 = vpack.i.bf16 %v3114_v25, %v3113_v16  ;;  %v3146_v61 = vld [vmem:[#allocation3 + $0xf9] sm:$0xff] }
 0x2d0   : > { %v2814_v17 = vadd.f32 %v8229_v53, %v2775_v13  ;;  %2721 = vst.msk [vmem:[#allocation2 + $0xb0] sm:$0xff] %vm2698_vm11, %v2647_v4  ;;  %v2649_v14 = vpop.permute.xlu1 %2648  ;;  %v6400_v21 = vpack.i.bf16 %v3146_v61, %v3145_v62  ;;  %v3177_v47 = vld [vmem:[#allocation3 + $0xf2] sm:$0xff]  ;;  %v3178_v34 = vld [vmem:[#allocation3 + $0xfa] sm:$0xff] }
 0x2d1   : > { %2877 = vst.msk [vmem:[#allocation3 + $0x49] sm:$0xff] %vm442_vm0, %v2845_v58  ;;  %6396 = vrot.lane.b32.xlu0 %v6395_v43, %s6999_s15  ;;  %6381 = vrot.lane.b32.xlu1 %v6395_v43, %s6996_s18  ;;  %v6405_v41 = vpack.i.bf16 %v3178_v34, %v3177_v47  ;;  %v3111_v40 = vld [vmem:[#allocation3 + $0xd8] sm:$0xff]  ;;  %v6948_v43 = vld [vmem:[%s9535_s7] sm:$0xff]  }
 0x2d2   : > { %v2846_v42 = vmax.f32 %v2814_v17, 0.0  ;;  %2722 = vst.msk [vmem:[#allocation2 + $0xb8] sm:$0xff] %vm2698_vm11, %v2649_v14  ;;  %v2643_v15 = vpop.permute.xlu0 %2642  ;;  %v3175_v7 = vld [vmem:[#allocation3 + $0xda] sm:$0xff]  ;;  %v3176_v54 = vld [vmem:[#allocation3 + $0xe2] sm:$0xff]  ;;  %5558 = vmatprep.subr.bf16.mxu1 %v6948_v43 }
 0x2d3   : > { %2719 = vst.msk [vmem:[#allocation2 + $0xa0] sm:$0xff] %vm2698_vm11, %v2643_v15  ;;  %v3112_v32 = vld [vmem:[#allocation3 + $0xe0] sm:$0xff]  ;;  %v6430_v51 = vpack.i.bf16 %v3176_v54, %v3175_v7  ;;  %5559 = vmatpush3.bf16.msra.mxu1 %v6948_v43  ;;  %v6949_v15 = vld [vmem:[%s9535_s7 + $0x8] sm:$0xff]  }
 0x2d4   : > { %2878 = vst.msk [vmem:[#allocation3 + $0x51] sm:$0xff] %vm442_vm0, %v2846_v42  ;;  %v2645_v52 = vpop.permute.xlu1 %2644  ;;  %v6420_v12 = vpack.i.bf16 %v3112_v32, %v3111_v40  ;;  %v3144_v49 = vld [vmem:[#allocation3 + $0xe1] sm:$0xff]  ;;  %v3143_v24 = vld [vmem:[#allocation3 + $0xd9] sm:$0xff]  ;;  %5560 = vmatprep.subr.bf16.mxu1 %v6949_v15 }
 0x2d5   : > { %2720 = vst.msk [vmem:[#allocation2 + $0xa8] sm:$0xff] %vm2698_vm11, %v2645_v52  ;;  %6401 = vrot.lane.b32.xlu0 %v6400_v21, %s7000_s16  ;;  %6386 = vrot.lane.b32.xlu1 %v6400_v21, %s6998_s14  ;;  %v6425_v27 = vpack.i.bf16 %v3144_v49, %v3143_v24  ;;  %v3101_v52 = vld [vmem:[#allocation3 + $0x60] sm:$0xff] }
 0x2d6   : > { %v2623_v48 = vpop.permute.xlu0 %2622  ;;  %v3102_v42 = vld [vmem:[#allocation3 + $0x68] sm:$0xff] }
 0x2d7   : > { %v2753_v60 = vld [vmem:[#allocation2 + $0xb0] sm:$0xff]  ;;  %2709 = vst.msk [vmem:[#allocation2 + $0x50] sm:$0xff] %vm2698_vm11, %v2623_v48  ;;  %v6475_v34 = vpack.i.bf16 %v3102_v42, %v3101_v52  ;;  %5561 = vmatpush3.bf16.msra.mxu1 %v6949_v15 }
 0x2d8   : > { %v2792_v30 = vmul.f32 %v8221_v55, %v2753_v60  ;;  %v2625_v36 = vpop.permute.xlu1 %2624 }
 0x2d9   : > { %v2754_v39 = vld [vmem:[#allocation2 + $0xb8] sm:$0xff]  ;;  %2710 = vst.msk [vmem:[#allocation2 + $0x58] sm:$0xff] %vm2698_vm11, %v2625_v36  ;;  %6406 = vrot.lane.b32.xlu0 %v6405_v41, %s7001_s19  ;;  %6391 = vrot.lane.b32.xlu1 %v6405_v41, %s7002_s17  ;;  %v6950_v36 = vld [vmem:[%s9535_s7 + $0x10] sm:$0xff]  }
 0x2da   : > { %v2831_v63 = vadd.f32 %v8229_v53, %v2792_v30  ;;  %v2793_v9 = vmul.f32 %v8221_v55, %v2754_v39  ;;  %v2751_v57 = vld [vmem:[#allocation2 + $0xa0] sm:$0xff]  ;;  %v2619_v44 = vpop.permute.xlu0 %2618  ;;  %v3134_v30 = vld [vmem:[#allocation3 + $0x69] sm:$0xff]  ;;  %5562 = vmatprep.subr.bf16.mxu1 %v6950_v36 }
 0x2db   : > { %v2790_v22 = vmul.f32 %v8221_v55, %v2751_v57  ;;  %2707 = vst.msk [vmem:[#allocation2 + $0x40] sm:$0xff] %vm2698_vm11, %v2619_v44  ;;  %v3133_v57 = vld [vmem:[#allocation3 + $0x61] sm:$0xff]  ;;  %5563 = vmatpush3.bf16.msra.mxu1 %v6950_v36 }
 0x2dc   : > { %v2863_v50 = vmax.f32 %v2831_v63, 0.0  ;;  %v2832_v8 = vadd.f32 %v8229_v53, %v2793_v9  ;;  %v2752_v29 = vld [vmem:[#allocation2 + $0xa8] sm:$0xff]  ;;  %v2621_v59 = vpop.permute.xlu1 %2620 }
 0x2dd   : > { %v2829_v26 = vadd.f32 %v8229_v53, %v2790_v22  ;;  %v2791_v10 = vmul.f32 %v8221_v55, %v2752_v29  ;;  %2708 = vst.msk [vmem:[#allocation2 + $0x48] sm:$0xff] %vm2698_vm11, %v2621_v59  ;;  %6416 = vrot.lane.b32.xlu0 %v6405_v41, %s6994_s24  ;;  %6411 = vrot.lane.b32.xlu1 %v6400_v21, %s6992_s20  ;;  %v3165_v29 = vld [vmem:[#allocation3 + $0x62] sm:$0xff]  ;;  %v3166_v59 = vld [vmem:[#allocation3 + $0x6a] sm:$0xff] }
 0x2de   : > { %2895 = vst.msk [vmem:[#allocation3 + $0x121] sm:$0xff] %vm442_vm0, %v2863_v50  ;;  %v2864_v56 = vmax.f32 %v2832_v8, 0.0  ;;  %v2741_v1 = vld [vmem:[#allocation2 + $0x50] sm:$0xff]  ;;  %v6480_v22 = vpack.i.bf16 %v3134_v30, %v3133_v57 }
 0x2df   : > { %v2861_v2 = vmax.f32 %v2829_v26, 0.0  ;;  %v2830_v11 = vadd.f32 %v8229_v53, %v2791_v10  ;;  %v2780_v33 = vmul.f32 %v8221_v55, %v2741_v1  ;;  %v6951_v10 = vld [vmem:[%s9535_s7 + $0x18] sm:$0xff]  }
 0x2e0   : > { %2896 = vst.msk [vmem:[#allocation3 + $0x129] sm:$0xff] %vm442_vm0, %v2864_v56  ;;  %v2742_v28 = vld [vmem:[#allocation2 + $0x58] sm:$0xff]  ;;  %5564 = vmatprep.subr.bf16.mxu1 %v6951_v10 }
 0x2e1   : > { %2893 = vst.msk [vmem:[#allocation3 + $0x109] sm:$0xff] %vm442_vm0, %v2861_v2  ;;  %v2862_v6 = vmax.f32 %v2830_v11, 0.0  ;;  %v2819_v46 = vadd.f32 %v8229_v53, %v2780_v33  ;;  %v2781_v0 = vmul.f32 %v8221_v55, %v2742_v28  ;;  %6431 = vrot.lane.b32.xlu0 %v6430_v51, %s7001_s19  ;;  %6421 = vrot.lane.b32.xlu1 %v6420_v12, %s6999_s15 }
 0x2e2   : > { %v2739_v3 = vld [vmem:[#allocation2 + $0x40] sm:$0xff]  ;;  %v6485_v11 = vpack.i.bf16 %v3166_v59, %v3165_v29  ;;  %5565 = vmatpush3.bf16.msra.mxu1 %v6951_v10 }
 0x2e3   : > { %2894 = vst.msk [vmem:[#allocation3 + $0x111] sm:$0xff] %vm442_vm0, %v2862_v6  ;;  %v2851_v45 = vmax.f32 %v2819_v46, 0.0  ;;  %v2820_v38 = vadd.f32 %v8229_v53, %v2781_v0  ;;  %v2778_v35 = vmul.f32 %v8221_v55, %v2739_v3  ;;  %v6952_v6 = vld [vmem:[%s9535_s7 + $0x20] ss:$0 sps:$4 sm:$0xff]  }
 0x2e4   : > { %v2740_v31 = vld [vmem:[#allocation2 + $0x48] sm:$0xff]  ;;  %5642 = vmatprep.subr.msk.bf16.mxu1 %vm4585_vm12, %v6952_v6 }
 0x2e5   : > { %2883 = vst.msk [vmem:[#allocation3 + $0x91] sm:$0xff] %vm442_vm0, %v2851_v45  ;;  %v2852_v5 = vmax.f32 %v2820_v38, 0.0  ;;  %v2817_v37 = vadd.f32 %v8229_v53, %v2778_v35  ;;  %v2779_v13 = vmul.f32 %v8221_v55, %v2740_v31  ;;  %6426 = vrot.lane.b32.xlu1 %v6425_v27, %s7000_s16  ;;  %6446 = vrot.lane.b32.xlu0 %v6420_v12, %s6996_s18  ;;  %v3163_v45 = vld [vmem:[#allocation3 + $0x4a] sm:$0xff]  ;;  %v4587_v38 = vsel %vm4585_vm12, %v6952_v6, 0  ;;  %v3117_v29 = vld [vmem:[#allocation3 + $0x120] sm:$0xff] }
 0x2e6   : > { %v2655_v4 = vpop.permute.xlu0 %2654  ;;  %v8419_v31 = vld [vmem:[#allocation3 + $0x50] sm:$0xff]  ;;  %5567 = vmatpush3.bf16.msra.mxu1 %v4587_v38  ;;  %v6314_v6 = vunpack.i.h.bf16 %v8202_v19 }
 0x2e7   : > { %2884 = vst.msk [vmem:[#allocation3 + $0x99] sm:$0xff] %vm442_vm0, %v2852_v5  ;;  %v2849_v16 = vmax.f32 %v2817_v37, 0.0  ;;  %v2818_v25 = vadd.f32 %v8229_v53, %v2779_v13 }
 0x2e8   : > { %2725 = vst.msk [vmem:[#allocation2 + $0xd0] sm:$0xff] %vm2698_vm11, %v2655_v4  ;;  %v2657_v58 = vpop.permute.xlu1 %2656 }
 0x2e9   : > { %2881 = vst.msk [vmem:[#allocation3 + $0x79] sm:$0xff] %vm442_vm0, %v2849_v16  ;;  %v2850_v17 = vmax.f32 %v2818_v25, 0.0  ;;  %6451 = vrot.lane.b32.xlu0 %v6425_v27, %s6998_s14  ;;  %6436 = vrot.lane.b32.xlu1 %v6425_v27, %s6992_s20  ;;  %v3164_v27 = vld [vmem:[#allocation3 + $0x52] sm:$0xff]  ;;  %v8426_v16 = vld [vmem:[#allocation3 + $0x48] sm:$0xff] }
 0x2ea   : > { %2726 = vst.msk [vmem:[#allocation2 + $0xd8] sm:$0xff] %vm2698_vm11, %v2657_v58  ;;  %v2651_v14 = vpop.permute.xlu0 %2650  ;;  %v6500_v43 = vpack.i.bf16 %v8419_v31, %v8426_v16 }
 0x2eb   : > { %2882 = vst.msk [vmem:[#allocation3 + $0x81] sm:$0xff] %vm442_vm0, %v2850_v17  ;;  %v6510_v17 = vpack.i.bf16 %v3164_v27, %v3163_v45  ;;  %v8478_v27 = vld [vmem:[#allocation3 + $0x110] sm:$0xff] }
 0x2ec   : > { %2723 = vst.msk [vmem:[#allocation2 + $0xc0] sm:$0xff] %vm2698_vm11, %v2651_v14  ;;  %v2653_v61 = vpop.permute.xlu1 %2652 }
 0x2ed   : > { %2724 = vst.msk [vmem:[#allocation2 + $0xc8] sm:$0xff] %vm2698_vm11, %v2653_v61  ;;  %6456 = vrot.lane.b32.xlu0 %v6430_v51, %s7002_s17  ;;  %6441 = vrot.lane.b32.xlu1 %v6430_v51, %s6994_s24  ;;  %v3132_v61 = vld [vmem:[#allocation3 + $0x51] sm:$0xff] }
 0x2ee   : > { %v2631_v21 = vpop.permute.xlu0 %2630 }
 0x2ef   : > { %v2757_v62 = vld [vmem:[#allocation2 + $0xd0] sm:$0xff]  ;;  %2713 = vst.msk [vmem:[#allocation2 + $0x70] sm:$0xff] %vm2698_vm11, %v2631_v21 }
 0x2f0   : > { %v2796_v47 = vmul.f32 %v8221_v55, %v2757_v62  ;;  %v2633_v48 = vpop.permute.xlu1 %2632  ;;  %v3131_v62 = vld [vmem:[#allocation3 + $0x49] sm:$0xff] }
 0x2f1   : > { %v2758_v60 = vld [vmem:[#allocation2 + $0xd8] sm:$0xff]  ;;  %2714 = vst.msk [vmem:[#allocation2 + $0x78] sm:$0xff] %vm2698_vm11, %v2633_v48  ;;  %6476 = vrot.lane.b32.xlu0 %v6475_v34, %s6999_s15  ;;  %6461 = vrot.lane.b32.xlu1 %v6475_v34, %s6996_s18  ;;  %v6505_v21 = vpack.i.bf16 %v3132_v61, %v3131_v62 }
 0x2f2   : > { %v2835_v41 = vadd.f32 %v8229_v53, %v2796_v47  ;;  %v2797_v39 = vmul.f32 %v8221_v55, %v2758_v60  ;;  %v2627_v9 = vpop.permute.xlu0 %2626 }
 0x2f3   : > { %v2755_v63 = vld [vmem:[#allocation2 + $0xc0] sm:$0xff]  ;;  %2711 = vst.msk [vmem:[#allocation2 + $0x60] sm:$0xff] %vm2698_vm11, %v2627_v9 }
 0x2f4   : > { %v2867_v44 = vmax.f32 %v2835_v41, 0.0  ;;  %v2836_v50 = vadd.f32 %v8229_v53, %v2797_v39  ;;  %v2794_v8 = vmul.f32 %v8221_v55, %v2755_v63  ;;  %v2756_v7 = vld [vmem:[#allocation2 + $0xc8] sm:$0xff]  ;;  %v2629_v54 = vpop.permute.xlu1 %2628 }
 0x2f5   : > { %v2795_v26 = vmul.f32 %v8221_v55, %v2756_v7  ;;  %2712 = vst.msk [vmem:[#allocation2 + $0x68] sm:$0xff] %vm2698_vm11, %v2629_v54  ;;  %6481 = vrot.lane.b32.xlu0 %v6480_v22, %s7000_s16  ;;  %6466 = vrot.lane.b32.xlu1 %v6480_v22, %s6998_s14 }
 0x2f6   : > { %2899 = vst.msk [vmem:[#allocation3 + $0x151] sm:$0xff] %vm442_vm0, %v2867_v44  ;;  %v2868_v32 = vmax.f32 %v2836_v50, 0.0  ;;  %v2833_v56 = vadd.f32 %v8229_v53, %v2794_v8  ;;  %v2745_v1 = vld [vmem:[#allocation2 + $0x70] sm:$0xff]  ;;  %v3118_v50 = vld [vmem:[#allocation3 + $0x128] sm:$0xff] }
 0x2f7   : > { %v2834_v40 = vadd.f32 %v8229_v53, %v2795_v26  ;;  %v2784_v2 = vmul.f32 %v8221_v55, %v2745_v1  ;;  %v3150_v26 = vld [vmem:[#allocation3 + $0x129] sm:$0xff]  ;;  %v3149_v1 = vld [vmem:[#allocation3 + $0x121] sm:$0xff] }
 0x2f8   : > { %2900 = vst.msk [vmem:[#allocation3 + $0x159] sm:$0xff] %vm442_vm0, %v2868_v32  ;;  %v2865_v51 = vmax.f32 %v2833_v56, 0.0  ;;  %v2746_v33 = vld [vmem:[#allocation2 + $0x78] sm:$0xff]  ;;  %v6555_v56 = vpack.i.bf16 %v3118_v50, %v3117_v29 }
 0x2f9   : > { %v2866_v12 = vmax.f32 %v2834_v40, 0.0  ;;  %v2823_v28 = vadd.f32 %v8229_v53, %v2784_v2  ;;  %v2785_v49 = vmul.f32 %v8221_v55, %v2746_v33  ;;  %6486 = vrot.lane.b32.xlu0 %v6485_v11, %s7001_s19  ;;  %6471 = vrot.lane.b32.xlu1 %v6485_v11, %s7002_s17  ;;  %v3181_v40 = vld [vmem:[#allocation3 + $0x122] sm:$0xff]  ;;  %v3182_v2 = vld [vmem:[#allocation3 + $0x12a] sm:$0xff] }
 0x2fa   : > { %2897 = vst.msk [vmem:[#allocation3 + $0x139] sm:$0xff] %vm442_vm0, %v2865_v51  ;;  %v2743_v46 = vld [vmem:[#allocation2 + $0x60] sm:$0xff]  ;;  %v6560_v51 = vpack.i.bf16 %v3150_v26, %v3149_v1  ;;  %v3137_v1 = vld [vmem:[#allocation3 + $0x91] sm:$0xff] }
 0x2fb   : > { %2898 = vst.msk [vmem:[#allocation3 + $0x141] sm:$0xff] %vm442_vm0, %v2866_v12  ;;  %v2855_v0 = vmax.f32 %v2823_v28, 0.0  ;;  %v2824_v3 = vadd.f32 %v8229_v53, %v2785_v49  ;;  %v2782_v24 = vmul.f32 %v8221_v55, %v2743_v46  ;;  %v2905_v12 = vld [vmem:[#allocation3] sm:$0xff]  ;;  %v2906_v28 = vld [vmem:[#allocation3 + $0x8] sm:$0xff]  ;;  %v6565_v49 = vpack.i.bf16 %v3182_v2, %v3181_v40  ;;  %v3169_v2 = vld [vmem:[#allocation3 + $0x92] sm:$0xff] }
 0x2fc   : > { %v2744_v35 = vld [vmem:[#allocation2 + $0x68] sm:$0xff]  ;;  %v6313_v46 = vunpack.i.l.bf16 %v8202_v19 }
 0x2fd   : > { %2887 = vst.msk [vmem:[#allocation3 + $0xc1] sm:$0xff] %vm442_vm0, %v2855_v0  ;;  %v2856_v5 = vmax.f32 %v2824_v3, 0.0  ;;  %v2821_v37 = vadd.f32 %v8229_v53, %v2782_v24  ;;  %v2783_v13 = vmul.f32 %v8221_v55, %v2744_v35  ;;  %6496 = vrot.lane.b32.xlu0 %v6485_v11, %s6994_s24  ;;  %6491 = vrot.lane.b32.xlu1 %v6480_v22, %s6992_s20  ;;  %v6308_v11 = vunpack.i.l.bf16 %v8200_v23  ;;  %v3180_v35 = vld [vmem:[#allocation3 + $0x112] sm:$0xff] }
 0x2fe   : > { %v2663_v4 = vpop.permute.xlu0 %2662 }
 0x2ff   : > { %2888 = vst.msk [vmem:[#allocation3 + $0xc9] sm:$0xff] %vm442_vm0, %v2856_v5  ;;  %v2853_v25 = vmax.f32 %v2821_v37, 0.0  ;;  %v2822_v58 = vadd.f32 %v8229_v53, %v2783_v13  ;;  %v4217_v3 = vsel %vm442_vm0, %v2905_v12, %v6308_v11  ;;  %v3167_v12 = vld [vmem:[#allocation3 + $0x7a] sm:$0xff] }
 0x300   : > { %2729 = vst.msk [vmem:[#allocation2 + $0xf0] sm:$0xff] %vm2698_vm11, %v2663_v4  ;;  %v2665_v14 = vpop.permute.xlu1 %2664  ;;  %v4249_v13 = vsel %vm2148_vm5, %v4217_v3, %v6313_v46  ;;  %v8484_v4 = vld [vmem:[#allocation3 + $0x108] sm:$0xff] }
 0x301   : > { %2885 = vst.msk [vmem:[#allocation3 + $0xa9] sm:$0xff] %vm442_vm0, %v2853_v25  ;;  %v2854_v42 = vmax.f32 %v2822_v58, 0.0  ;;  %6511 = vrot.lane.b32.xlu0 %v6510_v17, %s7001_s19  ;;  %6501 = vrot.lane.b32.xlu1 %v6500_v43, %s6999_s15 }
 0x302   : > { %2730 = vst.msk [vmem:[#allocation2 + $0xf8] sm:$0xff] %vm2698_vm11, %v2665_v14  ;;  %v2659_v15 = vpop.permute.xlu0 %2658 }
 0x303   : > { %2886 = vst.msk [vmem:[#allocation3 + $0xb1] sm:$0xff] %vm442_vm0, %v2854_v42 }
 0x304   : > { %2727 = vst.msk [vmem:[#allocation2 + $0xe0] sm:$0xff] %vm2698_vm11, %v2659_v15  ;;  %v2661_v52 = vpop.permute.xlu1 %2660 }
 0x305   : > { %2728 = vst.msk [vmem:[#allocation2 + $0xe8] sm:$0xff] %vm2698_vm11, %v2661_v52  ;;  %6506 = vrot.lane.b32.xlu1 %v6505_v21, %s7000_s16  ;;  %6526 = vrot.lane.b32.xlu0 %v6500_v43, %s6996_s18 }
 0x306   : > { %v8442_v34 = vpop.permute.xlu0 %6331 }
 0x307   : > { %v2761_v47 = vld [vmem:[#allocation2 + $0xf0] sm:$0xff]  ;;  %v6334_v15 = vunpack.i.h.bf16 %v8442_v34  ;;  %v6333_v62 = vunpack.i.l.bf16 %v8442_v34 }
 0x308   : > { %v2800_v60 = vmul.f32 %v8221_v55, %v2761_v47  ;;  %v3148_v47 = vld [vmem:[#allocation3 + $0x111] sm:$0xff] }
 0x309   : > { %v2762_v48 = vld [vmem:[#allocation2 + $0xf8] sm:$0xff]  ;;  %6531 = vrot.lane.b32.xlu0 %v6505_v21, %s6998_s14  ;;  %6516 = vrot.lane.b32.xlu1 %v6505_v21, %s6992_s20 }
 0x30a   : > { %v2839_v30 = vadd.f32 %v8229_v53, %v2800_v60  ;;  %v2801_v41 = vmul.f32 %v8221_v55, %v2762_v48  ;;  %v8449_v36 = vpop.permute.xlu0 %6336  ;;  %v8494_v60 = vpop.permute.xlu1 %6316 }
 0x30b   : > { %v2759_v39 = vld [vmem:[#allocation2 + $0xe0] sm:$0xff]  ;;  %v6339_v48 = vunpack.i.h.bf16 %v8449_v36 }
 0x30c   : > { %v2871_v63 = vmax.f32 %v2839_v30, 0.0  ;;  %v2840_v9 = vadd.f32 %v8229_v53, %v2801_v41  ;;  %v2798_v57 = vmul.f32 %v8221_v55, %v2759_v39  ;;  %v2760_v44 = vld [vmem:[#allocation2 + $0xe8] sm:$0xff]  ;;  %v6338_v30 = vunpack.i.l.bf16 %v8449_v36 }
 0x30d   : > { %v2799_v7 = vmul.f32 %v8221_v55, %v2760_v44  ;;  %6536 = vrot.lane.b32.xlu0 %v6510_v17, %s7002_s17  ;;  %6521 = vrot.lane.b32.xlu1 %v6510_v17, %s6994_s24  ;;  %v6580_v17 = vpack.i.bf16 %v8478_v27, %v8484_v4  ;;  %v3147_v44 = vld [vmem:[#allocation3 + $0x109] sm:$0xff] }
 0x30e   : > { %2903 = vst.msk [vmem:[#allocation3 + $0x181] sm:$0xff] %vm442_vm0, %v2871_v63  ;;  %v2872_v8 = vmax.f32 %v2840_v9, 0.0  ;;  %v2837_v22 = vadd.f32 %v8229_v53, %v2798_v57  ;;  %v8458_v54 = vpop.permute.xlu0 %6341  ;;  %v6585_v50 = vpack.i.bf16 %v3148_v47, %v3147_v44  ;;  %v8512_v29 = vpop.permute.xlu1 %6321 }
 0x30f   : > { %v2838_v32 = vadd.f32 %v8229_v53, %v2799_v7  ;;  %v6309_v53 = vunpack.i.h.bf16 %v8200_v23  ;;  %v3179_v23 = vld [vmem:[#allocation3 + $0x10a] sm:$0xff]  ;;  %v6344_v34 = vunpack.i.h.bf16 %v8458_v54  ;;  %v6343_v63 = vunpack.i.l.bf16 %v8458_v54 }
 0x310   : > { %2904 = vst.msk [vmem:[#allocation3 + $0x189] sm:$0xff] %vm442_vm0, %v2872_v8  ;;  %v2869_v59 = vmax.f32 %v2837_v22, 0.0  ;;  %v6590_v58 = vpack.i.bf16 %v3180_v35, %v3179_v23 }
 0x311   : > { %v2870_v10 = vmax.f32 %v2838_v32, 0.0  ;;  %6556 = vrot.lane.b32.xlu0 %v6555_v56, %s6999_s15  ;;  %6541 = vrot.lane.b32.xlu1 %v6555_v56, %s6996_s18  ;;  %v4218_v0 = vsel %vm442_vm0, %v2906_v28, %v6309_v53  ;;  %v3105_v56 = vld [vmem:[#allocation3 + $0x90] sm:$0xff]  ;;  %v3170_v53 = vld [vmem:[#allocation3 + $0x9a] sm:$0xff]  ;;  %v3168_v28 = vld [vmem:[#allocation3 + $0x82] sm:$0xff] }
 0x312   : > { %2901 = vst.msk [vmem:[#allocation3 + $0x169] sm:$0xff] %vm442_vm0, %v2869_v59  ;;  %v8465_v55 = vpop.permute.xlu0 %6351  ;;  %v4250_v19 = vsel %vm2148_vm5, %v4218_v0, %v6314_v6  ;;  %v3106_v59 = vld [vmem:[#allocation3 + $0x98] sm:$0xff]  ;;  %v8517_v32 = vpop.permute.xlu1 %6326  ;;  %v6645_v11 = vpack.i.bf16 %v3170_v53, %v3169_v2  ;;  %v6670_v0 = vpack.i.bf16 %v3168_v28, %v3167_v12  ;;  %v3142_v2 = vld [vmem:[#allocation3 + $0xc9] sm:$0xff]  ;;  %v3141_v53 = vld [vmem:[#allocation3 + $0xc1] sm:$0xff] }
 0x313   : > { %2902 = vst.msk [vmem:[#allocation3 + $0x171] sm:$0xff] %vm442_vm0, %v2870_v10  ;;  %v6635_v26 = vpack.i.bf16 %v3106_v59, %v3105_v56  ;;  %v3138_v10 = vld [vmem:[#allocation3 + $0x99] sm:$0xff]  ;;  %v3110_v56 = vld [vmem:[#allocation3 + $0xc8] sm:$0xff]  ;;  %v6780_v28 = vpack.i.bf16 %v3142_v2, %v3141_v53  ;;  %v6329_v2 = vunpack.i.h.bf16 %v8517_v32 }
 0x314   : > { %v6640_v40 = vpack.i.bf16 %v3138_v10, %v3137_v1  ;;  %v3103_v6 = vld [vmem:[#allocation3 + $0x78] sm:$0xff]  ;;  %v8642_v53 = vld [vmem:[#allocation3 + $0xa8] sm:$0xff] }
 0x315   : > { %6561 = vrot.lane.b32.xlu0 %v6560_v51, %s7000_s16  ;;  %6546 = vrot.lane.b32.xlu1 %v6560_v51, %s6998_s14 }
 0x316   : > { %v6367_v33 = vpop.permute.xlu0 %6366 }
 0x317   : > { %v6369_v45 = vunpack.i.h.bf16 %v6367_v33  ;;  %v6368_v38 = vunpack.i.l.bf16 %v6367_v33 }
 0x319   : > { %6566 = vrot.lane.b32.xlu0 %v6565_v49, %s7001_s19  ;;  %6551 = vrot.lane.b32.xlu1 %v6565_v49, %s7002_s17  ;;  %v4282_v43 = vsel %vm2214_vm7, %v4250_v19, %v6369_v45  ;;  %v4281_v14 = vsel %vm2214_vm7, %v4249_v13, %v6368_v38  ;;  %v3135_v45 = vld [vmem:[#allocation3 + $0x79] sm:$0xff] }
 0x31a   : > { %v6372_v24 = vpop.permute.xlu0 %6371 }
 0x31b   : > { %v6374_v5 = vunpack.i.h.bf16 %v6372_v24  ;;  %v6373_v37 = vunpack.i.l.bf16 %v6372_v24  ;;  %v3136_v24 = vld [vmem:[#allocation3 + $0x81] sm:$0xff] }
 0x31c   : > { %v6665_v35 = vpack.i.bf16 %v3136_v24, %v3135_v45 }
 0x31d   : > { %6576 = vrot.lane.b32.xlu0 %v6565_v49, %s6994_s24  ;;  %6571 = vrot.lane.b32.xlu1 %v6560_v51, %s6992_s20  ;;  %v4313_v21 = vsel %vm2280_vm9, %v4281_v14, %v6373_v37  ;;  %v4314_v52 = vsel %vm2280_vm9, %v4282_v43, %v6374_v5  ;;  %v8523_v51 = vpop.permute.xlu1 %6346  ;;  %v3104_v49 = vld [vmem:[#allocation3 + $0x80] sm:$0xff] }
 0x31e   : > { %v6377_v25 = vpop.permute.xlu0 %6376  ;;  %v6660_v3 = vpack.i.bf16 %v3104_v49, %v3103_v6  ;;  %v3173_v49 = vld [vmem:[#allocation3 + $0xc2] sm:$0xff]  ;;  %v3174_v6 = vld [vmem:[#allocation3 + $0xca] sm:$0xff] }
 0x31f   : > { %v6379_v61 = vunpack.i.h.bf16 %v6377_v25  ;;  %v6378_v42 = vunpack.i.l.bf16 %v6377_v25  ;;  %v3122_v25 = vld [vmem:[#allocation3 + $0x158] sm:$0xff] }
 0x321   : > { %v4346_v41 = vsel %vm4345_vm13, %v4313_v21, %v6378_v42  ;;  %v4347_v39 = vsel %vm4345_vm13, %v4314_v52, %v6379_v61  ;;  %6591 = vrot.lane.b32.xlu0 %v6590_v58, %s7001_s19  ;;  %6581 = vrot.lane.b32.xlu1 %v6580_v17, %s6999_s15  ;;  %v8527_v33 = vpop.permute.xlu1 %6356  ;;  %v3060_v61 = vld [vmem:[#allocation3 + $0x159] sm:$0xff] }
 0x322   : > { %v4379_v9 = vsel %vm4378_vm14, %v4346_v41, %v6333_v62  ;;  %v4380_v57 = vsel %vm4378_vm14, %v4347_v39, %v6334_v15  ;;  %v3183_v42 = vld [vmem:[#allocation3 + $0x13a] sm:$0xff]  ;;  %v3184_v15 = vld [vmem:[#allocation3 + $0x142] sm:$0xff]  ;;  %v3059_v62 = vld [vmem:[#allocation3 + $0x151] sm:$0xff] }
 0x323   : > { %v4412_v36 = vsel %vm4411_vm15, %v4379_v9, %v6338_v30  ;;  %v4413_v8 = vsel %vm4411_vm15, %v4380_v57, %v6339_v48  ;;  %v8565_v47 = vpack.i.bf16 %v3060_v61, %v3059_v62  ;;  %v6730_v48 = vpack.i.bf16 %v3184_v15, %v3183_v42  ;;  %v3091_v30 = vld [vmem:[#allocation3 + $0x152] sm:$0xff]  ;;  %v3092_v41 = vld [vmem:[#allocation3 + $0x15a] sm:$0xff] }
 0x324   : > { %v4445_v22 = vsel %vm4444_vm1, %v4412_v36, %v6343_v63  ;;  %v4446_v7 = vsel %vm4444_vm1, %v4413_v8, %v6344_v34  ;;  %v3026_v39 = vld [vmem:[#allocation3 + $0x140] sm:$0xff]  ;;  %v3025_v34 = vld [vmem:[#allocation3 + $0x138] sm:$0xff]  ;;  %v8574_v57 = vpack.i.bf16 %v3092_v41, %v3091_v30  ;;  %v6319_v62 = vunpack.i.h.bf16 %v8494_v60  ;;  %v3171_v30 = vld [vmem:[#allocation3 + $0xaa] sm:$0xff] }
 0x325   : > { %6586 = vrot.lane.b32.xlu1 %v6585_v50, %s7000_s16  ;;  %6606 = vrot.lane.b32.xlu0 %v6580_v17, %s6996_s18  ;;  %v4477_v54 = vpack.c.bf16 %v4446_v7, %v4445_v22  ;;  %v8533_v46 = vpop.permute.xlu1 %6361  ;;  %v6745_v44 = vpack.i.bf16 %v3026_v39, %v3025_v34  ;;  %v3057_v36 = vld [vmem:[#allocation3 + $0x139] sm:$0xff]  ;;  %v6324_v39 = vunpack.i.h.bf16 %v8512_v29  ;;  %v6323_v34 = vunpack.i.l.bf16 %v8512_v29 }
 0x326   : > { %v6364_v24 = vunpack.i.h.bf16 %v8533_v46  ;;  %v6363_v45 = vunpack.i.l.bf16 %v8533_v46  ;;  %v3172_v41 = vld [vmem:[#allocation3 + $0xb2] sm:$0xff]  ;;  %v6328_v29 = vunpack.i.l.bf16 %v8517_v32 }
 0x327   : > { %5568 = vmatprep.mubr.msk.bf16.mxu1 %vm4536_vm2, %v4477_v54 }
 0x329   : > { %6611 = vrot.lane.b32.xlu0 %v6585_v50, %s6998_s14  ;;  %6596 = vrot.lane.b32.xlu1 %v6585_v50, %s6992_s20  ;;  %v3058_v50 = vld [vmem:[#allocation3 + $0x141] sm:$0xff] }
 0x32a   : > { %v6750_v7 = vpack.i.bf16 %v3058_v50, %v3057_v36  ;;  %v8631_v36 = vpack.i.bf16 %v3172_v41, %v3171_v30  ;;  %v3045_v41 = vld [vmem:[#allocation3 + $0xa9] sm:$0xff] }
 0x32d   : > { %6616 = vrot.lane.b32.xlu0 %v6590_v58, %s7002_s17  ;;  %6601 = vrot.lane.b32.xlu1 %v6590_v58, %s6994_s24  ;;  %v3121_v58 = vld [vmem:[#allocation3 + $0x150] sm:$0xff] }
 0x32e   : > { %v6715_v14 = vpack.i.bf16 %v3122_v25, %v3121_v58  ;;  %v6785_v58 = vpack.i.bf16 %v3174_v6, %v3173_v49  ;;  %v6349_v49 = vunpack.i.h.bf16 %v8523_v51  ;;  %v6348_v6 = vunpack.i.l.bf16 %v8523_v51 }
 0x331   : > { %6636 = vrot.lane.b32.xlu0 %v6635_v26, %s6999_s15  ;;  %6621 = vrot.lane.b32.xlu1 %v6635_v26, %s6996_s18  ;;  %v3109_v26 = vld [vmem:[#allocation3 + $0xc0] sm:$0xff] }
 0x335   : > { %6641 = vrot.lane.b32.xlu0 %v6640_v40, %s7000_s16  ;;  %6626 = vrot.lane.b32.xlu1 %v6640_v40, %s6998_s14 }
 0x339   : > { %6646 = vrot.lane.b32.xlu0 %v6645_v11, %s7001_s19  ;;  %6631 = vrot.lane.b32.xlu1 %v6645_v11, %s7002_s17 }
 0x33d   : > { %6656 = vrot.lane.b32.xlu0 %v6645_v11, %s6994_s24  ;;  %6651 = vrot.lane.b32.xlu1 %v6640_v40, %s6992_s20  ;;  %v6775_v40 = vpack.i.bf16 %v3110_v56, %v3109_v26 }
 0x341   : > { %6671 = vrot.lane.b32.xlu0 %v6670_v0, %s7001_s19  ;;  %6661 = vrot.lane.b32.xlu1 %v6660_v3, %s6999_s15 }
 0x343   : > { %v8537_v38 = vpop.permute.xlu1 %6381  ;;  %v8539_v23 = vpop.permute.xlu0 %6396 }
 0x345   : > { %6666 = vrot.lane.b32.xlu1 %v6665_v35, %s7000_s16  ;;  %6686 = vrot.lane.b32.xlu0 %v6660_v3, %s6996_s18  ;;  %v6358_v3 = vunpack.i.l.bf16 %v8527_v33 }
 0x347   : > { %v8543_v5 = vpop.permute.xlu1 %6386  ;;  %v8545_v37 = vpop.permute.xlu0 %6401 }
 0x349   : > { %6691 = vrot.lane.b32.xlu0 %v6665_v35, %s6998_s14  ;;  %6676 = vrot.lane.b32.xlu1 %v6665_v35, %s6992_s20 }
 0x34b   : > { %v8549_v13 = vpop.permute.xlu1 %6391  ;;  %v8551_v19 = vpop.permute.xlu0 %6406 }
 0x34d   : > { %6696 = vrot.lane.b32.xlu0 %v6670_v0, %s7002_s17  ;;  %6681 = vrot.lane.b32.xlu1 %v6670_v0, %s6994_s24  ;;  %v6359_v0 = vunpack.i.h.bf16 %v8527_v33 }
 0x34f   : > { %v8555_v17 = vpop.permute.xlu1 %6411  ;;  %v8557_v43 = vpop.permute.xlu0 %6416  ;;  %v4220_v61 = vsel %vm442_vm0, %v8280_v18, %v6359_v0 }
 0x350   : > { %v4252_v42 = vsel %vm2148_vm5, %v4220_v61, %v6364_v24 }
 0x351   : > { %6716 = vrot.lane.b32.xlu0 %v6715_v14, %s6999_s15  ;;  %6701 = vrot.lane.b32.xlu1 %v6715_v14, %s6996_s18  ;;  %v4219_v14 = vsel %vm442_vm0, %v8283_v20, %v6358_v3  ;;  %v4284_v20 = vsel %vm2214_vm7, %v4252_v42, %v6319_v62 }
 0x352   : > { %v4251_v33 = vsel %vm2148_vm5, %v4219_v14, %v6363_v45  ;;  %v4316_v56 = vsel %vm2280_vm9, %v4284_v20, %v6324_v39 }
 0x353   : > { %v8561_v21 = vpop.permute.xlu1 %6421  ;;  %v8563_v52 = vpop.permute.xlu0 %6431 }
 0x355   : > { %6706 = vrot.lane.b32.xlu1 %v8565_v47, %s6998_s14  ;;  %6731 = vrot.lane.b32.xlu0 %v6730_v48, %s7001_s19 }
 0x357   : > { %v8570_v63 = vpop.permute.xlu1 %6426  ;;  %v8572_v9 = vpop.permute.xlu0 %6446 }
 0x359   : > { %6711 = vrot.lane.b32.xlu1 %v8574_v57, %s7002_s17  ;;  %6746 = vrot.lane.b32.xlu0 %v6745_v44, %s6996_s18 }
 0x35b   : > { %v8579_v8 = vpop.permute.xlu1 %6436  ;;  %v8581_v22 = vpop.permute.xlu0 %6451 }
 0x35d   : > { %6721 = vrot.lane.b32.xlu1 %v6745_v44, %s6999_s15  ;;  %6751 = vrot.lane.b32.xlu0 %v6750_v7, %s6998_s14 }
 0x35f   : > { %v8585_v54 = vpop.permute.xlu1 %6441  ;;  %v8587_v59 = vpop.permute.xlu0 %6456 }
 0x361   : > { %6726 = vrot.lane.b32.xlu1 %v6750_v7, %s7000_s16  ;;  %6756 = vrot.lane.b32.xlu0 %v6730_v48, %s7002_s17 }
 0x363   : > { %v8591_v10 = vpop.permute.xlu1 %6461  ;;  %v8593_v1 = vpop.permute.xlu0 %6476 }
 0x365   : > { %6736 = vrot.lane.b32.xlu1 %v6750_v7, %s6992_s20  ;;  %6776 = vrot.lane.b32.xlu0 %v6775_v40, %s6999_s15  ;;  %v8633_v7 = vld [vmem:[#allocation3 + $0xb0] sm:$0xff] }
 0x366   : > { %v6825_v24 = vpack.i.bf16 %v8633_v7, %v8642_v53 }
 0x367   : > { %v8597_v11 = vpop.permute.xlu1 %6466  ;;  %v8599_v12 = vpop.permute.xlu0 %6481 }
 0x369   : > { %6741 = vrot.lane.b32.xlu1 %v6730_v48, %s6994_s24  ;;  %6781 = vrot.lane.b32.xlu0 %v6780_v28, %s7000_s16  ;;  %v6318_v48 = vunpack.i.l.bf16 %v8494_v60 }
 0x36b   : > { %v8607_v35 = vpop.permute.xlu1 %6471  ;;  %v8609_v25 = vpop.permute.xlu0 %6486  ;;  %v4283_v18 = vsel %vm2214_vm7, %v4251_v33, %v6318_v48  ;;  %v3046_v33 = vld [vmem:[#allocation3 + $0xb1] sm:$0xff] }
 0x36c   : > { %v4315_v60 = vsel %vm2280_vm9, %v4283_v18, %v6323_v34  ;;  %v6970_v18 = vld [vmem:[#allocation3 + $0x38] sm:$0xff] }
 0x36d   : > { %6761 = vrot.lane.b32.xlu1 %v6775_v40, %s6996_s18  ;;  %6786 = vrot.lane.b32.xlu0 %v6785_v58, %s7001_s19  ;;  %v4348_v45 = vsel %vm4345_vm13, %v4315_v60, %v6328_v29  ;;  %v4222_v20 = vsel %vm442_vm0, %v6970_v18, %v6349_v49  ;;  %v6354_v29 = vunpack.i.h.bf16 %v8465_v55  ;;  %v6483_v18 = vunpack.i.l.bf16 %v8599_v12 }
 0x36f   : > { %v8619_v46 = vpop.permute.xlu1 %6491  ;;  %v8621_v15 = vpop.permute.xlu0 %6496 }
 0x371   : > { %6766 = vrot.lane.b32.xlu1 %v6780_v28, %s6998_s14  ;;  %6796 = vrot.lane.b32.xlu0 %v6785_v58, %s6994_s24 }
 0x373   : > { %v6502_v44 = vpop.permute.xlu1 %6501  ;;  %v6512_v50 = vpop.permute.xlu0 %6511 }
 0x374   : > { %v6504_v26 = vunpack.i.h.bf16 %v6502_v44  ;;  %v6503_v40 = vunpack.i.l.bf16 %v6502_v44  ;;  %v6514_v62 = vunpack.i.h.bf16 %v6512_v50  ;;  %v6513_v48 = vunpack.i.l.bf16 %v6512_v50 }
 0x375   : > { %6771 = vrot.lane.b32.xlu1 %v6785_v58, %s7002_s17  ;;  %6811 = vrot.lane.b32.xlu0 %v8631_v36, %s7001_s19  ;;  %v4349_v58 = vsel %vm4345_vm13, %v4316_v56, %v6329_v2  ;;  %v6830_v50 = vpack.i.bf16 %v3046_v33, %v3045_v41  ;;  %v6971_v56 = vld [vmem:[#allocation3 + $0x30] sm:$0xff]  ;;  %v6484_v41 = vunpack.i.h.bf16 %v8599_v12 }
 0x376   : > { %v4382_v32 = vsel %vm4378_vm14, %v4349_v58, %v6504_v26  ;;  %v4381_v42 = vsel %vm4378_vm14, %v4348_v45, %v6503_v40 }
 0x377   : > { %v6507_v0 = vpop.permute.xlu1 %6506  ;;  %v6527_v3 = vpop.permute.xlu0 %6526 }
 0x378   : > { %v6509_v14 = vunpack.i.h.bf16 %v6507_v0  ;;  %v6508_v61 = vunpack.i.l.bf16 %v6507_v0  ;;  %v6529_v40 = vunpack.i.h.bf16 %v6527_v3  ;;  %v6528_v2 = vunpack.i.l.bf16 %v6527_v3 }
 0x379   : > { %6791 = vrot.lane.b32.xlu1 %v6780_v28, %s6992_s20  ;;  %6826 = vrot.lane.b32.xlu0 %v6825_v24, %s6996_s18  ;;  %v4221_v28 = vsel %vm442_vm0, %v6971_v56, %v6348_v6  ;;  %v6353_v0 = vunpack.i.l.bf16 %v8465_v55  ;;  %v6488_v56 = vunpack.i.l.bf16 %v8609_v25 }
 0x37a   : > { %v4414_v51 = vsel %vm4411_vm15, %v4381_v42, %v6508_v61  ;;  %v4415_v30 = vsel %vm4411_vm15, %v4382_v32, %v6509_v14  ;;  %v4254_v14 = vsel %vm2148_vm5, %v4222_v20, %v6354_v29  ;;  %v6479_v42 = vunpack.i.h.bf16 %v8593_v1 }
 0x37b   : > { %v4447_v39 = vsel %vm4444_vm1, %v4414_v51, %v6513_v48  ;;  %v4448_v34 = vsel %vm4444_vm1, %v4415_v30, %v6514_v62  ;;  %v8659_v44 = vpop.permute.xlu1 %6516  ;;  %v6532_v60 = vpop.permute.xlu0 %6531  ;;  %v4253_v58 = vsel %vm2148_vm5, %v4221_v28, %v6353_v0  ;;  %v4286_v33 = vsel %vm2214_vm7, %v4254_v14, %v6529_v40 }
 0x37c   : > { %v4478_v26 = vpack.c.bf16 %v4448_v34, %v4447_v39  ;;  %v6534_v45 = vunpack.i.h.bf16 %v6532_v60  ;;  %v6533_v49 = vunpack.i.l.bf16 %v6532_v60  ;;  %v4285_v3 = vsel %vm2214_vm7, %v4253_v58, %v6528_v2 }
 0x37d   : > { %6801 = vrot.lane.b32.xlu1 %v6825_v24, %s6999_s15  ;;  %6831 = vrot.lane.b32.xlu0 %v6830_v50, %s6998_s14  ;;  %v6478_v24 = vunpack.i.l.bf16 %v8593_v1  ;;  %v6489_v60 = vunpack.i.h.bf16 %v8609_v25  ;;  %v3187_v25 = vld [vmem:[#allocation3 + $0x16a] sm:$0xff] }
 0x37e   : > { %5569 = vmatmul.mubr.msk.bf16.vlgmr.msra.gmra.mrb[16].mxu1 %vm4536_vm2, %v4478_v26  ;;  %v4317_v62 = vsel %vm2280_vm9, %v4285_v3, %v6533_v49  ;;  %v4318_v48 = vsel %vm2280_vm9, %v4286_v33, %v6534_v45  ;;  %v3124_v45 = vld [vmem:[#allocation3 + $0x170] sm:$0xff]  ;;  %v3123_v49 = vld [vmem:[#allocation3 + $0x168] sm:$0xff] }
 0x37f   : > { %v8669_v6 = vpop.permute.xlu1 %6521  ;;  %v6537_v61 = vpop.permute.xlu0 %6536  ;;  %v3156_v33 = vld [vmem:[#allocation3 + $0x171] sm:$0xff] }
 0x380   : > { %v6539_v55 = vunpack.i.h.bf16 %v6537_v61  ;;  %v6538_v32 = vunpack.i.l.bf16 %v6537_v61  ;;  %v6845_v61 = vpack.i.bf16 %v3124_v45, %v3123_v49  ;;  %v3031_v45 = vld [vmem:[#allocation3 + $0x180] sm:$0xff] }
 0x381   : > { %6806 = vrot.lane.b32.xlu1 %v6830_v50, %s7000_s16  ;;  %6836 = vrot.lane.b32.xlu0 %v8631_v36, %s7002_s17 }
 0x382   : > { %v4350_v51 = vsel %vm4345_vm13, %v4317_v62, %v6538_v32  ;;  %v4351_v30 = vsel %vm4345_vm13, %v4318_v48, %v6539_v55  ;;  %v3155_v55 = vld [vmem:[#allocation3 + $0x169] sm:$0xff] }
 0x383   : > { %v4383_v20 = vsel %vm4378_vm14, %v4350_v51, %v6478_v24  ;;  %v4384_v1 = vsel %vm4378_vm14, %v4351_v30, %v6479_v42  ;;  %v8686_v39 = vpop.permute.xlu1 %6541  ;;  %v8688_v34 = vpop.permute.xlu0 %6556  ;;  %v6850_v42 = vpack.i.bf16 %v3156_v33, %v3155_v55  ;;  %v6414_v30 = vunpack.i.h.bf16 %v8555_v17  ;;  %v3064_v33 = vld [vmem:[#allocation3 + $0x189] sm:$0xff] }
 0x384   : > { %v4416_v28 = vsel %vm4411_vm15, %v4383_v20, %v6483_v18  ;;  %v4417_v12 = vsel %vm4411_vm15, %v4384_v1, %v6484_v41  ;;  %v6413_v41 = vunpack.i.l.bf16 %v8555_v17  ;;  %v6418_v18 = vunpack.i.l.bf16 %v8557_v43  ;;  %v6972_v1 = vld [vmem:[#allocation3 + $0xf0] sm:$0xff]  ;;  %v3032_v17 = vld [vmem:[#allocation3 + $0x188] sm:$0xff] }
 0x385   : > { %6816 = vrot.lane.b32.xlu1 %v6830_v50, %s6992_s20  ;;  %6841 = vrot.lane.b32.xlu0 %v8565_v47, %s7000_s16  ;;  %v4449_v26 = vsel %vm4444_vm1, %v4416_v28, %v6488_v56  ;;  %v4450_v40 = vsel %vm4444_vm1, %v4417_v12, %v6489_v60  ;;  %v3188_v50 = vld [vmem:[#allocation3 + $0x172] sm:$0xff] }
 0x386   : > { %v4479_v0 = vpack.c.bf16 %v4450_v40, %v4449_v26  ;;  %v6865_v3 = vpack.i.bf16 %v3188_v50, %v3187_v25  ;;  %v4237_v60 = vsel %vm442_vm0, %v6972_v1, %v6413_v41  ;;  %v6973_v56 = vld [vmem:[#allocation3 + $0xf8] sm:$0xff]  ;;  %v6559_v41 = vunpack.i.h.bf16 %v8688_v34 }
 0x387   : > { %v8699_v2 = vpop.permute.xlu1 %6546  ;;  %v8701_v29 = vpop.permute.xlu0 %6561  ;;  %v4238_v28 = vsel %vm442_vm0, %v6973_v56, %v6414_v30  ;;  %v4269_v25 = vsel %vm2148_vm5, %v4237_v60, %v6418_v18  ;;  %v3063_v18 = vld [vmem:[#allocation3 + $0x181] sm:$0xff] }
 0x388   : > { %5572 = vmatprep.mubr.msk.bf16.mxu1 %vm4536_vm2, %v4479_v0  ;;  %v6900_v56 = vpack.i.bf16 %v3064_v33, %v3063_v18  ;;  %v3128_v33 = vld [vmem:[#allocation3 + $0x1a0] sm:$0xff]  ;;  %v6523_v18 = vunpack.i.l.bf16 %v8669_v6 }
 0x389   : > { %6821 = vrot.lane.b32.xlu1 %v8631_v36, %s6994_s24  ;;  %6856 = vrot.lane.b32.xlu0 %v8574_v57, %s7001_s19 }
 0x38b   : > { %v8708_v58 = vpop.permute.xlu1 %6551  ;;  %v8710_v14 = vpop.permute.xlu0 %6566 }
 0x38d   : > { %6846 = vrot.lane.b32.xlu1 %v6845_v61, %s6999_s15  ;;  %6866 = vrot.lane.b32.xlu0 %v6865_v3, %s7001_s19 }
 0x38f   : > { %v8714_v32 = vpop.permute.xlu1 %6571  ;;  %v8716_v36 = vpop.permute.xlu0 %6576 }
 0x391   : > { %6851 = vrot.lane.b32.xlu1 %v6850_v42, %s7000_s16  ;;  %6876 = vrot.lane.b32.xlu0 %v8574_v57, %s6994_s24  ;;  %v6419_v57 = vunpack.i.h.bf16 %v8557_v43 }
 0x393   : > { %v8721_v24 = vpop.permute.xlu1 %6581  ;;  %v8723_v62 = vpop.permute.xlu0 %6591  ;;  %v4270_v43 = vsel %vm2148_vm5, %v4238_v28, %v6419_v57  ;;  %v6564_v28 = vunpack.i.h.bf16 %v8701_v29 }
 0x395   : > { %6861 = vrot.lane.b32.xlu1 %v8565_v47, %s6992_s20  ;;  %6886 = vrot.lane.b32.xlu0 %v6845_v61, %s6996_s18  ;;  %v6890_v61 = vpack.i.bf16 %v3032_v17, %v3031_v45  ;;  %v6568_v45 = vunpack.i.l.bf16 %v8710_v14 }
 0x397   : > { %v8728_v48 = vpop.permute.xlu1 %6586  ;;  %v6607_v51 = vpop.permute.xlu0 %6606 }
 0x398   : > { %v6609_v12 = vunpack.i.h.bf16 %v6607_v51  ;;  %v6608_v26 = vunpack.i.l.bf16 %v6607_v51 }
 0x399   : > { %6871 = vrot.lane.b32.xlu1 %v6850_v42, %s6992_s20  ;;  %6896 = vrot.lane.b32.xlu0 %v6850_v42, %s6998_s14 }
 0x39a   : > { %v4301_v55 = vsel %vm2214_vm7, %v4269_v25, %v6608_v26  ;;  %v4302_v42 = vsel %vm2214_vm7, %v4270_v43, %v6609_v12  ;;  %v6563_v12 = vunpack.i.l.bf16 %v8701_v29  ;;  %v3095_v43 = vld [vmem:[#allocation3 + $0x182] sm:$0xff]  ;;  %v3096_v25 = vld [vmem:[#allocation3 + $0x18a] sm:$0xff] }
 0x39b   : > { %v8736_v20 = vpop.permute.xlu1 %6596  ;;  %v6612_v47 = vpop.permute.xlu0 %6611 }
 0x39c   : > { %v6614_v40 = vunpack.i.h.bf16 %v6612_v47  ;;  %v6613_v0 = vunpack.i.l.bf16 %v6612_v47 }
 0x39d   : > { %6881 = vrot.lane.b32.xlu1 %v6865_v3, %s6994_s24  ;;  %6906 = vrot.lane.b32.xlu0 %v6865_v3, %s7002_s17  ;;  %v6558_v3 = vunpack.i.l.bf16 %v8688_v34 }
 0x39e   : > { %v4333_v47 = vsel %vm2280_vm9, %v4301_v55, %v6613_v0  ;;  %v4334_v57 = vsel %vm2280_vm9, %v4302_v42, %v6614_v40  ;;  %v6569_v0 = vunpack.i.h.bf16 %v8710_v14 }
 0x39f   : > { %v8744_v50 = vpop.permute.xlu1 %6601  ;;  %v6617_v49 = vpop.permute.xlu0 %6616 }
 0x3a0   : > { %v6619_v51 = vunpack.i.h.bf16 %v6617_v49  ;;  %v6618_v30 = vunpack.i.l.bf16 %v6617_v49 }
 0x3a1   : > { %6891 = vrot.lane.b32.xlu1 %v6890_v61, %s6996_s18  ;;  %6916 = vrot.lane.b32.xlu0 %v6890_v61, %s6999_s15  ;;  %v3127_v61 = vld [vmem:[#allocation3 + $0x198] sm:$0xff] }
 0x3a2   : > { %v4366_v1 = vsel %vm4345_vm13, %v4333_v47, %v6618_v30  ;;  %v4367_v60 = vsel %vm4345_vm13, %v4334_v57, %v6619_v51  ;;  %v6910_v30 = vpack.i.bf16 %v3096_v25, %v3095_v43  ;;  %v6920_v47 = vpack.i.bf16 %v3128_v33, %v3127_v61  ;;  %v3191_v43 = vld [vmem:[#allocation3 + $0x19a] sm:$0xff]  ;;  %v3192_v25 = vld [vmem:[#allocation3 + $0x1a2] sm:$0xff] }
 0x3a3   : > { %v4399_v34 = vsel %vm4378_vm14, %v4366_v1, %v6558_v3  ;;  %v4400_v26 = vsel %vm4378_vm14, %v4367_v60, %v6559_v41  ;;  %v8760_v17 = vpop.permute.xlu1 %6621  ;;  %v8762_v40 = vpop.permute.xlu0 %6636  ;;  %v6518_v3 = vunpack.i.l.bf16 %v8659_v44  ;;  %v6519_v57 = vunpack.i.h.bf16 %v8659_v44  ;;  %v3159_v1 = vld [vmem:[#allocation3 + $0x199] sm:$0xff]  ;;  %v3160_v60 = vld [vmem:[#allocation3 + $0x1a1] sm:$0xff] }
 0x3a4   : > { %v4432_v49 = vsel %vm4411_vm15, %v4399_v34, %v6563_v12  ;;  %v4433_v29 = vsel %vm4411_vm15, %v4400_v26, %v6564_v28  ;;  %v6930_v26 = vpack.i.bf16 %v3160_v60, %v3159_v1  ;;  %v6464_v44 = vunpack.i.h.bf16 %v8591_v10  ;;  %v2918_v60 = vld [vmem:[#allocation3 + $0x98] sm:$0xff] }
 0x3a5   : > { %6901 = vrot.lane.b32.xlu1 %v6900_v56, %s6998_s14  ;;  %6926 = vrot.lane.b32.xlu0 %v6900_v56, %s7000_s16  ;;  %v8771_v55 = vsel %vm4444_vm1, %v4432_v49, %v6568_v45  ;;  %v8774_v42 = vsel %vm4444_vm1, %v4433_v29, %v6569_v0  ;;  %v6524_v56 = vunpack.i.h.bf16 %v8669_v6  ;;  %v4223_v34 = vsel %vm442_vm0, %v8426_v16, %v6518_v3 }
 0x3a6   : > { %9598 = vst [vmem:[#allocation14_spill] sm:$0xff] %v8771_v55  ;;  %v4224_v0 = vsel %vm442_vm0, %v8419_v31, %v6519_v57  ;;  %v4255_v45 = vsel %vm2148_vm5, %v4223_v34, %v6523_v18  ;;  %v6463_v6 = vunpack.i.l.bf16 %v8591_v10  ;;  %v6494_v49 = vunpack.i.h.bf16 %v8619_v46  ;;  %v2917_v18 = vld [vmem:[#allocation3 + $0x90] sm:$0xff] }
 0x3a7   : > { %v8776_v51 = vpop.permute.xlu1 %6626  ;;  %v8778_v14 = vpop.permute.xlu0 %6641  ;;  %v6493_v29 = vunpack.i.l.bf16 %v8619_v46  ;;  %v4256_v16 = vsel %vm2148_vm5, %v4224_v0, %v6524_v56  ;;  %v6469_v31 = vunpack.i.h.bf16 %v8597_v11  ;;  %v6940_v10 = vpack.i.bf16 %v3192_v25, %v3191_v43  ;;  %v6974_v25 = vld [vmem:[#allocation3 + $0x60] sm:$0xff] }
 0x3a8   : > { %v4287_v57 = vsel %vm2214_vm7, %v4255_v45, %v6463_v6  ;;  %v6468_v34 = vunpack.i.l.bf16 %v8597_v11  ;;  %v4288_v46 = vsel %vm2214_vm7, %v4256_v16, %v6464_v44  ;;  %v6975_v44 = vld [vmem:[#allocation3 + $0x68] sm:$0xff] }
 0x3a9   : > { %6911 = vrot.lane.b32.xlu1 %v6910_v30, %s7002_s17  ;;  %6936 = vrot.lane.b32.xlu0 %v6910_v30, %s7001_s19  ;;  %v4225_v11 = vsel %vm442_vm0, %v6974_v25, %v6493_v29  ;;  %v4226_v6 = vsel %vm442_vm0, %v6975_v44, %v6494_v49 }
 0x3aa   : > { %v4319_v16 = vsel %vm2280_vm9, %v4287_v57, %v6468_v34 }
 0x3ab   : > { %v8788_v28 = vpop.permute.xlu1 %6631  ;;  %v8790_v12 = vpop.permute.xlu0 %6646 }
 0x3ad   : > { %6921 = vrot.lane.b32.xlu1 %v6920_v47, %s6999_s15 }
 0x3af   : > { %v6652_v61 = vpop.permute.xlu1 %6651  ;;  %v6657_v33 = vpop.permute.xlu0 %6656 }
 0x3b0   : > { %v6654_v30 = vunpack.i.h.bf16 %v6652_v61  ;;  %v6653_v3 = vunpack.i.l.bf16 %v6652_v61  ;;  %v6659_v47 = vunpack.i.h.bf16 %v6657_v33  ;;  %v6658_v1 = vunpack.i.l.bf16 %v6657_v33 }
 0x3b1   : > { %6931 = vrot.lane.b32.xlu1 %v6930_v26, %s7000_s16  ;;  %v6499_v61 = vunpack.i.h.bf16 %v8621_v15  ;;  %v6498_v33 = vunpack.i.l.bf16 %v8621_v15  ;;  %v4320_v15 = vsel %vm2280_vm9, %v4288_v46, %v6469_v31 }
 0x3b2   : > { %v4229_v56 = vsel %vm442_vm0, %v2917_v18, %v6653_v3  ;;  %v4230_v0 = vsel %vm442_vm0, %v2918_v60, %v6654_v30  ;;  %v6473_v30 = vunpack.i.l.bf16 %v8607_v35 }
 0x3b3   : > { %v8813_v41 = vsel %vm2148_vm5, %v4230_v0, %v6659_v47  ;;  %v8816_v45 = vsel %vm2148_vm5, %v4229_v56, %v6658_v1  ;;  %v6662_v26 = vpop.permute.xlu1 %6661  ;;  %v6672_v43 = vpop.permute.xlu0 %6671  ;;  %v6474_v1 = vunpack.i.h.bf16 %v8607_v35  ;;  %v4258_v18 = vsel %vm2148_vm5, %v4226_v6, %v6499_v61 }
 0x3b4   : > { %v6664_v3 = vunpack.i.h.bf16 %v6662_v26  ;;  %v6663_v47 = vunpack.i.l.bf16 %v6662_v26  ;;  %v4257_v60 = vsel %vm2148_vm5, %v4225_v11, %v6498_v33  ;;  %v4352_v29 = vsel %vm4345_vm13, %v4319_v16, %v6473_v30 }
 0x3b5   : > { %6941 = vrot.lane.b32.xlu1 %v6940_v10, %s7001_s19  ;;  %v4353_v34 = vsel %vm4345_vm13, %v4320_v15, %v6474_v1  ;;  %v6674_v26 = vunpack.i.h.bf16 %v6672_v43  ;;  %v6673_v35 = vunpack.i.l.bf16 %v6672_v43  ;;  %v6624_v43 = vunpack.i.h.bf16 %v8760_v17 }
 0x3b6   : > { %v4386_v46 = vsel %vm4378_vm14, %v4353_v34, %v6664_v3  ;;  %v4385_v10 = vsel %vm4378_vm14, %v4352_v29, %v6663_v47  ;;  %v6603_v47 = vunpack.i.l.bf16 %v8744_v50  ;;  %v6623_v1 = vunpack.i.l.bf16 %v8760_v17 }
 0x3b7   : > { %v6667_v56 = vpop.permute.xlu1 %6666  ;;  %v6687_v49 = vpop.permute.xlu0 %6686 }
 0x3b8   : > { %v6669_v0 = vunpack.i.h.bf16 %v6667_v56  ;;  %v6668_v31 = vunpack.i.l.bf16 %v6667_v56  ;;  %v6689_v44 = vunpack.i.h.bf16 %v6687_v49  ;;  %v6688_v6 = vunpack.i.l.bf16 %v6687_v49 }
 0x3b9   : > { %v6638_v49 = vunpack.i.l.bf16 %v8762_v40 }
 0x3ba   : > { %v4418_v25 = vsel %vm4411_vm15, %v4385_v10, %v6668_v31  ;;  %v4419_v11 = vsel %vm4411_vm15, %v4386_v46, %v6669_v0  ;;  %v6639_v0 = vunpack.i.h.bf16 %v8762_v40  ;;  %v6629_v46 = vunpack.i.h.bf16 %v8776_v51 }
 0x3bb   : > { %v6677_v16 = vpop.permute.xlu1 %6676  ;;  %v6692_v30 = vpop.permute.xlu0 %6691  ;;  %v4451_v15 = vsel %vm4444_vm1, %v4418_v25, %v6673_v35  ;;  %v4452_v3 = vsel %vm4444_vm1, %v4419_v11, %v6674_v26  ;;  %v6628_v35 = vunpack.i.l.bf16 %v8776_v51  ;;  %v6644_v26 = vunpack.i.h.bf16 %v8778_v14 }
 0x3bc   : > { %v6679_v29 = vunpack.i.h.bf16 %v6677_v16  ;;  %v6678_v56 = vunpack.i.l.bf16 %v6677_v16  ;;  %v6694_v34 = vunpack.i.h.bf16 %v6692_v30  ;;  %v6693_v31 = vunpack.i.l.bf16 %v6692_v30 }
 0x3bd   : > { %v4480_v10 = vpack.c.bf16 %v4452_v3, %v4451_v15  ;;  %v6643_v25 = vunpack.i.l.bf16 %v8778_v14  ;;  %v4289_v11 = vsel %vm2214_vm7, %v4257_v60, %v6688_v6  ;;  %v4290_v17 = vsel %vm2214_vm7, %v4258_v18, %v6689_v44  ;;  %v2915_v15 = vld [vmem:[#allocation3 + $0x78] sm:$0xff]  ;;  %v2916_v3 = vld [vmem:[#allocation3 + $0x80] sm:$0xff] }
 0x3be   : > { %v4227_v51 = vsel %vm442_vm0, %v2915_v15, %v6678_v56  ;;  %v4228_v55 = vsel %vm442_vm0, %v2916_v3, %v6679_v29  ;;  %v4321_v14 = vsel %vm2280_vm9, %v4289_v11, %v6693_v31  ;;  %v4322_v60 = vsel %vm2280_vm9, %v4290_v17, %v6694_v34 }
 0x3bf   : > { %5573 = vmatmul.mubr.msk.bf16.gmra.mrb[20].mxu1 %vm4536_vm2, %v4480_v10  ;;  %v6682_v16 = vpop.permute.xlu1 %6681  ;;  %v6697_v30 = vpop.permute.xlu0 %6696  ;;  %v6634_v34 = vunpack.i.h.bf16 %v8788_v28 }
 0x3c0   : > { %v6684_v33 = vunpack.i.h.bf16 %v6682_v16  ;;  %v6683_v40 = vunpack.i.l.bf16 %v6682_v16  ;;  %v6699_v57 = vunpack.i.h.bf16 %v6697_v30  ;;  %v6698_v61 = vunpack.i.l.bf16 %v6697_v30 }
 0x3c2   : > { %v4259_v18 = vsel %vm2148_vm5, %v4227_v51, %v6683_v40  ;;  %v4260_v44 = vsel %vm2148_vm5, %v4228_v55, %v6684_v33  ;;  %v4354_v6 = vsel %vm4345_vm13, %v4321_v14, %v6698_v61  ;;  %v4355_v10 = vsel %vm4345_vm13, %v4322_v60, %v6699_v57 }
 0x3c3   : > { %v4291_v16 = vsel %vm2214_vm7, %v4259_v18, %v6623_v1  ;;  %v4292_v30 = vsel %vm2214_vm7, %v4260_v44, %v6624_v43  ;;  %v4387_v56 = vsel %vm4378_vm14, %v4354_v6, %v6638_v49  ;;  %v4388_v29 = vsel %vm4378_vm14, %v4355_v10, %v6639_v0  ;;  %v8862_v15 = vpop.permute.xlu1 %6701  ;;  %v8864_v31 = vpop.permute.xlu0 %6716 }
 0x3c4   : > { %v6633_v55 = vunpack.i.l.bf16 %v8788_v28  ;;  %v6649_v61 = vunpack.i.h.bf16 %v8790_v12  ;;  %v6648_v57 = vunpack.i.l.bf16 %v8790_v12  ;;  %v4420_v33 = vsel %vm4411_vm15, %v4387_v56, %v6643_v25  ;;  %v6976_v56 = vld [vmem:[#allocation3 + $0x120] sm:$0xff] }
 0x3c5   : > { %v4421_v43 = vsel %vm4411_vm15, %v4388_v29, %v6644_v26  ;;  %v4323_v1 = vsel %vm2280_vm9, %v4291_v16, %v6628_v35  ;;  %v4324_v0 = vsel %vm2280_vm9, %v4292_v30, %v6629_v46  ;;  %v9599_v26 = vunpack.i.l.bf16 %v8736_v20 }
 0x3c6   : > { %v4453_v49 = vsel %vm4444_vm1, %v4420_v33, %v6648_v57  ;;  %v4454_v11 = vsel %vm4444_vm1, %v4421_v43, %v6649_v61  ;;  %v8877_v17 = vsel %vm4345_vm13, %v4323_v1, %v6633_v55  ;;  %v8880_v28 = vsel %vm4345_vm13, %v4324_v0, %v6634_v34  ;;  %v6977_v34 = vld [vmem:[#allocation3 + $0x128] sm:$0xff] }
 0x3c7   : > { %v8882_v3 = vpop.permute.xlu1 %6706  ;;  %v8884_v12 = vpop.permute.xlu0 %6731  ;;  %v4481_v25 = vpack.c.bf16 %v4454_v11, %v4453_v49  ;;  %v4239_v46 = vsel %vm442_vm0, %v8484_v4, %v9599_v26  ;;  %v9600_v35 = vunpack.i.h.bf16 %v8736_v20  ;;  %v6574_v51 = vunpack.i.h.bf16 %v8714_v32 }
 0x3c8   : > { %v6573_v14 = vunpack.i.l.bf16 %v8714_v32  ;;  %v4271_v60 = vsel %vm2148_vm5, %v4239_v46, %v6603_v47  ;;  %v9601_v18 = vunpack.i.h.bf16 %v8744_v50  ;;  %v6544_v6 = vunpack.i.h.bf16 %v8686_v39 }
 0x3c9   : > { %v4240_v40 = vsel %vm442_vm0, %v8478_v27, %v9600_v35  ;;  %5576 = vmatprep.mubr.msk.bf16.mxu1 %vm4536_vm2, %v4481_v25  ;;  %v6543_v4 = vunpack.i.l.bf16 %v8686_v39  ;;  %v6579_v27 = vunpack.i.h.bf16 %v8716_v36  ;;  %v6578_v16 = vunpack.i.l.bf16 %v8716_v36 }
 0x3ca   : > { %v4272_v44 = vsel %vm2148_vm5, %v4240_v40, %v9601_v18  ;;  %v6549_v50 = vunpack.i.h.bf16 %v8699_v2  ;;  %v6548_v30 = vunpack.i.l.bf16 %v8699_v2  ;;  %v4241_v29 = vsel %vm442_vm0, %v6976_v56, %v6573_v14 }
 0x3cb   : > { %v8903_v20 = vpop.permute.xlu1 %6711  ;;  %v6747_v10 = vpop.permute.xlu0 %6746  ;;  %v4303_v32 = vsel %vm2214_vm7, %v4271_v60, %v6543_v4  ;;  %v4304_v47 = vsel %vm2214_vm7, %v4272_v44, %v6544_v6  ;;  %v4242_v39 = vsel %vm442_vm0, %v6977_v34, %v6574_v51  ;;  %v6554_v1 = vunpack.i.h.bf16 %v8708_v58 }
 0x3cc   : > { %v6749_v55 = vunpack.i.h.bf16 %v6747_v10  ;;  %v6748_v61 = vunpack.i.l.bf16 %v6747_v10  ;;  %v4335_v57 = vsel %vm2280_vm9, %v4303_v32, %v6548_v30  ;;  %v4336_v36 = vsel %vm2280_vm9, %v4304_v47, %v6549_v50 }
 0x3cd   : > { %v6553_v0 = vunpack.i.l.bf16 %v8708_v58  ;;  %v4274_v2 = vsel %vm2148_vm5, %v4242_v39, %v6579_v27  ;;  %v4273_v49 = vsel %vm2148_vm5, %v4241_v29, %v6578_v16  ;;  %v6719_v35 = vunpack.i.h.bf16 %v8864_v31 }
 0x3ce   : > { %v6718_v40 = vunpack.i.l.bf16 %v8864_v31  ;;  %v4369_v14 = vsel %vm4345_vm13, %v4336_v36, %v6554_v1  ;;  %v6734_v60 = vunpack.i.h.bf16 %v8884_v12  ;;  %v6733_v58 = vunpack.i.l.bf16 %v8884_v12 }
 0x3cf   : > { %v6722_v33 = vpop.permute.xlu1 %6721  ;;  %v6752_v43 = vpop.permute.xlu0 %6751  ;;  %v4368_v51 = vsel %vm4345_vm13, %v4335_v57, %v6553_v0  ;;  %v4305_v18 = vsel %vm2214_vm7, %v4273_v49, %v6748_v61  ;;  %v4306_v44 = vsel %vm2214_vm7, %v4274_v2, %v6749_v55  ;;  %v6439_v2 = vunpack.i.h.bf16 %v8579_v8 }
 0x3d0   : > { %v6724_v11 = vunpack.i.h.bf16 %v6722_v33  ;;  %v6723_v25 = vunpack.i.l.bf16 %v6722_v33  ;;  %v6754_v26 = vunpack.i.h.bf16 %v6752_v43  ;;  %v6753_v46 = vunpack.i.l.bf16 %v6752_v43 }
 0x3d2   : > { %v4402_v31 = vsel %vm4378_vm14, %v4369_v14, %v6724_v11  ;;  %v4401_v47 = vsel %vm4378_vm14, %v4368_v51, %v6723_v25  ;;  %v4337_v50 = vsel %vm2280_vm9, %v4305_v18, %v6753_v46  ;;  %v4338_v30 = vsel %vm2280_vm9, %v4306_v44, %v6754_v26  ;;  %v2931_v46 = vld [vmem:[#allocation3 + $0x138] sm:$0xff] }
 0x3d3   : > { %v6727_v6 = vpop.permute.xlu1 %6726  ;;  %v6757_v4 = vpop.permute.xlu0 %6756  ;;  %v6438_v25 = vunpack.i.l.bf16 %v8579_v8  ;;  %v6444_v26 = vunpack.i.h.bf16 %v8585_v54  ;;  %v6704_v14 = vunpack.i.h.bf16 %v8862_v15  ;;  %v6443_v44 = vunpack.i.l.bf16 %v8585_v54 }
 0x3d4   : > { %v6729_v10 = vunpack.i.h.bf16 %v6727_v6  ;;  %v6728_v27 = vunpack.i.l.bf16 %v6727_v6  ;;  %v6759_v16 = vunpack.i.h.bf16 %v6757_v4  ;;  %v6758_v32 = vunpack.i.l.bf16 %v6757_v4 }
 0x3d5   : > { %v6709_v4 = vunpack.i.h.bf16 %v8882_v3  ;;  %v6714_v54 = vunpack.i.h.bf16 %v8903_v20 }
 0x3d6   : > { %v4434_v12 = vsel %vm4411_vm15, %v4401_v47, %v6728_v27  ;;  %v4435_v56 = vsel %vm4411_vm15, %v4402_v31, %v6729_v10  ;;  %v4370_v29 = vsel %vm4345_vm13, %v4337_v50, %v6758_v32  ;;  %v4371_v34 = vsel %vm4345_vm13, %v4338_v30, %v6759_v16  ;;  %v6978_v31 = vld [vmem:[#allocation3 + $0xe0] sm:$0xff]  ;;  %v6979_v30 = vld [vmem:[#allocation3 + $0xd8] sm:$0xff] }
 0x3d7   : > { %v6737_v39 = vpop.permute.xlu1 %6736  ;;  %v8935_v55 = vpop.permute.xlu0 %6776  ;;  %v8938_v61 = vsel %vm4378_vm14, %v4370_v29, %v6718_v40  ;;  %v8941_v57 = vsel %vm4378_vm14, %v4371_v34, %v6719_v35  ;;  %v8944_v36 = vsel %vm4444_vm1, %v4434_v12, %v6733_v58  ;;  %v8947_v33 = vsel %vm4444_vm1, %v4435_v56, %v6734_v60  ;;  %v2932_v35 = vld [vmem:[#allocation3 + $0x140] sm:$0xff] }
 0x3d8   : > { %v6739_v43 = vunpack.i.h.bf16 %v6737_v39  ;;  %v6738_v1 = vunpack.i.l.bf16 %v6737_v39  ;;  %v6703_v60 = vunpack.i.l.bf16 %v8862_v15  ;;  %v6708_v10 = vunpack.i.l.bf16 %v8882_v3 }
 0x3d9   : > { %v4236_v47 = vsel %vm442_vm0, %v6978_v31, %v6439_v2  ;;  %v6713_v50 = vunpack.i.l.bf16 %v8903_v20  ;;  %v4235_v12 = vsel %vm442_vm0, %v6979_v30, %v6438_v25  ;;  %v6384_v34 = vunpack.i.h.bf16 %v8537_v38 }
 0x3da   : > { %v4243_v58 = vsel %vm442_vm0, %v2931_v46, %v6738_v1  ;;  %v4244_v18 = vsel %vm442_vm0, %v2932_v35, %v6739_v43  ;;  %v4268_v3 = vsel %vm2148_vm5, %v4236_v47, %v6444_v26  ;;  %v4267_v39 = vsel %vm2148_vm5, %v4235_v12, %v6443_v44 }
 0x3db   : > { %v6742_v49 = vpop.permute.xlu1 %6741  ;;  %v8952_v11 = vpop.permute.xlu0 %6781  ;;  %v6383_v20 = vunpack.i.l.bf16 %v8537_v38  ;;  %v6399_v25 = vunpack.i.h.bf16 %v8539_v23  ;;  %v6398_v26 = vunpack.i.l.bf16 %v8539_v23  ;;  %v4300_v46 = vsel %vm2214_vm7, %v4268_v3, %v6384_v34 }
 0x3dc   : > { %v6744_v40 = vunpack.i.h.bf16 %v6742_v49  ;;  %v6743_v51 = vunpack.i.l.bf16 %v6742_v49  ;;  %v6389_v35 = vunpack.i.h.bf16 %v8543_v5  ;;  %v6394_v38 = vunpack.i.h.bf16 %v8549_v13 }
 0x3dd   : > { %v6448_v30 = vunpack.i.l.bf16 %v8572_v9  ;;  %v6454_v12 = vunpack.i.h.bf16 %v8581_v22  ;;  %v6453_v3 = vunpack.i.l.bf16 %v8581_v22  ;;  %v6458_v34 = vunpack.i.l.bf16 %v8587_v59 }
 0x3de   : > { %v4275_v6 = vsel %vm2148_vm5, %v4243_v58, %v6743_v51  ;;  %v4276_v8 = vsel %vm2148_vm5, %v4244_v18, %v6744_v40  ;;  %v6388_v40 = vunpack.i.l.bf16 %v8543_v5  ;;  %v6393_v58 = vunpack.i.l.bf16 %v8549_v13  ;;  %v2922_v13 = vld [vmem:[#allocation3 + $0xc8] sm:$0xff] }
 0x3df   : > { %v4307_v27 = vsel %vm2214_vm7, %v4275_v6, %v6703_v60  ;;  %v4308_v16 = vsel %vm2214_vm7, %v4276_v8, %v6704_v14  ;;  %v8967_v32 = vpop.permute.xlu1 %6761  ;;  %v8969_v15 = vpop.permute.xlu0 %6786  ;;  %v4299_v14 = vsel %vm2214_vm7, %v4267_v39, %v6383_v20  ;;  %v6403_v60 = vunpack.i.l.bf16 %v8545_v37 }
 0x3e0   : > { %v4339_v56 = vsel %vm2280_vm9, %v4307_v27, %v6708_v10  ;;  %v4340_v29 = vsel %vm2280_vm9, %v4308_v16, %v6709_v4  ;;  %v4332_v8 = vsel %vm2280_vm9, %v4300_v46, %v6389_v35  ;;  %v6584_v5 = vunpack.i.h.bf16 %v8721_v24 }
 0x3e1   : > { %v8981_v43 = vsel %vm4345_vm13, %v4339_v56, %v6713_v50  ;;  %v8984_v1 = vsel %vm4345_vm13, %v4340_v29, %v6714_v54  ;;  %v4331_v31 = vsel %vm2280_vm9, %v4299_v14, %v6388_v40  ;;  %v6449_v50 = vunpack.i.h.bf16 %v8572_v9 }
 0x3e2   : > { %v6459_v56 = vunpack.i.h.bf16 %v8587_v59  ;;  %v4365_v29 = vsel %vm4345_vm13, %v4332_v8, %v6394_v38  ;;  %v9022_v39 = vsel %vm4345_vm13, %v4331_v31, %v6393_v58  ;;  %v6779_v22 = vunpack.i.h.bf16 %v8935_v55  ;;  %v2921_v31 = vld [vmem:[#allocation3 + $0xc0] sm:$0xff] }
 0x3e3   : > { %v8987_v2 = vpop.permute.xlu1 %6766  ;;  %v6797_v49 = vpop.permute.xlu0 %6796  ;;  %v9025_v20 = vsel %vm4378_vm14, %v4365_v29, %v6584_v5  ;;  %v6778_v38 = vunpack.i.l.bf16 %v8935_v55  ;;  %v6784_v8 = vunpack.i.h.bf16 %v8952_v11  ;;  %v6783_v5 = vunpack.i.l.bf16 %v8952_v11 }
 0x3e4   : > { %v6799_v16 = vunpack.i.h.bf16 %v6797_v49  ;;  %v6798_v58 = vunpack.i.l.bf16 %v6797_v49  ;;  %v6763_v49 = vunpack.i.l.bf16 %v8967_v32  ;;  %v6789_v51 = vunpack.i.h.bf16 %v8969_v15 }
 0x3e7   : > { %v9004_v4 = vpop.permute.xlu1 %6771  ;;  %v9006_v10 = vpop.permute.xlu0 %6811 }
 0x3e8   : > { %v6773_v59 = vunpack.i.l.bf16 %v9004_v4 }
 0x3eb   : > { %v6792_v35 = vpop.permute.xlu1 %6791  ;;  %v6827_v9 = vpop.permute.xlu0 %6826 }
 0x3ec   : > { %v6794_v14 = vunpack.i.h.bf16 %v6792_v35  ;;  %v6793_v0 = vunpack.i.l.bf16 %v6792_v35  ;;  %v6829_v47 = vunpack.i.h.bf16 %v6827_v9  ;;  %v6828_v55 = vunpack.i.l.bf16 %v6827_v9 }
 0x3ed   : > { %v6813_v9 = vunpack.i.l.bf16 %v9006_v10 }
 0x3ee   : > { %v4233_v46 = vsel %vm442_vm0, %v2921_v31, %v6793_v0  ;;  %v4234_v40 = vsel %vm442_vm0, %v2922_v13, %v6794_v14 }
 0x3ef   : > { %v4265_v18 = vsel %vm2148_vm5, %v4233_v46, %v6798_v58  ;;  %v4266_v35 = vsel %vm2148_vm5, %v4234_v40, %v6799_v16  ;;  %v6802_v54 = vpop.permute.xlu1 %6801  ;;  %v6832_v44 = vpop.permute.xlu0 %6831  ;;  %v6788_v46 = vunpack.i.l.bf16 %v8969_v15  ;;  %v6814_v16 = vunpack.i.h.bf16 %v9006_v10 }
 0x3f0   : > { %v4297_v6 = vsel %vm2214_vm7, %v4265_v18, %v6448_v30  ;;  %v4298_v11 = vsel %vm2214_vm7, %v4266_v35, %v6449_v50  ;;  %v6804_v27 = vunpack.i.h.bf16 %v6802_v54  ;;  %v6803_v0 = vunpack.i.l.bf16 %v6802_v54 }
 0x3f1   : > { %v6834_v31 = vunpack.i.h.bf16 %v6832_v44  ;;  %v6833_v13 = vunpack.i.l.bf16 %v6832_v44  ;;  %v4329_v40 = vsel %vm2280_vm9, %v4297_v6, %v6453_v3  ;;  %v4330_v14 = vsel %vm2280_vm9, %v4298_v11, %v6454_v12 }
 0x3f2   : > { %v4293_v18 = vsel %vm2214_vm7, %v8816_v45, %v6828_v55  ;;  %v4294_v50 = vsel %vm2214_vm7, %v8813_v41, %v6829_v47  ;;  %v4390_v54 = vsel %vm4378_vm14, %v8880_v28, %v6804_v27  ;;  %v4389_v6 = vsel %vm4378_vm14, %v8877_v17, %v6803_v0 }
 0x3f3   : > { %v6807_v44 = vpop.permute.xlu1 %6806  ;;  %v6837_v30 = vpop.permute.xlu0 %6836  ;;  %v4325_v10 = vsel %vm2280_vm9, %v4293_v18, %v6833_v13  ;;  %v4326_v12 = vsel %vm2280_vm9, %v4294_v50, %v6834_v31  ;;  %v4362_v45 = vsel %vm4345_vm13, %v4329_v40, %v6458_v34  ;;  %v6769_v34 = vunpack.i.h.bf16 %v8987_v2 }
 0x3f4   : > { %v6809_v15 = vunpack.i.h.bf16 %v6807_v44  ;;  %v6808_v58 = vunpack.i.l.bf16 %v6807_v44  ;;  %v6839_v35 = vunpack.i.h.bf16 %v6837_v30  ;;  %v6838_v29 = vunpack.i.l.bf16 %v6837_v30 }
 0x3f5   : > { %v4363_v40 = vsel %vm4345_vm13, %v4330_v14, %v6459_v56 }
 0x3f6   : > { %v4422_v41 = vsel %vm4411_vm15, %v4389_v6, %v6808_v58  ;;  %v4423_v47 = vsel %vm4411_vm15, %v4390_v54, %v6809_v15  ;;  %v4358_v28 = vsel %vm4345_vm13, %v4325_v10, %v6838_v29  ;;  %v4359_v27 = vsel %vm4345_vm13, %v4326_v12, %v6839_v35 }
 0x3f7   : > { %v4391_v3 = vsel %vm4378_vm14, %v4358_v28, %v6778_v38  ;;  %v4392_v55 = vsel %vm4378_vm14, %v4359_v27, %v6779_v22  ;;  %v6817_v11 = vpop.permute.xlu1 %6816  ;;  %v6842_v17 = vpop.permute.xlu0 %6841  ;;  %v4455_v0 = vsel %vm4444_vm1, %v4422_v41, %v6813_v9  ;;  %v4456_v31 = vsel %vm4444_vm1, %v4423_v47, %v6814_v16 }
 0x3f8   : > { %v6819_v13 = vunpack.i.h.bf16 %v6817_v11  ;;  %v4395_v29 = vsel %vm4378_vm14, %v4362_v45, %v6398_v26  ;;  %v6818_v38 = vunpack.i.l.bf16 %v6817_v11  ;;  %v4482_v18 = vpack.c.bf16 %v4456_v31, %v4455_v0 }
 0x3f9   : > { %v4424_v22 = vsel %vm4411_vm15, %v4391_v3, %v6783_v5  ;;  %v4425_v50 = vsel %vm4411_vm15, %v4392_v55, %v6784_v8  ;;  %v6768_v9 = vunpack.i.l.bf16 %v8987_v2  ;;  %v6774_v16 = vunpack.i.h.bf16 %v9004_v4 }
 0x3fa   : > { %v6844_v54 = vunpack.i.h.bf16 %v6842_v17  ;;  %v6843_v44 = vunpack.i.l.bf16 %v6842_v17  ;;  %5577 = vmatmul.mubr.msk.bf16.gmra.mrb[24].mxu1 %vm4536_vm2, %v4482_v18  ;;  %v4457_v14 = vsel %vm4444_vm1, %v4424_v22, %v6788_v46  ;;  %v4458_v26 = vsel %vm4444_vm1, %v4425_v50, %v6789_v51 }
 0x3fb   : > { %v6822_v56 = vpop.permute.xlu1 %6821  ;;  %v4396_v5 = vsel %vm4378_vm14, %v4363_v40, %v6399_v25  ;;  %v6857_v2 = vpop.permute.xlu0 %6856  ;;  %v4483_v15 = vpack.c.bf16 %v4458_v26, %v4457_v14  ;;  %v4428_v58 = vsel %vm4411_vm15, %v4395_v29, %v6403_v60  ;;  %v4231_v4 = vsel %vm442_vm0, %v8642_v53, %v6818_v38 }
 0x3fc   : > { %v6824_v8 = vunpack.i.h.bf16 %v6822_v56  ;;  %v6823_v30 = vunpack.i.l.bf16 %v6822_v56  ;;  %v4232_v46 = vsel %vm442_vm0, %v8633_v7, %v6819_v13  ;;  %v6859_v35 = vunpack.i.h.bf16 %v6857_v2 }
 0x3fd   : > { %v6858_v51 = vunpack.i.l.bf16 %v6857_v2  ;;  %v4436_v23 = vsel %vm4411_vm15, %v8938_v61, %v6843_v44  ;;  %v4437_v25 = vsel %vm4411_vm15, %v8941_v57, %v6844_v54  ;;  %5580 = vmatprep.mubr.msk.bf16.mxu1 %vm4536_vm2, %v4483_v15  ;;  %v9602_v7 = vunpack.i.h.bf16 %v8967_v32 }
 0x3fe   : > { %v4263_v6 = vsel %vm2148_vm5, %v4231_v4, %v6823_v30  ;;  %v4264_v10 = vsel %vm2148_vm5, %v4232_v46, %v6824_v8  ;;  %v9108_v61 = vsel %vm4444_vm1, %v4437_v25, %v6859_v35  ;;  %v6588_v17 = vunpack.i.l.bf16 %v8728_v48 }
 0x3ff   : > { %v4295_v53 = vsel %vm2214_vm7, %v4263_v6, %v6763_v49  ;;  %v4296_v60 = vsel %vm2214_vm7, %v4264_v10, %v9602_v7  ;;  %v9105_v12 = vsel %vm4444_vm1, %v4436_v23, %v6858_v51  ;;  %v6847_v57 = vpop.permute.xlu1 %6846  ;;  %v6867_v28 = vpop.permute.xlu0 %6866  ;;  %v9603_v49 = vunpack.i.h.bf16 %v8545_v37 }
 0x400   : > { %v4327_v45 = vsel %vm2280_vm9, %v4295_v53, %v6768_v9  ;;  %v4328_v41 = vsel %vm2280_vm9, %v4296_v60, %v6769_v34  ;;  %v4489_v47 = vpack.c.bf16 %v9108_v61, %v9105_v12  ;;  %v6849_v55 = vunpack.i.h.bf16 %v6847_v57 }
 0x401   : > { %v4429_v32 = vsel %vm4411_vm15, %v4396_v5, %v9603_v49  ;;  %v4360_v27 = vsel %vm4345_vm13, %v4327_v45, %v6773_v59  ;;  %v4361_v3 = vsel %vm4345_vm13, %v4328_v41, %v6774_v16  ;;  %v6848_v11 = vunpack.i.l.bf16 %v6847_v57  ;;  %v2933_v49 = vld [vmem:[#allocation3 + $0x150] sm:$0xff] }
 0x402   : > { %v9604_v0 = vunpack.i.l.bf16 %v8561_v21  ;;  %v9605_v34 = vunpack.i.h.bf16 %v8561_v21  ;;  %v9606_v37 = vunpack.i.l.bf16 %v8551_v19  ;;  %v6869_v29 = vunpack.i.h.bf16 %v6867_v28 }
 0x403   : > { %v6852_v38 = vpop.permute.xlu1 %6851  ;;  %v9607_v18 = vunpack.i.l.bf16 %v8570_v63  ;;  %v9608_v50 = vunpack.i.h.bf16 %v8570_v63  ;;  %v9609_v16 = vunpack.i.h.bf16 %v8551_v19  ;;  %v6877_v59 = vpop.permute.xlu0 %6876  ;;  %v9610_v56 = vunpack.i.l.bf16 %v8563_v52 }
 0x404   : > { %v4393_v31 = vsel %vm4378_vm14, %v4360_v27, %v9604_v0  ;;  %v4394_v13 = vsel %vm4378_vm14, %v4361_v3, %v9605_v34  ;;  %v4461_v40 = vsel %vm4444_vm1, %v4428_v58, %v9606_v37  ;;  %v6854_v54 = vunpack.i.h.bf16 %v6852_v38 }
 0x405   : > { %v4426_v22 = vsel %vm4411_vm15, %v4393_v31, %v9607_v18  ;;  %v4427_v9 = vsel %vm4411_vm15, %v4394_v13, %v9608_v50  ;;  %v4462_v21 = vsel %vm4444_vm1, %v4429_v32, %v9609_v16  ;;  %v6853_v44 = vunpack.i.l.bf16 %v6852_v38  ;;  %v2934_v32 = vld [vmem:[#allocation3 + $0x158] sm:$0xff] }
 0x406   : > { %v4459_v14 = vsel %vm4444_vm1, %v4426_v22, %v9610_v56  ;;  %v9611_v26 = vunpack.i.h.bf16 %v8563_v52  ;;  %v4406_v63 = vsel %vm4378_vm14, %v8984_v1, %v6849_v55  ;;  %v4405_v8 = vsel %vm4378_vm14, %v8981_v43, %v6848_v11 }
 0x407   : > { %v6868_v19 = vunpack.i.l.bf16 %v6867_v28  ;;  %v9612_v2 = vunpack.i.l.bf16 %v8721_v24  ;;  %v4438_v58 = vsel %vm4411_vm15, %v4405_v8, %v6853_v44  ;;  %v4439_v4 = vsel %vm4411_vm15, %v4406_v63, %v6854_v54  ;;  %v6862_v43 = vpop.permute.xlu1 %6861  ;;  %v6887_v25 = vpop.permute.xlu0 %6886 }
 0x408   : > { %v4460_v5 = vsel %vm4444_vm1, %v4427_v9, %v9611_v26  ;;  %v4485_v52 = vpack.c.bf16 %v4462_v21, %v4461_v40  ;;  %v9613_v35 = vunpack.i.h.bf16 %v8728_v48  ;;  %v4472_v51 = vsel %vm4444_vm1, %v4439_v4, %v6869_v29 }
 0x409   : > { %v4484_v30 = vpack.c.bf16 %v4460_v5, %v4459_v14  ;;  %v4397_v15 = vsel %vm4378_vm14, %v9022_v39, %v9612_v2  ;;  %v4471_v24 = vsel %vm4444_vm1, %v4438_v58, %v6868_v19  ;;  %v6594_v39 = vunpack.i.h.bf16 %v8723_v62 }
 0x40a   : > { %v4430_v46 = vsel %vm4411_vm15, %v4397_v15, %v6588_v17  ;;  %v4431_v1 = vsel %vm4411_vm15, %v9025_v20, %v9613_v35  ;;  %v6593_v23 = vunpack.i.l.bf16 %v8723_v62  ;;  %v4490_v6 = vpack.c.bf16 %v4472_v51, %v4471_v24  ;;  %v9614_v62 = vld [vmem:[#allocation14_spill] sm:$0xff] }
 0x40b   : > { %5581 = vmatmul.mubr.msk.bf16.gmra.mrb[28].mxu1 %vm4536_vm2, %v4484_v30  ;;  %v4464_v10 = vsel %vm4444_vm1, %v4431_v1, %v6594_v39  ;;  %v9167_v20 = vpop.permute.xlu1 %6871  ;;  %v6897_v53 = vpop.permute.xlu0 %6896  ;;  %v6864_v60 = vunpack.i.h.bf16 %v6862_v43  ;;  %v6863_v57 = vunpack.i.l.bf16 %v6862_v43  ;;  %v9615_v28 = vpack.c.bf16 %v8774_v42, %v9614_v62  ;;  %v6980_v39 = vld [vmem:[#allocation3 + $0x168] sm:$0xff] }
 0x40c   : > { %5584 = vmatprep.mubr.msk.bf16.mxu1 %vm4536_vm2, %v4485_v52  ;;  %v4463_v48 = vsel %vm4444_vm1, %v4430_v46, %v6593_v23  ;;  %v6879_v55 = vunpack.i.h.bf16 %v6877_v59  ;;  %v6878_v11 = vunpack.i.l.bf16 %v6877_v59  ;;  %v6889_v13 = vunpack.i.h.bf16 %v6887_v25 }
 0x40d   : > { %v4486_v7 = vpack.c.bf16 %v4464_v10, %v4463_v48  ;;  %v4246_v27 = vsel %vm442_vm0, %v2934_v32, %v6864_v60  ;;  %v4245_v3 = vsel %vm442_vm0, %v2933_v49, %v6863_v57  ;;  %v6888_v37 = vunpack.i.l.bf16 %v6887_v25  ;;  %v6981_v25 = vld [vmem:[#allocation3 + $0x170] sm:$0xff] }
 0x40e   : > { %v4277_v31 = vsel %vm2148_vm5, %v4245_v3, %v6878_v11  ;;  %v4278_v34 = vsel %vm2148_vm5, %v4246_v27, %v6879_v55  ;;  %v6899_v40 = vunpack.i.h.bf16 %v6897_v53  ;;  %v6898_v42 = vunpack.i.l.bf16 %v6897_v53 }
 0x40f   : > { %v9169_v45 = vpop.permute.xlu1 %6881  ;;  %v6907_v41 = vpop.permute.xlu0 %6906  ;;  %v9616_v38 = vpack.c.bf16 %v8947_v33, %v8944_v36  ;;  %v4309_v18 = vsel %vm2214_vm7, %v4277_v31, %v6888_v37  ;;  %v4310_v22 = vsel %vm2214_vm7, %v4278_v34, %v6889_v13  ;;  %v6874_v30 = vunpack.i.h.bf16 %v9167_v20 }
 0x410   : > { %v6909_v50 = vunpack.i.h.bf16 %v6907_v41  ;;  %v6908_v9 = vunpack.i.l.bf16 %v6907_v41  ;;  %v4341_v36 = vsel %vm2280_vm9, %v4309_v18, %v6898_v42  ;;  %v4342_v33 = vsel %vm2280_vm9, %v4310_v22, %v6899_v40 }
 0x411   : > { %v6873_v2 = vunpack.i.l.bf16 %v9167_v20  ;;  %v6884_v52 = vunpack.i.h.bf16 %v9169_v45  ;;  %v6883_v46 = vunpack.i.l.bf16 %v9169_v45  ;;  %v4248_v48 = vsel %vm442_vm0, %v6981_v25, %v6874_v30  ;;  %v9253_v30 = vld [vmem:[%s9537_s9] ss:$0 sm:$0xff] }
 0x412   : > { %v4374_v14 = vsel %vm4345_vm13, %v4341_v36, %v6908_v9  ;;  %v4375_v26 = vsel %vm4345_vm13, %v4342_v33, %v6909_v50 }
 0x413   : > { %5585 = vmatmul.mubr.msk.bf16.gmra.mrb[32].mxu1 %vm4536_vm2, %v4486_v7  ;;  %v6892_v17 = vpop.permute.xlu1 %6891  ;;  %v6917_v0 = vpop.permute.xlu0 %6916  ;;  %v4247_v23 = vsel %vm442_vm0, %v6980_v39, %v6873_v2  ;;  %v4280_v7 = vsel %vm2148_vm5, %v4248_v48, %v6884_v52  ;;  %vm5131_vm0 = vcmask 1045504  }
 0x414   : > { %5588 = vmatprep.mubr.msk.bf16.mxu1 %vm4536_vm2, %v9615_v28  ;;  %v6919_v21 = vunpack.i.h.bf16 %v6917_v0  ;;  %v6918_v54 = vunpack.i.l.bf16 %v6917_v0  ;;  %v6894_v1 = vunpack.i.h.bf16 %v6892_v17  ;;  %v6893_v43 = vunpack.i.l.bf16 %v6892_v17 }
 0x415   : > { %v4279_v53 = vsel %vm2148_vm5, %v4247_v23, %v6883_v46  ;;  %vm5296_vm5 = vcmask 48128  }
 0x416   : > { %v4407_v63 = vsel %vm4378_vm14, %v4374_v14, %v6918_v54  ;;  %v4408_v12 = vsel %vm4378_vm14, %v4375_v26, %v6919_v21  ;;  %v4311_v45 = vsel %vm2214_vm7, %v4279_v53, %v6893_v43  ;;  %v4312_v41 = vsel %vm2214_vm7, %v4280_v7, %v6894_v1 }
 0x417   : > { %v6902_v29 = vpop.permute.xlu1 %6901  ;;  %v6927_v16 = vpop.permute.xlu0 %6926 }
 0x418   : > { %v6929_v44 = vunpack.i.h.bf16 %v6927_v16  ;;  %v6928_v59 = vunpack.i.l.bf16 %v6927_v16  ;;  %v6904_v24 = vunpack.i.h.bf16 %v6902_v29  ;;  %v6903_v51 = vunpack.i.l.bf16 %v6902_v29  ;;  %v9226_v29 = vld [vmem:[%s9536_s8] ss:$0 sm:$0xff] }
 0x41a   : > { %v4440_v8 = vsel %vm4411_vm15, %v4407_v63, %v6928_v59  ;;  %v4441_v19 = vsel %vm4411_vm15, %v4408_v12, %v6929_v44  ;;  %v4343_v49 = vsel %vm2280_vm9, %v4311_v45, %v6903_v51  ;;  %v4344_v32 = vsel %vm2280_vm9, %v4312_v41, %v6904_v24  ;;  %v6953_v44 = vld [vmem:[%s9539_s11] sm:$0x3f]  }
 0x41b   : > { %5589 = vmatmul.mubr.msk.bf16.gmra.mrb[36].mxu1 %vm4536_vm2, %v9616_v38  ;;  %v6912_v56 = vpop.permute.xlu1 %6911  ;;  %v6937_v5 = vpop.permute.xlu0 %6936  ;;  %5643 = vmatprep.subr.msk.bf16.mxu0 %vm5131_vm0, %v6953_v44  ;;  %v5133_v59 = vsel %vm5131_vm0, %v6953_v44, 0 }
 0x41c   : > { %5592 = vmatprep.mubr.msk.bf16.mxu1 %vm4536_vm2, %v4489_v47  ;;  %v6939_v61 = vunpack.i.h.bf16 %v6937_v5  ;;  %v6938_v47 = vunpack.i.l.bf16 %v6937_v5  ;;  %v6914_v10 = vunpack.i.h.bf16 %v6912_v56  ;;  %v6913_v20 = vunpack.i.l.bf16 %v6912_v56  ;;  %5601 = vmatpush3.bf16.msra.mxu0 %v5133_v59 }
 0x41e   : > { %v4473_v15 = vsel %vm4444_vm1, %v4440_v8, %v6938_v47  ;;  %v4474_v58 = vsel %vm4444_vm1, %v4441_v19, %v6939_v61  ;;  %v4376_v27 = vsel %vm4345_vm13, %v4343_v49, %v6913_v20  ;;  %v4377_v3 = vsel %vm4345_vm13, %v4344_v32, %v6914_v10 }
 0x41f   : > { %v6922_v4 = vpop.permute.xlu1 %6921  ;;  %v4491_v35 = vpack.c.bf16 %v4474_v58, %v4473_v15 }
 0x420   : > { %v6924_v60 = vunpack.i.h.bf16 %v6922_v4  ;;  %v6923_v57 = vunpack.i.l.bf16 %v6922_v4  ;;  %v9259_v4 = vld [vmem:[%s9538_s10] ss:$0 sm:$0xff] }
 0x422   : > { %v4409_v11 = vsel %vm4378_vm14, %v4376_v27, %v6923_v57  ;;  %v4410_v17 = vsel %vm4378_vm14, %v4377_v3, %v6924_v60 }
 0x423   : > { %5593 = vmatmul.mubr.msk.bf16.gmra.mrb[40].mxu1 %vm4536_vm2, %v4490_v6  ;;  %v6932_v6 = vpop.permute.xlu1 %6931 }
 0x424   : > { %5596 = vmatprep.mubr.msk.bf16.mxu1 %vm4536_vm2, %v4491_v35  ;;  %v6934_v62 = vunpack.i.h.bf16 %v6932_v6  ;;  %v6933_v28 = vunpack.i.l.bf16 %v6932_v6 }
 0x426   : > { %v4442_v34 = vsel %vm4411_vm15, %v4409_v11, %v6933_v28  ;;  %v4443_v13 = vsel %vm4411_vm15, %v4410_v17, %v6934_v62 }
 0x427   : > { %v6942_v55 = vpop.permute.xlu1 %6941 }
 0x428   : > { %v6944_v0 = vunpack.i.h.bf16 %v6942_v55  ;;  %v6943_v31 = vunpack.i.l.bf16 %v6942_v55 }
 0x42a   : > { %v4475_v37 = vsel %vm4444_vm1, %v4442_v34, %v6943_v31  ;;  %v4476_v40 = vsel %vm4444_vm1, %v4443_v13, %v6944_v0 }
 0x42b   : > { %v4492_v42 = vpack.c.bf16 %v4476_v40, %v4475_v37 }
 0x42d   : > { %5597 = vmatmul.mubr.msk.bf16.gmra.mrb[44].mxu1 %vm4536_vm2, %v4492_v42 }
 0x451   : > { %v5570_v38 = vpop.f32.mrb[16].mxu1 }
 0x452   : > { %v4623_v18 = vpop.f32.mrb[17].mxu1  ;;  %v4632_v21 = vadd.f32 %v5570_v38, %v9226_v29 }
 0x453   : > { %v4624_v22 = vadd.f32 %v9226_v29, %v4623_v18  ;;  %v5571_v50 = vpop.f32.mrb[18].mxu1 }
 0x454   : > { %v4626_v9 = vpop.f32.mrb[19].mxu1  ;;  %v4635_v54 = vadd.f32 %v5571_v50, %v9226_v29 }
 0x455   : > { %v4627_v16 = vadd.f32 %v9226_v29, %v4626_v9  ;;  %4782 = vrot.lane.b32.xlu0 %v4624_v22, %s6992_s20 }
 0x457   : > { %4784 = vrot.lane.b32.xlu1 %v4627_v16, %s6992_s20 }
 0x459   : > { %4786 = vrot.lane.b32.xlu0 %v4632_v21, %s6992_s20 }
 0x45b   : > { %4788 = vrot.lane.b32.xlu1 %v4635_v54, %s6992_s20 }
 0x492   : > { %v5574_v36 = vpop.f32.mrb[20].mxu1 }
 0x493   : > { %v4639_v33 = vpop.f32.mrb[21].mxu1  ;;  %v4648_v63 = vadd.f32 %v5574_v36, %v9226_v29 }
 0x494   : > { %v4640_v56 = vadd.f32 %v9226_v29, %v4639_v33  ;;  %v5575_v14 = vpop.f32.mrb[22].mxu1 }
 0x495   : > { %v4642_v26 = vpop.f32.mrb[23].mxu1  ;;  %v4651_v12 = vadd.f32 %v5575_v14, %v9226_v29 }
 0x496   : > { %v4643_v5 = vadd.f32 %v9226_v29, %v4642_v26  ;;  %4790 = vrot.lane.b32.xlu0 %v4640_v56, %s6992_s20 }
 0x498   : > { %4792 = vrot.lane.b32.xlu1 %v4643_v5, %s6992_s20 }
 0x49a   : > { %4794 = vrot.lane.b32.xlu0 %v4648_v63, %s6992_s20 }
 0x49c   : > { %4796 = vrot.lane.b32.xlu1 %v4651_v12, %s6992_s20 }
 0x4c7   : > { %v4783_v61 = vpop.permute.xlu0 %4782 }
 0x4c8   : > { %4879 = vst.msk [vmem:[#allocation2] sm:$0xff] %vm4878_vm3, %v4783_v61 }
 0x4c9   : > { %v4785_v47 = vpop.permute.xlu1 %4784 }
 0x4ca   : > { %4880 = vst.msk [vmem:[#allocation2 + $0x8] sm:$0xff] %vm4878_vm3, %v4785_v47 }
 0x4cb   : > { %v4787_v8 = vpop.permute.xlu0 %4786 }
 0x4cc   : > { %4881 = vst.msk [vmem:[#allocation2 + $0x10] sm:$0xff] %vm4878_vm3, %v4787_v8 }
 0x4cd   : > { %v4789_v19 = vpop.permute.xlu1 %4788  ;;  %v5578_v2 = vpop.f32.mrb[24].mxu1 }
 0x4ce   : > { %4882 = vst.msk [vmem:[#allocation2 + $0x18] sm:$0xff] %vm4878_vm3, %v4789_v19  ;;  %v4655_v15 = vpop.f32.mrb[25].mxu1  ;;  %v4664_v25 = vadd.f32 %v5578_v2, %v9226_v29 }
 0x4cf   : > { %v4911_v58 = vld [vmem:[#allocation2] sm:$0xff]  ;;  %v4656_v52 = vadd.f32 %v9226_v29, %v4655_v15  ;;  %v5579_v46 = vpop.f32.mrb[26].mxu1 }
 0x4d0   : > { %v4950_v35 = vmul.f32 %v9253_v30, %v4911_v58  ;;  %v4658_v1 = vpop.f32.mrb[27].mxu1  ;;  %v4667_v20 = vadd.f32 %v5579_v46, %v9226_v29 }
 0x4d1   : > { %v4912_v43 = vld [vmem:[#allocation2 + $0x8] sm:$0xff]  ;;  %v4659_v24 = vadd.f32 %v9226_v29, %v4658_v1  ;;  %4798 = vrot.lane.b32.xlu0 %v4656_v52, %s6992_s20 }
 0x4d2   : > { %v4951_v51 = vmul.f32 %v9253_v30, %v4912_v43  ;;  %v4989_v39 = vadd.f32 %v9259_v4, %v4950_v35 }
 0x4d3   : > { %v4913_v23 = vld [vmem:[#allocation2 + $0x10] sm:$0xff]  ;;  %4800 = vrot.lane.b32.xlu1 %v4659_v24, %s6992_s20 }
 0x4d4   : > { %v4990_v48 = vadd.f32 %v9259_v4, %v4951_v51  ;;  %v4952_v10 = vmul.f32 %v9253_v30, %v4913_v23  ;;  %v5021_v53 = vmax.f32 %v4989_v39, 0.0 }
 0x4d5   : > { %v4914_v6 = vld [vmem:[#allocation2 + $0x18] sm:$0xff]  ;;  %4802 = vrot.lane.b32.xlu0 %v4664_v25, %s6992_s20 }
 0x4d6   : > { %v5022_v7 = vmax.f32 %v4990_v48, 0.0  ;;  %v4953_v60 = vmul.f32 %v9253_v30, %v4914_v6  ;;  %v4991_v57 = vadd.f32 %v9259_v4, %v4952_v10 }
 0x4d7   : > { %4804 = vrot.lane.b32.xlu1 %v4667_v20, %s6992_s20 }
 0x4d8   : > { %v5053_v45 = vpack.c.bf16 %v5022_v7, %v5021_v53  ;;  %v4992_v41 = vadd.f32 %v9259_v4, %v4953_v60  ;;  %v5023_v28 = vmax.f32 %v4991_v57, 0.0 }
 0x4da   : > { %5602 = vmatprep.mubr.msk.bf16.mxu0 %vm2115_vm4, %v5053_v45  ;;  %v5024_v49 = vmax.f32 %v4992_v41, 0.0 }
 0x4dc   : > { %v5054_v55 = vpack.c.bf16 %v5024_v49, %v5023_v28 }
 0x4de   : > { %v5582_v62 = vpop.f32.mrb[28].mxu1  ;;  %5603 = vmatmul.mubr.msk.bf16.vlgmr.msra.gmra.mrb[16].mxu0 %vm2115_vm4, %v5054_v55 }
 0x4df   : > { %v4671_v32 = vpop.f32.mrb[29].mxu1  ;;  %v4680_v0 = vadd.f32 %v5582_v62, %v9226_v29 }
 0x4e0   : > { %v4672_v27 = vadd.f32 %v9226_v29, %v4671_v32  ;;  %v5583_v3 = vpop.f32.mrb[30].mxu1 }
 0x4e1   : > { %v4674_v11 = vpop.f32.mrb[31].mxu1  ;;  %v4683_v31 = vadd.f32 %v5583_v3, %v9226_v29 }
 0x4e2   : > { %v4675_v17 = vadd.f32 %v9226_v29, %v4674_v11  ;;  %4806 = vrot.lane.b32.xlu0 %v4672_v27, %s6992_s20 }
 0x4e4   : > { %4808 = vrot.lane.b32.xlu1 %v4675_v17, %s6992_s20 }
 0x4e6   : > { %v5586_v34 = vpop.f32.mrb[32].mxu1  ;;  %4810 = vrot.lane.b32.xlu0 %v4680_v0, %s6992_s20 }
 0x4e7   : > { %v4687_v13 = vpop.f32.mrb[33].mxu1  ;;  %v4696_v18 = vadd.f32 %v5586_v34, %v9226_v29 }
 0x4e8   : > { %v4688_v37 = vadd.f32 %v9226_v29, %v4687_v13  ;;  %v5587_v40 = vpop.f32.mrb[34].mxu1  ;;  %4812 = vrot.lane.b32.xlu1 %v4683_v31, %s6992_s20 }
 0x4e9   : > { %v4690_v42 = vpop.f32.mrb[35].mxu1  ;;  %v4699_v22 = vadd.f32 %v5587_v40, %v9226_v29 }
 0x4ea   : > { %v4691_v38 = vadd.f32 %v9226_v29, %v4690_v42  ;;  %4814 = vrot.lane.b32.xlu0 %v4688_v37, %s6992_s20 }
 0x4ec   : > { %4816 = vrot.lane.b32.xlu1 %v4691_v38, %s6992_s20 }
 0x4ee   : > { %v5590_v50 = vpop.f32.mrb[36].mxu1  ;;  %4818 = vrot.lane.b32.xlu0 %v4696_v18, %s6992_s20 }
 0x4ef   : > { %v4703_v9 = vpop.f32.mrb[37].mxu1  ;;  %v4712_v59 = vadd.f32 %v5590_v50, %v9226_v29 }
 0x4f0   : > { %v4704_v16 = vadd.f32 %v9226_v29, %v4703_v9  ;;  %v5591_v21 = vpop.f32.mrb[38].mxu1  ;;  %4820 = vrot.lane.b32.xlu1 %v4699_v22, %s6992_s20 }
 0x4f1   : > { %v4706_v54 = vpop.f32.mrb[39].mxu1  ;;  %v4715_v36 = vadd.f32 %v5591_v21, %v9226_v29 }
 0x4f2   : > { %v4707_v44 = vadd.f32 %v9226_v29, %v4706_v54  ;;  %4822 = vrot.lane.b32.xlu0 %v4704_v16, %s6992_s20 }
 0x4f4   : > { %4824 = vrot.lane.b32.xlu1 %v4707_v44, %s6992_s20 }
 0x4f6   : > { %v5594_v33 = vpop.f32.mrb[40].mxu1  ;;  %4826 = vrot.lane.b32.xlu0 %v4712_v59, %s6992_s20 }
 0x4f7   : > { %v4719_v56 = vpop.f32.mrb[41].mxu1  ;;  %v4728_v12 = vadd.f32 %v5594_v33, %v9226_v29 }
 0x4f8   : > { %v4720_v14 = vadd.f32 %v9226_v29, %v4719_v56  ;;  %v5595_v26 = vpop.f32.mrb[42].mxu1  ;;  %4828 = vrot.lane.b32.xlu1 %v4715_v36, %s6992_s20 }
 0x4f9   : > { %v4722_v5 = vpop.f32.mrb[43].mxu1  ;;  %v4731_v61 = vadd.f32 %v5595_v26, %v9226_v29 }
 0x4fa   : > { %v4723_v63 = vadd.f32 %v9226_v29, %v4722_v5  ;;  %4830 = vrot.lane.b32.xlu0 %v4720_v14, %s6992_s20 }
 0x4fc   : > { %4832 = vrot.lane.b32.xlu1 %v4723_v63, %s6992_s20 }
 0x4fe   : > { %4834 = vrot.lane.b32.xlu0 %v4728_v12, %s6992_s20 }
 0x500   : > { %4836 = vrot.lane.b32.xlu1 %v4731_v61, %s6992_s20  ;;  %v5598_v47 = vpop.f32.mrb[44].mxu1 }
 0x501   : > { %v4735_v8 = vpop.f32.mrb[45].mxu1  ;;  %v4744_v52 = vadd.f32 %v5598_v47, %v9226_v29 }
 0x502   : > { %v4736_v19 = vadd.f32 %v9226_v29, %v4735_v8  ;;  %v5599_v2 = vpop.f32.mrb[46].mxu1 }
 0x503   : > { %v4738_v15 = vpop.f32.mrb[47].mxu1  ;;  %v4747_v46 = vadd.f32 %v5599_v2, %v9226_v29 }
 0x504   : > { %v4739_v58 = vadd.f32 %v9226_v29, %v4738_v15  ;;  %4838 = vrot.lane.b32.xlu0 %v4736_v19, %s6992_s20 }
 0x506   : > { %4840 = vrot.lane.b32.xlu1 %v4739_v58, %s6992_s20 }
 0x508   : > { %v4791_v35 = vpop.permute.xlu0 %4790  ;;  %4842 = vrot.lane.b32.xlu0 %v4744_v52, %s6992_s20 }
 0x509   : > { %4883 = vst.msk [vmem:[#allocation2 + $0x20] sm:$0xff] %vm4878_vm3, %v4791_v35 }
 0x50a   : > { %v4793_v1 = vpop.permute.xlu1 %4792  ;;  %4844 = vrot.lane.b32.xlu1 %v4747_v46, %s6992_s20 }
 0x50b   : > { %4884 = vst.msk [vmem:[#allocation2 + $0x28] sm:$0xff] %vm4878_vm3, %v4793_v1 }
 0x50c   : > { %v4795_v43 = vpop.permute.xlu0 %4794 }
 0x50d   : > { %4885 = vst.msk [vmem:[#allocation2 + $0x30] sm:$0xff] %vm4878_vm3, %v4795_v43 }
 0x50e   : > { %v4797_v24 = vpop.permute.xlu1 %4796 }
 0x50f   : > { %4886 = vst.msk [vmem:[#allocation2 + $0x38] sm:$0xff] %vm4878_vm3, %v4797_v24 }
 0x510   : > { %v4915_v51 = vld [vmem:[#allocation2 + $0x20] sm:$0xff] }
 0x511   : > { %v4954_v39 = vmul.f32 %v9253_v30, %v4915_v51 }
 0x512   : > { %v4916_v29 = vld [vmem:[#allocation2 + $0x28] sm:$0xff] }
 0x513   : > { %v4955_v23 = vmul.f32 %v9253_v30, %v4916_v29  ;;  %v4993_v25 = vadd.f32 %v9259_v4, %v4954_v39 }
 0x514   : > { %v4917_v48 = vld [vmem:[#allocation2 + $0x30] sm:$0xff] }
 0x515   : > { %v4994_v10 = vadd.f32 %v9259_v4, %v4955_v23  ;;  %v4956_v20 = vmul.f32 %v9253_v30, %v4917_v48  ;;  %v5025_v53 = vmax.f32 %v4993_v25, 0.0 }
 0x516   : > { %v4918_v6 = vld [vmem:[#allocation2 + $0x38] sm:$0xff] }
 0x517   : > { %v5026_v7 = vmax.f32 %v4994_v10, 0.0  ;;  %v4957_v60 = vmul.f32 %v9253_v30, %v4918_v6  ;;  %v4995_v57 = vadd.f32 %v9259_v4, %v4956_v20 }
 0x519   : > { %v5055_v45 = vpack.c.bf16 %v5026_v7, %v5025_v53  ;;  %v4996_v41 = vadd.f32 %v9259_v4, %v4957_v60  ;;  %v5027_v62 = vmax.f32 %v4995_v57, 0.0 }
 0x51b   : > { %5606 = vmatprep.mubr.msk.bf16.mxu0 %vm2115_vm4, %v5055_v45  ;;  %v5028_v28 = vmax.f32 %v4996_v41, 0.0 }
 0x51d   : > { %v5056_v49 = vpack.c.bf16 %v5028_v28, %v5027_v62 }
 0x51f   : > { %5607 = vmatmul.mubr.msk.bf16.gmra.mrb[20].mxu0 %vm2115_vm4, %v5056_v49 }
 0x543   : > { %v4799_v32 = vpop.permute.xlu0 %4798 }
 0x544   : > { %4887 = vst.msk [vmem:[#allocation2 + $0x40] sm:$0xff] %vm4878_vm3, %v4799_v32 }
 0x545   : > { %v4801_v27 = vpop.permute.xlu1 %4800 }
 0x546   : > { %4888 = vst.msk [vmem:[#allocation2 + $0x48] sm:$0xff] %vm4878_vm3, %v4801_v27 }
 0x547   : > { %v4803_v3 = vpop.permute.xlu0 %4802 }
 0x548   : > { %4889 = vst.msk [vmem:[#allocation2 + $0x50] sm:$0xff] %vm4878_vm3, %v4803_v3 }
 0x549   : > { %v4805_v55 = vpop.permute.xlu1 %4804 }
 0x54a   : > { %4890 = vst.msk [vmem:[#allocation2 + $0x58] sm:$0xff] %vm4878_vm3, %v4805_v55 }
 0x54b   : > { %v4919_v11 = vld [vmem:[#allocation2 + $0x40] sm:$0xff] }
 0x54c   : > { %v4958_v17 = vmul.f32 %v9253_v30, %v4919_v11 }
 0x54d   : > { %v4920_v0 = vld [vmem:[#allocation2 + $0x48] sm:$0xff] }
 0x54e   : > { %v4959_v31 = vmul.f32 %v9253_v30, %v4920_v0  ;;  %v4997_v34 = vadd.f32 %v9259_v4, %v4958_v17 }
 0x54f   : > { %v4921_v37 = vld [vmem:[#allocation2 + $0x50] sm:$0xff] }
 0x550   : > { %v4998_v40 = vadd.f32 %v9259_v4, %v4959_v31  ;;  %v4960_v42 = vmul.f32 %v9253_v30, %v4921_v37  ;;  %v5029_v22 = vmax.f32 %v4997_v34, 0.0 }
 0x551   : > { %v4922_v18 = vld [vmem:[#allocation2 + $0x58] sm:$0xff] }
 0x552   : > { %v5030_v50 = vmax.f32 %v4998_v40, 0.0  ;;  %v4961_v9 = vmul.f32 %v9253_v30, %v4922_v18  ;;  %v4999_v16 = vadd.f32 %v9259_v4, %v4960_v42 }
 0x554   : > { %v4807_v13 = vpop.permute.xlu0 %4806  ;;  %v5057_v54 = vpack.c.bf16 %v5030_v50, %v5029_v22  ;;  %v5000_v44 = vadd.f32 %v9259_v4, %v4961_v9  ;;  %v5031_v36 = vmax.f32 %v4999_v16, 0.0 }
 0x555   : > { %4891 = vst.msk [vmem:[#allocation2 + $0x60] sm:$0xff] %vm4878_vm3, %v4807_v13 }
 0x556   : > { %v4809_v38 = vpop.permute.xlu1 %4808  ;;  %5610 = vmatprep.mubr.msk.bf16.mxu0 %vm2115_vm4, %v5057_v54  ;;  %v5032_v33 = vmax.f32 %v5000_v44, 0.0 }
 0x557   : > { %4892 = vst.msk [vmem:[#allocation2 + $0x68] sm:$0xff] %vm4878_vm3, %v4809_v38 }
 0x558   : > { %v4811_v21 = vpop.permute.xlu0 %4810  ;;  %v5058_v26 = vpack.c.bf16 %v5032_v33, %v5031_v36 }
 0x559   : > { %4893 = vst.msk [vmem:[#allocation2 + $0x70] sm:$0xff] %vm4878_vm3, %v4811_v21 }
 0x55a   : > { %v4813_v59 = vpop.permute.xlu1 %4812  ;;  %5611 = vmatmul.mubr.msk.bf16.gmra.mrb[24].mxu0 %vm2115_vm4, %v5058_v26 }
 0x55b   : > { %4894 = vst.msk [vmem:[#allocation2 + $0x78] sm:$0xff] %vm4878_vm3, %v4813_v59 }
 0x55c   : > { %v4815_v56 = vpop.permute.xlu0 %4814  ;;  %v4923_v14 = vld [vmem:[#allocation2 + $0x60] sm:$0xff] }
 0x55d   : > { %4895 = vst.msk [vmem:[#allocation2 + $0x80] sm:$0xff] %vm4878_vm3, %v4815_v56  ;;  %v4962_v5 = vmul.f32 %v9253_v30, %v4923_v14 }
 0x55e   : > { %v4817_v63 = vpop.permute.xlu1 %4816  ;;  %v4924_v12 = vld [vmem:[#allocation2 + $0x68] sm:$0xff] }
 0x55f   : > { %4896 = vst.msk [vmem:[#allocation2 + $0x88] sm:$0xff] %vm4878_vm3, %v4817_v63  ;;  %v4963_v61 = vmul.f32 %v9253_v30, %v4924_v12  ;;  %v5001_v47 = vadd.f32 %v9259_v4, %v4962_v5 }
 0x560   : > { %v4819_v8 = vpop.permute.xlu0 %4818  ;;  %v4925_v19 = vld [vmem:[#allocation2 + $0x70] sm:$0xff] }
 0x561   : > { %4897 = vst.msk [vmem:[#allocation2 + $0x90] sm:$0xff] %vm4878_vm3, %v4819_v8  ;;  %v5002_v2 = vadd.f32 %v9259_v4, %v4963_v61  ;;  %v4964_v15 = vmul.f32 %v9253_v30, %v4925_v19  ;;  %v5033_v46 = vmax.f32 %v5001_v47, 0.0 }
 0x562   : > { %v4821_v58 = vpop.permute.xlu1 %4820  ;;  %v4926_v52 = vld [vmem:[#allocation2 + $0x78] sm:$0xff] }
 0x563   : > { %4898 = vst.msk [vmem:[#allocation2 + $0x98] sm:$0xff] %vm4878_vm3, %v4821_v58  ;;  %v5034_v35 = vmax.f32 %v5002_v2, 0.0  ;;  %v4965_v1 = vmul.f32 %v9253_v30, %v4926_v52  ;;  %v5003_v43 = vadd.f32 %v9259_v4, %v4964_v15 }
 0x564   : > { %v4823_v24 = vpop.permute.xlu0 %4822  ;;  %v4927_v51 = vld [vmem:[#allocation2 + $0x80] sm:$0xff] }
 0x565   : > { %4899 = vst.msk [vmem:[#allocation2 + $0xa0] sm:$0xff] %vm4878_vm3, %v4823_v24  ;;  %v5059_v39 = vpack.c.bf16 %v5034_v35, %v5033_v46  ;;  %v5004_v29 = vadd.f32 %v9259_v4, %v4965_v1  ;;  %v4966_v23 = vmul.f32 %v9253_v30, %v4927_v51  ;;  %v5035_v10 = vmax.f32 %v5003_v43, 0.0 }
 0x566   : > { %v4825_v25 = vpop.permute.xlu1 %4824  ;;  %v4928_v48 = vld [vmem:[#allocation2 + $0x88] sm:$0xff] }
 0x567   : > { %4900 = vst.msk [vmem:[#allocation2 + $0xa8] sm:$0xff] %vm4878_vm3, %v4825_v25  ;;  %5614 = vmatprep.mubr.msk.bf16.mxu0 %vm2115_vm4, %v5059_v39  ;;  %v5036_v20 = vmax.f32 %v5004_v29, 0.0  ;;  %v4967_v6 = vmul.f32 %v9253_v30, %v4928_v48  ;;  %v5005_v53 = vadd.f32 %v9259_v4, %v4966_v23 }
 0x568   : > { %v4827_v7 = vpop.permute.xlu0 %4826  ;;  %v4929_v60 = vld [vmem:[#allocation2 + $0x90] sm:$0xff] }
 0x569   : > { %4901 = vst.msk [vmem:[#allocation2 + $0xb0] sm:$0xff] %vm4878_vm3, %v4827_v7  ;;  %v5060_v57 = vpack.c.bf16 %v5036_v20, %v5035_v10  ;;  %v5006_v45 = vadd.f32 %v9259_v4, %v4967_v6  ;;  %v4968_v41 = vmul.f32 %v9253_v30, %v4929_v60  ;;  %v5037_v49 = vmax.f32 %v5005_v53, 0.0 }
 0x56a   : > { %v4829_v62 = vpop.permute.xlu1 %4828  ;;  %v4930_v28 = vld [vmem:[#allocation2 + $0x98] sm:$0xff] }
 0x56b   : > { %4902 = vst.msk [vmem:[#allocation2 + $0xb8] sm:$0xff] %vm4878_vm3, %v4829_v62  ;;  %5615 = vmatmul.mubr.msk.bf16.gmra.mrb[28].mxu0 %vm2115_vm4, %v5060_v57  ;;  %v5038_v32 = vmax.f32 %v5006_v45, 0.0  ;;  %v4969_v27 = vmul.f32 %v9253_v30, %v4930_v28  ;;  %v5007_v3 = vadd.f32 %v9259_v4, %v4968_v41 }
 0x56c   : > { %v4831_v55 = vpop.permute.xlu0 %4830  ;;  %v4931_v11 = vld [vmem:[#allocation2 + $0xa0] sm:$0xff] }
 0x56d   : > { %4903 = vst.msk [vmem:[#allocation2 + $0xc0] sm:$0xff] %vm4878_vm3, %v4831_v55  ;;  %v5061_v17 = vpack.c.bf16 %v5038_v32, %v5037_v49  ;;  %v5008_v0 = vadd.f32 %v9259_v4, %v4969_v27  ;;  %v4970_v31 = vmul.f32 %v9253_v30, %v4931_v11  ;;  %v5039_v37 = vmax.f32 %v5007_v3, 0.0 }
 0x56e   : > { %v4833_v34 = vpop.permute.xlu1 %4832  ;;  %v4932_v13 = vld [vmem:[#allocation2 + $0xa8] sm:$0xff] }
 0x56f   : > { %4904 = vst.msk [vmem:[#allocation2 + $0xc8] sm:$0xff] %vm4878_vm3, %v4833_v34  ;;  %5618 = vmatprep.mubr.msk.bf16.mxu0 %vm2115_vm4, %v5061_v17  ;;  %v5040_v40 = vmax.f32 %v5008_v0, 0.0  ;;  %v4971_v42 = vmul.f32 %v9253_v30, %v4932_v13  ;;  %v5009_v38 = vadd.f32 %v9259_v4, %v4970_v31  ;;  %v9420_v34 = vld [vmem:[%s9540_s12] ss:$0 sm:$0xff] }
 0x570   : > { %v4835_v18 = vpop.permute.xlu0 %4834  ;;  %v4933_v22 = vld [vmem:[#allocation2 + $0xb0] sm:$0xff] }
 0x571   : > { %4905 = vst.msk [vmem:[#allocation2 + $0xd0] sm:$0xff] %vm4878_vm3, %v4835_v18  ;;  %v5062_v50 = vpack.c.bf16 %v5040_v40, %v5039_v37  ;;  %v5010_v9 = vadd.f32 %v9259_v4, %v4971_v42  ;;  %v4972_v16 = vmul.f32 %v9253_v30, %v4933_v22  ;;  %v5041_v44 = vmax.f32 %v5009_v38, 0.0 }
 0x572   : > { %v4837_v21 = vpop.permute.xlu1 %4836  ;;  %v4934_v54 = vld [vmem:[#allocation2 + $0xb8] sm:$0xff] }
 0x573   : > { %4906 = vst.msk [vmem:[#allocation2 + $0xd8] sm:$0xff] %vm4878_vm3, %v4837_v21  ;;  %5619 = vmatmul.mubr.msk.bf16.gmra.mrb[32].mxu0 %vm2115_vm4, %v5062_v50  ;;  %v5042_v59 = vmax.f32 %v5010_v9, 0.0  ;;  %v4973_v36 = vmul.f32 %v9253_v30, %v4934_v54  ;;  %v5011_v33 = vadd.f32 %v9259_v4, %v4972_v16 }
 0x574   : > { %v4935_v56 = vld [vmem:[#allocation2 + $0xc0] sm:$0xff] }
 0x575   : > { %v5063_v14 = vpack.c.bf16 %v5042_v59, %v5041_v44  ;;  %v5012_v26 = vadd.f32 %v9259_v4, %v4973_v36  ;;  %v4974_v5 = vmul.f32 %v9253_v30, %v4935_v56  ;;  %v5043_v12 = vmax.f32 %v5011_v33, 0.0 }
 0x576   : > { %v4936_v63 = vld [vmem:[#allocation2 + $0xc8] sm:$0xff]  ;;  %v4839_v52 = vpop.permute.xlu0 %4838 }
 0x577   : > { %5622 = vmatprep.mubr.msk.bf16.mxu0 %vm2115_vm4, %v5063_v14  ;;  %v5044_v61 = vmax.f32 %v5012_v26, 0.0  ;;  %v4975_v47 = vmul.f32 %v9253_v30, %v4936_v63  ;;  %v5013_v8 = vadd.f32 %v9259_v4, %v4974_v5  ;;  %4907 = vst.msk [vmem:[#allocation2 + $0xe0] sm:$0xff] %vm4878_vm3, %v4839_v52 }
 0x578   : > { %v4937_v19 = vld [vmem:[#allocation2 + $0xd0] sm:$0xff]  ;;  %v4841_v51 = vpop.permute.xlu1 %4840 }
 0x579   : > { %v5064_v2 = vpack.c.bf16 %v5044_v61, %v5043_v12  ;;  %v5014_v15 = vadd.f32 %v9259_v4, %v4975_v47  ;;  %v4976_v58 = vmul.f32 %v9253_v30, %v4937_v19  ;;  %v5045_v35 = vmax.f32 %v5013_v8, 0.0  ;;  %4908 = vst.msk [vmem:[#allocation2 + $0xe8] sm:$0xff] %vm4878_vm3, %v4841_v51 }
 0x57a   : > { %v4938_v46 = vld [vmem:[#allocation2 + $0xd8] sm:$0xff]  ;;  %v4843_v23 = vpop.permute.xlu0 %4842 }
 0x57b   : > { %5623 = vmatmul.mubr.msk.bf16.gmra.mrb[36].mxu0 %vm2115_vm4, %v5064_v2  ;;  %v5046_v1 = vmax.f32 %v5014_v15, 0.0  ;;  %v4977_v43 = vmul.f32 %v9253_v30, %v4938_v46  ;;  %v5015_v24 = vadd.f32 %v9259_v4, %v4976_v58  ;;  %4909 = vst.msk [vmem:[#allocation2 + $0xf0] sm:$0xff] %vm4878_vm3, %v4843_v23 }
 0x57c   : > { %v4845_v10 = vpop.permute.xlu1 %4844 }
 0x57d   : > { %v5065_v39 = vpack.c.bf16 %v5046_v1, %v5045_v35  ;;  %v5016_v29 = vadd.f32 %v9259_v4, %v4977_v43  ;;  %v5047_v25 = vmax.f32 %v5015_v24, 0.0  ;;  %4910 = vst.msk [vmem:[#allocation2 + $0xf8] sm:$0xff] %vm4878_vm3, %v4845_v10 }
 0x57e   : > { %v4939_v6 = vld [vmem:[#allocation2 + $0xe0] sm:$0xff] }
 0x57f   : > { %5626 = vmatprep.mubr.msk.bf16.mxu0 %vm2115_vm4, %v5065_v39  ;;  %v5048_v48 = vmax.f32 %v5016_v29, 0.0  ;;  %v4978_v53 = vmul.f32 %v9253_v30, %v4939_v6 }
 0x580   : > { %v4940_v7 = vld [vmem:[#allocation2 + $0xe8] sm:$0xff] }
 0x581   : > { %v5066_v20 = vpack.c.bf16 %v5048_v48, %v5047_v25  ;;  %v4979_v60 = vmul.f32 %v9253_v30, %v4940_v7  ;;  %v5017_v57 = vadd.f32 %v9259_v4, %v4978_v53 }
 0x582   : > { %v4941_v45 = vld [vmem:[#allocation2 + $0xf0] sm:$0xff] }
 0x583   : > { %5627 = vmatmul.mubr.msk.bf16.gmra.mrb[40].mxu0 %vm2115_vm4, %v5066_v20  ;;  %v5018_v41 = vadd.f32 %v9259_v4, %v4979_v60  ;;  %v4980_v62 = vmul.f32 %v9253_v30, %v4941_v45  ;;  %v5049_v49 = vmax.f32 %v5017_v57, 0.0 }
 0x584   : > { %v4942_v28 = vld [vmem:[#allocation2 + $0xf8] sm:$0xff] }
 0x585   : > { %v5050_v32 = vmax.f32 %v5018_v41, 0.0  ;;  %v4981_v27 = vmul.f32 %v9253_v30, %v4942_v28  ;;  %v5019_v3 = vadd.f32 %v9259_v4, %v4980_v62 }
 0x587   : > { %v5067_v55 = vpack.c.bf16 %v5050_v32, %v5049_v49  ;;  %v5020_v11 = vadd.f32 %v9259_v4, %v4981_v27  ;;  %v5051_v17 = vmax.f32 %v5019_v3, 0.0 }
 0x589   : > { %5630 = vmatprep.mubr.msk.bf16.mxu0 %vm2115_vm4, %v5067_v55  ;;  %v5052_v0 = vmax.f32 %v5020_v11, 0.0 }
 0x58b   : > { %v5068_v31 = vpack.c.bf16 %v5052_v0, %v5051_v17 }
 0x58d   : > { %5631 = vmatmul.mubr.msk.bf16.gmra.mrb[44].mxu0 %vm2115_vm4, %v5068_v31 }
 0x5b1   : > { %v5604_v30 = vpop.f32.mrb[16].mxu0 }
 0x5b2   : > { %v5178_v4 = vadd.f32 %v5604_v30, %v9420_v34  ;;  %v5169_v13 = vpop.f32.mrb[17].mxu0 }
 0x5b3   : > { %v5170_v37 = vadd.f32 %v9420_v34, %v5169_v13  ;;  %v5605_v40 = vpop.f32.mrb[18].mxu0 }
 0x5b4   : > { %5299 = vst.msk [vmem:[%s9427_s23 + $0x10] sm:$0xff] %vm5296_vm5, %v5178_v4  ;;  %v5181_v42 = vadd.f32 %v5605_v40, %v9420_v34  ;;  %v5172_v38 = vpop.f32.mrb[19].mxu0 }
 0x5b5   : > { %5297 = vst.msk [vmem:[%s9427_s23] sm:$0xff] %vm5296_vm5, %v5170_v37  ;;  %v5173_v18 = vadd.f32 %v9420_v34, %v5172_v38 }
 0x5b6   : > { %5300 = vst.msk [vmem:[%s9427_s23 + $0x18] sm:$0xff] %vm5296_vm5, %v5181_v42 }
 0x5b7   : > { %5298 = vst.msk [vmem:[%s9427_s23 + $0x8] sm:$0xff] %vm5296_vm5, %v5173_v18 }
 0x5f2   : > { %v5608_v22 = vpop.f32.mrb[20].mxu0 }
 0x5f3   : > { %v5194_v50 = vadd.f32 %v5608_v22, %v9420_v34  ;;  %v5185_v9 = vpop.f32.mrb[21].mxu0 }
 0x5f4   : > { %v5186_v16 = vadd.f32 %v9420_v34, %v5185_v9  ;;  %v5609_v21 = vpop.f32.mrb[22].mxu0 }
 0x5f5   : > { %5303 = vst.msk [vmem:[%s9427_s23 + $0x30] sm:$0xff] %vm5296_vm5, %v5194_v50  ;;  %v5197_v54 = vadd.f32 %v5609_v21, %v9420_v34  ;;  %v5188_v44 = vpop.f32.mrb[23].mxu0 }
 0x5f6   : > { %5301 = vst.msk [vmem:[%s9427_s23 + $0x20] sm:$0xff] %vm5296_vm5, %v5186_v16  ;;  %v5189_v59 = vadd.f32 %v9420_v34, %v5188_v44 }
 0x5f7   : > { %5304 = vst.msk [vmem:[%s9427_s23 + $0x38] sm:$0xff] %vm5296_vm5, %v5197_v54 }
 0x5f8   : > { %5302 = vst.msk [vmem:[%s9427_s23 + $0x28] sm:$0xff] %vm5296_vm5, %v5189_v59 }
 0x62d   : > { %v5612_v36 = vpop.f32.mrb[24].mxu0 }
 0x62e   : > { %v5210_v33 = vadd.f32 %v5612_v36, %v9420_v34  ;;  %v5201_v56 = vpop.f32.mrb[25].mxu0 }
 0x62f   : > { %v5202_v14 = vadd.f32 %v9420_v34, %v5201_v56  ;;  %v5613_v26 = vpop.f32.mrb[26].mxu0 }
 0x630   : > { %5307 = vst.msk [vmem:[%s9427_s23 + $0x50] sm:$0xff] %vm5296_vm5, %v5210_v33  ;;  %v5213_v5 = vadd.f32 %v5613_v26, %v9420_v34  ;;  %v5204_v63 = vpop.f32.mrb[27].mxu0 }
 0x631   : > { %5305 = vst.msk [vmem:[%s9427_s23 + $0x40] sm:$0xff] %vm5296_vm5, %v5202_v14  ;;  %v5205_v12 = vadd.f32 %v9420_v34, %v5204_v63 }
 0x632   : > { %5308 = vst.msk [vmem:[%s9427_s23 + $0x58] sm:$0xff] %vm5296_vm5, %v5213_v5 }
 0x633   : > { %5306 = vst.msk [vmem:[%s9427_s23 + $0x48] sm:$0xff] %vm5296_vm5, %v5205_v12 }
 0x63e   : > { %v5616_v61 = vpop.f32.mrb[28].mxu0 }
 0x63f   : > { %v5226_v47 = vadd.f32 %v5616_v61, %v9420_v34  ;;  %v5217_v8 = vpop.f32.mrb[29].mxu0 }
 0x640   : > { %v5218_v19 = vadd.f32 %v9420_v34, %v5217_v8  ;;  %v5617_v2 = vpop.f32.mrb[30].mxu0 }
 0x641   : > { %5311 = vst.msk [vmem:[%s9427_s23 + $0x70] sm:$0xff] %vm5296_vm5, %v5226_v47  ;;  %v5229_v15 = vadd.f32 %v5617_v2, %v9420_v34  ;;  %v5220_v58 = vpop.f32.mrb[31].mxu0 }
 0x642   : > { %5309 = vst.msk [vmem:[%s9427_s23 + $0x60] sm:$0xff] %vm5296_vm5, %v5218_v19  ;;  %v5221_v52 = vadd.f32 %v9420_v34, %v5220_v58 }
 0x643   : > { %5312 = vst.msk [vmem:[%s9427_s23 + $0x78] sm:$0xff] %vm5296_vm5, %v5229_v15 }
 0x644   : > { %5310 = vst.msk [vmem:[%s9427_s23 + $0x68] sm:$0xff] %vm5296_vm5, %v5221_v52 }
 0x646   : > { %v5620_v46 = vpop.f32.mrb[32].mxu0 }
 0x647   : > { %v5242_v35 = vadd.f32 %v5620_v46, %v9420_v34  ;;  %v5233_v1 = vpop.f32.mrb[33].mxu0 }
 0x648   : > { %v5234_v43 = vadd.f32 %v9420_v34, %v5233_v1  ;;  %v5621_v24 = vpop.f32.mrb[34].mxu0 }
 0x649   : > { %5315 = vst.msk [vmem:[%s9427_s23 + $0x90] sm:$0xff] %vm5296_vm5, %v5242_v35  ;;  %v5245_v51 = vadd.f32 %v5621_v24, %v9420_v34  ;;  %v5236_v39 = vpop.f32.mrb[35].mxu0 }
 0x64a   : > { %5313 = vst.msk [vmem:[%s9427_s23 + $0x80] sm:$0xff] %vm5296_vm5, %v5234_v43  ;;  %v5237_v29 = vadd.f32 %v9420_v34, %v5236_v39 }
 0x64b   : > { %5316 = vst.msk [vmem:[%s9427_s23 + $0x98] sm:$0xff] %vm5296_vm5, %v5245_v51 }
 0x64c   : > { %5314 = vst.msk [vmem:[%s9427_s23 + $0x88] sm:$0xff] %vm5296_vm5, %v5237_v29 }
 0x64e   : > { %v5624_v23 = vpop.f32.mrb[36].mxu0 }
 0x64f   : > { %v5258_v25 = vadd.f32 %v5624_v23, %v9420_v34  ;;  %v5249_v48 = vpop.f32.mrb[37].mxu0 }
 0x650   : > { %v5250_v10 = vadd.f32 %v9420_v34, %v5249_v48  ;;  %v5625_v20 = vpop.f32.mrb[38].mxu0 }
 0x651   : > { %5319 = vst.msk [vmem:[%s9427_s23 + $0xb0] sm:$0xff] %vm5296_vm5, %v5258_v25  ;;  %v5261_v6 = vadd.f32 %v5625_v20, %v9420_v34  ;;  %v5252_v53 = vpop.f32.mrb[39].mxu0 }
 0x652   : > { %5317 = vst.msk [vmem:[%s9427_s23 + $0xa0] sm:$0xff] %vm5296_vm5, %v5250_v10  ;;  %v5253_v7 = vadd.f32 %v9420_v34, %v5252_v53 }
 0x653   : > { %5320 = vst.msk [vmem:[%s9427_s23 + $0xb8] sm:$0xff] %vm5296_vm5, %v5261_v6 }
 0x654   : > { %5318 = vst.msk [vmem:[%s9427_s23 + $0xa8] sm:$0xff] %vm5296_vm5, %v5253_v7 }
 0x656   : > { %v5628_v60 = vpop.f32.mrb[40].mxu0 }
 0x657   : > { %v5274_v57 = vadd.f32 %v5628_v60, %v9420_v34  ;;  %v5265_v45 = vpop.f32.mrb[41].mxu0 }
 0x658   : > { %v5266_v41 = vadd.f32 %v9420_v34, %v5265_v45  ;;  %v5629_v62 = vpop.f32.mrb[42].mxu0 }
 0x659   : > { %5323 = vst.msk [vmem:[%s9427_s23 + $0xd0] sm:$0xff] %vm5296_vm5, %v5274_v57  ;;  %v5277_v28 = vadd.f32 %v5629_v62, %v9420_v34  ;;  %v5268_v49 = vpop.f32.mrb[43].mxu0 }
 0x65a   : > { %5321 = vst.msk [vmem:[%s9427_s23 + $0xc0] sm:$0xff] %vm5296_vm5, %v5266_v41  ;;  %v5269_v32 = vadd.f32 %v9420_v34, %v5268_v49 }
 0x65b   : > { %5324 = vst.msk [vmem:[%s9427_s23 + $0xd8] sm:$0xff] %vm5296_vm5, %v5277_v28 }
 0x65c   : > { %5322 = vst.msk [vmem:[%s9427_s23 + $0xc8] sm:$0xff] %vm5296_vm5, %v5269_v32 }
 0x660   : > { %v5632_v27 = vpop.f32.mrb[44].mxu0 }
 0x661   : > { %v5290_v3 = vadd.f32 %v5632_v27, %v9420_v34  ;;  %v5281_v55 = vpop.f32.mrb[45].mxu0 }
 0x662   : > { %v5282_v11 = vadd.f32 %v9420_v34, %v5281_v55  ;;  %v5633_v17 = vpop.f32.mrb[46].mxu0 }
 0x663   : > { %5327 = vst.msk [vmem:[%s9427_s23 + $0xf0] sm:$0xff] %vm5296_vm5, %v5290_v3  ;;  %v5293_v0 = vadd.f32 %v5633_v17, %v9420_v34  ;;  %v5284_v31 = vpop.f32.mrb[47].mxu0 }
 0x664   : > { %5325 = vst.msk [vmem:[%s9427_s23 + $0xe0] sm:$0xff] %vm5296_vm5, %v5282_v11  ;;  %v5285_v30 = vadd.f32 %v9420_v34, %v5284_v31 }
 0x665   : > { %5328 = vst.msk [vmem:[%s9427_s23 + $0xf8] sm:$0xff] %vm5296_vm5, %v5293_v0 }
 0x666   : > { %5326 = vst.msk [vmem:[%s9427_s23 + $0xe8] sm:$0xff] %vm5296_vm5, %v5285_v30 }
 0x667 PF: > { %s23_s25 = sadd.s32 1, %s6988_s25  }
 0x668   : > { %p20_p4 = scmp.ge.s32.totalorder %s23_s25, 4  }
 0x66a   :  { %22 = sbr.rel (!%p20_p4) target bundleno = 1 (0x1), region = 104 }

</bundles_post_ra>
